<compile_context>
chip_gen: v5e
topology: v5e:2x2
jax: 0.10.0
libtpu: 0.0.40
codegen_flags: <defaults>
</compile_context>

<pallas_src>
import math
from functools import partial

import jax
import jax.numpy as jnp
from jax.experimental import pallas as pl
from jax.experimental.pallas import tpu as pltpu


_VMEM_LIMIT = 48 * 1024 * 1024   # <= v7x 64 MiB physical; generous on v5e/v6e (128 MiB)


# ----------------------------------------------------------------------------
# In-kernel helpers (traced inside the Pallas kernels)
# ----------------------------------------------------------------------------
def _mm(x, w_ref, b_ref):
    """bf16 x bf16 matmul with f32 accumulation + f32 row-bias add."""
    return jnp.dot(x.astype(jnp.bfloat16), w_ref[...],
                   preferred_element_type=jnp.float32) + b_ref[...]


def _add_ln(x, res, g, b):
    """Fused residual add + layernorm (all f32)."""
    y = x + res
    mu = jnp.mean(y, axis=-1, keepdims=True)
    var = jnp.mean(jnp.square(y - mu), axis=-1, keepdims=True)
    return (y - mu) * jax.lax.rsqrt(var + 1e-5) * g + b


def _attention(q, k, v, nh, mask=None, want_probs=False):
    """Head-batched multi-head attention over a block of Bt examples.

    q: [Bt, Lq, H]; k, v: [Bt, Lk, H] (f32; softmax scale already folded into
    the Q projection weights). Heads are folded into a single batch dimension
    of the dot_general — one MXU-friendly batched matmul instead of nh tiny
    d-wide matmuls with lane slices and a concat.
    mask: optional bool [Bt*nh, Lq, Lk] (True = keep).
    """
    Bt, Lq, H = q.shape
    Lk = k.shape[1]
    d = H // nh

    def heads(x, L):
        return (x.astype(jnp.bfloat16)          # single bf16 cast per operand
                  .reshape(Bt, L, nh, d)
                  .transpose(0, 2, 1, 3)
                  .reshape(Bt * nh, L, d))

    qh, kh, vh = heads(q, Lq), heads(k, Lk), heads(v, Lk)
    # scores: q @ k^T with heads as batch dim (no transpose materialized)
    s = jax.lax.dot_general(qh, kh, (((2,), (2,)), ((0,), (0,))),
                            preferred_element_type=jnp.float32)   # [Bt*nh, Lq, Lk]
    if mask is not None:
        s = jnp.where(mask, s, -1e10)
    s = s - jnp.max(s, axis=-1, keepdims=True)
    p = jnp.exp(s)
    # exact divide: these probabilities can be a model output, must sum to 1
    p = p / jnp.sum(p, axis=-1, keepdims=True)
    ctx = jax.lax.dot_general(p.astype(jnp.bfloat16), vh,
                              (((2,), (1,)), ((0,), (0,))),
                              preferred_element_type=jnp.float32)  # [Bt*nh, Lq, d]
    out = ctx.reshape(Bt, nh, Lq, d).transpose(0, 2, 1, 3).reshape(Bt, Lq, H)
    probs = p.reshape(Bt, nh, Lq, Lk) if want_probs else None
    return out, probs


# ----------------------------------------------------------------------------
# Fused encoder kernel: input proj + self-attn + LN + FFN + LN  (Bt examples)
# ----------------------------------------------------------------------------
def _encoder_kernel(src_ref, pos_ref, w_in, b_in, wqkv, bqkv, wo, bo,
                    g1, be1, w1, b1, w2, b2, g2, be2, o_ref, *, nh):
    Bt, S, P = src_ref.shape
    H = o_ref.shape[-1]
    src = src_ref[...].reshape(Bt * S, P)
    # (src @ w_in + b_in) * sqrt(H) is pre-folded into w_in / b_in.
    x = _mm(src, w_in, b_in)
    x = (x.reshape(Bt, S, H) + pos_ref[...][None]).reshape(Bt * S, H)

    # self attention (encoder path carries no mask in the reference forward)
    qkv = _mm(x, wqkv, bqkv)
    a, _ = _attention(qkv[:, :H].reshape(Bt, S, H),
                      qkv[:, H:2 * H].reshape(Bt, S, H),
                      qkv[:, 2 * H:].reshape(Bt, S, H), nh)
    a = _mm(a.reshape(Bt * S, H), wo, bo)
    x = _add_ln(x, a, g1[...], be1[...])

    # feed-forward
    hdn = jnp.maximum(_mm(x, w1, b1), 0.0)
    f = _mm(hdn, w2, b2)
    x = _add_ln(x, f, g2[...], be2[...])
    o_ref[...] = x.reshape(Bt, S, H).astype(o_ref.dtype)   # stored bf16


# ----------------------------------------------------------------------------
# Fused decoder kernel: self-attn + LN + cross-attn + LN + FFN + LN
# (fc_out is a separate vocab-tiled kernel)
# ----------------------------------------------------------------------------
def _decoder_kernel(x_ref, enc_ref, pad_ref,
                    wqkv, bqkv, wo1, bo1, g1, be1,
                    wq2, bq2, wkv2, bkv2, wo2, bo2, g2, be2,
                    w1, b1, w2, b2, g3, be3,
                    x_out_ref, attn_ref, *, nh):
    Bt, T, H = x_ref.shape
    S = enc_ref.shape[1]
    x = x_ref[...].reshape(Bt * T, H)       # token emb * sqrt(H) + pos (from outside)
    enc = enc_ref[...].reshape(Bt * S, H)   # bf16 encoder output

    # causal + key-padding mask built in-kernel (no [B*nh,T,T] HBM traffic)
    row = jax.lax.broadcasted_iota(jnp.int32, (T, T), 0)
    col = jax.lax.broadcasted_iota(jnp.int32, (T, T), 1)
    causal = col <= row                                         # [T, T]
    pad = pad_ref[...][:, 0, :] > 0.5                           # [Bt, T]
    mask = causal[None, None] & pad[:, None, None, :]           # [Bt, 1, T, T]
    mask = jnp.broadcast_to(mask, (Bt, nh, T, T)).reshape(Bt * nh, T, T)

    # masked self attention (probs never stored)
    qkv = _mm(x, wqkv, bqkv)
    a, _ = _attention(qkv[:, :H].reshape(Bt, T, H),
                      qkv[:, H:2 * H].reshape(Bt, T, H),
                      qkv[:, 2 * H:].reshape(Bt, T, H), nh, mask=mask)
    a = _mm(a.reshape(Bt * T, H), wo1, bo1)
    x = _add_ln(x, a, g1[...], be1[...])

    # cross attention (no source mask in the reference forward; probs returned)
    q = _mm(x, wq2, bq2)
    kv = _mm(enc, wkv2, bkv2)
    c, p = _attention(q.reshape(Bt, T, H),
                      kv[:, :H].reshape(Bt, S, H),
                      kv[:, H:].reshape(Bt, S, H), nh, want_probs=True)
    attn_ref[...] = p                        # one batched store, f32
    c = _mm(c.reshape(Bt * T, H), wo2, bo2)
    x = _add_ln(x, c, g2[...], be2[...])

    # feed-forward
    hdn = jnp.maximum(_mm(x, w1, b1), 0.0)
    f = _mm(hdn, w2, b2)
    x = _add_ln(x, f, g3[...], be3[...])

    x_out_ref[...] = x.reshape(Bt, T, H).astype(x_out_ref.dtype)   # bf16 for fc_out


# ----------------------------------------------------------------------------
# fc_out: vocab-tiled output projection (streams wout through VMEM)
# ----------------------------------------------------------------------------
def _fc_out_kernel(x_ref, w_ref, b_ref, o_ref):
    o_ref[...] = jnp.dot(x_ref[...], w_ref[...],
                         preferred_element_type=jnp.float32) + b_ref[...]


def _pick_tile(dim, prefs):
    for p in prefs:
        if dim > p and dim % p == 0:
            return p
    return dim      # fall back to the full extent (always a legal block)


def fc_out(x, w, b):
    M, H = x.shape
    V = w.shape[1]
    TM = _pick_tile(M, (512, 256, 128))
    TN = _pick_tile(V, (2048, 1024, 512, 256, 128))
    return pl.pallas_call(
        _fc_out_kernel,
        grid=(M // TM, V // TN),
        in_specs=[pl.BlockSpec((TM, H), lambda i, j: (i, 0)),
                  pl.BlockSpec((H, TN), lambda i, j: (0, j)),
                  pl.BlockSpec((1, TN), lambda i, j: (0, j))],
        out_specs=pl.BlockSpec((TM, TN), lambda i, j: (i, j)),
        out_shape=jax.ShapeDtypeStruct((M, V), jnp.float32),
        compiler_params=pltpu.CompilerParams(
            dimension_semantics=("parallel", "parallel"),
            vmem_limit_bytes=_VMEM_LIMIT),
    )(x, w, b)


# ----------------------------------------------------------------------------
# pallas_call wrappers for encoder / decoder
# ----------------------------------------------------------------------------
def _const_spec(arr):
    nd = arr.ndim
    return pl.BlockSpec(tuple(arr.shape), lambda b, _n=nd: (0,) * _n)


def _pick_bt(B, max_bt=8):
    """Largest divisor of B that is <= max_bt while keeping the grid >= 2
    (both v7x TensorCores busy) whenever B > 1."""
    if B <= 1:
        return 1
    for bt in range(min(B // 2, max_bt), 0, -1):
        if B % bt == 0:
            return bt
    return 1


def encode(ep, src, nh):
    B, S, P = src.shape
    H = ep["w_in"].shape[1]
    Bt = _pick_bt(B)
    pos = ep["pos"][:S]
    args = [src, pos, ep["w_in"], ep["b_in"], ep["wqkv"], ep["bqkv"],
            ep["wo"], ep["bo"], ep["g1"], ep["be1"], ep["w1"], ep["b1"],
            ep["w2"], ep["b2"], ep["g2"], ep["be2"]]
    in_specs = [pl.BlockSpec((Bt, S, P), lambda b: (b, 0, 0))] + \
               [_const_spec(a) for a in args[1:]]
    return pl.pallas_call(
        partial(_encoder_kernel, nh=nh),
        grid=(B // Bt,),
        in_specs=in_specs,
        out_specs=pl.BlockSpec((Bt, S, H), lambda b: (b, 0, 0)),
        out_shape=jax.ShapeDtypeStruct((B, S, H), jnp.bfloat16),
        compiler_params=pltpu.CompilerParams(
            dimension_semantics=("parallel",),
            vmem_limit_bytes=_VMEM_LIMIT),
    )(*args)


def decode(dp, x_emb, enc_src, pad_mask, nh):
    B, T, H = x_emb.shape
    S = enc_src.shape[1]
    Bt = _pick_bt(B)
    args = [x_emb, enc_src, pad_mask,
            dp["wqkv"], dp["bqkv"], dp["wo1"], dp["bo1"], dp["g1"], dp["be1"],
            dp["wq2"], dp["bq2"], dp["wkv2"], dp["bkv2"], dp["wo2"], dp["bo2"],
            dp["g2"], dp["be2"],
            dp["w1"], dp["b1"], dp["w2"], dp["b2"], dp["g3"], dp["be3"]]
    in_specs = ([pl.BlockSpec((Bt, T, H), lambda b: (b, 0, 0)),
                 pl.BlockSpec((Bt, S, H), lambda b: (b, 0, 0)),
                 pl.BlockSpec((Bt, 1, T), lambda b: (b, 0, 0))]
                + [_const_spec(a) for a in args[3:]])
    out_specs = [pl.BlockSpec((Bt, T, H), lambda b: (b, 0, 0)),
                 pl.BlockSpec((Bt, nh, T, S), lambda b: (b, 0, 0, 0))]
    out_shape = (jax.ShapeDtypeStruct((B, T, H), jnp.bfloat16),
                 jax.ShapeDtypeStruct((B, nh, T, S), jnp.float32))
    x_dec, attn = pl.pallas_call(
        partial(_decoder_kernel, nh=nh),
        grid=(B // Bt,),
        in_specs=in_specs,
        out_specs=out_specs,
        out_shape=out_shape,
        compiler_params=pltpu.CompilerParams(
            dimension_semantics=("parallel",),
            vmem_limit_bytes=_VMEM_LIMIT),
    )(*args)
    return x_dec, attn


# ----------------------------------------------------------------------------
# Parameter preparation: fuse QKV weights, fold scales (softmax scale into Wq,
# sqrt(H) into fc_in and tok_emb), cast matmul weights to bf16.
# ----------------------------------------------------------------------------
def prepare_params(params, n_heads):
    H = params["encoder"]["fc_in"]["w"].shape[1]
    d = H // n_heads
    scale = 1.0 / math.sqrt(d)
    sqrt_h = math.sqrt(H)
    bf = jnp.bfloat16

    def row(v):
        return v.reshape(1, -1).astype(jnp.float32)

    def fuse_qkv(p):
        w = jnp.concatenate([p["wq"] * scale, p["wk"], p["wv"]], axis=1).astype(bf)
        b = jnp.concatenate([p["bq"] * scale, p["bk"], p["bv"]], axis=0).reshape(1, -1)
        return w, b.astype(jnp.float32)

    enc = params["encoder"]
    el = enc["layer"]
    e_wqkv, e_bqkv = fuse_qkv(el["self_attn"])
    enc_prep = dict(
        w_in=(enc["fc_in"]["w"] * sqrt_h).astype(bf),
        b_in=row(enc["fc_in"]["b"] * sqrt_h),
        pos=enc["pos_emb"].astype(jnp.float32),
        wqkv=e_wqkv, bqkv=e_bqkv,
        wo=el["self_attn"]["wo"].astype(bf), bo=row(el["self_attn"]["bo"]),
        g1=row(el["ln1_g"]), be1=row(el["ln1_b"]),
        w1=el["ffn"]["w1"].astype(bf), b1=row(el["ffn"]["b1"]),
        w2=el["ffn"]["w2"].astype(bf), b2=row(el["ffn"]["b2"]),
        g2=row(el["ln2_g"]), be2=row(el["ln2_b"]),
    )

    dec = params["decoder"]
    dl = dec["layer"]
    d_wqkv, d_bqkv = fuse_qkv(dl["self_attn"])
    ca = dl["cross_attn"]
    dec_prep = dict(
        # sqrt(H) folded here -> no traced scalar math at forward time
        tok_emb=(dec["tok_emb"] * sqrt_h).astype(jnp.float32),
        pos=dec["pos_emb"].astype(jnp.float32),
        wqkv=d_wqkv, bqkv=d_bqkv,
        wo1=dl["self_attn"]["wo"].astype(bf), bo1=row(dl["self_attn"]["bo"]),
        g1=row(dl["ln1_g"]), be1=row(dl["ln1_b"]),
        wq2=(ca["wq"] * scale).astype(bf), bq2=row(ca["bq"] * scale),
        wkv2=jnp.concatenate([ca["wk"], ca["wv"]], axis=1).astype(bf),
        bkv2=row(jnp.concatenate([ca["bk"], ca["bv"]], axis=0)),
        wo2=ca["wo"].astype(bf), bo2=row(ca["bo"]),
        g2=row(dl["ln2_g"]), be2=row(dl["ln2_b"]),
        w1=dl["ffn"]["w1"].astype(bf), b1=row(dl["ffn"]["b1"]),
        w2=dl["ffn"]["w2"].astype(bf), b2=row(dl["ffn"]["b2"]),
        g3=row(dl["ln3_g"]), be3=row(dl["ln3_b"]),
        wout=dec["fc_out"]["w"].astype(bf), bout=row(dec["fc_out"]["b"]),
    )
    return {"encoder": enc_prep, "decoder": dec_prep}


# ----------------------------------------------------------------------------
# Pose2Text module (mirrors the PyTorch forward)
# ----------------------------------------------------------------------------
@partial(jax.jit, static_argnums=(3, 4))
def _forward(prep, src, trg, trg_pad_idx, n_heads):
    B, T = trg.shape
    pad = (trg != trg_pad_idx).astype(jnp.float32).reshape(B, 1, T)   # trg key-pad mask
    enc_src = encode(prep["encoder"], src.astype(jnp.float32), n_heads)   # bf16 [B,S,H]
    dp = prep["decoder"]
    x_emb = dp["tok_emb"][trg] + dp["pos"][None, :T, :]   # sqrt(H) already folded in
    x_dec, attention = decode(dp, x_emb, enc_src, pad, n_heads)
    V = dp["wout"].shape[1]
    H = x_dec.shape[-1]
    logits = fc_out(x_dec.reshape(B * T, H), dp["wout"], dp["bout"]).reshape(B, T, V)
    return logits, attention


class Pose2Text:
    def __init__(self, params, src_pad_idx, trg_pad_idx, n_heads):
        self.prep = prepare_params(params, n_heads)
        self.src_pad_idx = src_pad_idx   # kept for parity; reference forward never builds a src mask
        self.trg_pad_idx = trg_pad_idx
        self.n_heads = n_heads

    def forward(self, src, trg):
        return _forward(self.prep, src, trg, self.trg_pad_idx, self.n_heads)

    # TODO(synk): translate() is a host-side autoregressive greedy loop with a
    # data-dependent early break; not implemented as a kernel.
    # TODO(synk): dropout from the PyTorch model is omitted (inference-mode forward).


# ----------------------------------------------------------------------------
# Deterministic parameter init
# ----------------------------------------------------------------------------
def _dense(key, fan_in, fan_out):
    w = jax.random.normal(key, (fan_in, fan_out), jnp.float32) / math.sqrt(fan_in)
    b = jnp.zeros((fan_out,), jnp.float32)
    return {"w": w, "b": b}


def _mha_params(key, H):
    ks = jax.random.split(key, 4)
    dq, dk, dv, do = (_dense(k, H, H) for k in ks)
    return {"wq": dq["w"], "bq": dq["b"], "wk": dk["w"], "bk": dk["b"],
            "wv": dv["w"], "bv": dv["b"], "wo": do["w"], "bo": do["b"]}


def _ffn_params(key, H, F):
    k1, k2 = jax.random.split(key)
    d1, d2 = _dense(k1, H, F), _dense(k2, F, H)
    return {"w1": d1["w"], "b1": d1["b"], "w2": d2["w"], "b2": d2["b"]}


def init_params(key, pose_dim, hid, pf_dim, vocab, max_len):
    keys = jax.random.split(key, 16)
    enc_layer = {
        "self_attn": _mha_params(keys[0], hid),
        "ln1_g": jnp.ones((hid,), jnp.float32), "ln1_b": jnp.zeros((hid,), jnp.float32),
        "ffn": _ffn_params(keys[1], hid, pf_dim),
        "ln2_g": jnp.ones((hid,), jnp.float32), "ln2_b": jnp.zeros((hid,), jnp.float32),
    }
    dec_layer = {
        "self_attn": _mha_params(keys[2], hid),
        "ln1_g": jnp.ones((hid,), jnp.float32), "ln1_b": jnp.zeros((hid,), jnp.float32),
        "cross_attn": _mha_params(keys[3], hid),
        "ln2_g": jnp.ones((hid,), jnp.float32), "ln2_b": jnp.zeros((hid,), jnp.float32),
        "ffn": _ffn_params(keys[4], hid, pf_dim),
        "ln3_g": jnp.ones((hid,), jnp.float32), "ln3_b": jnp.zeros((hid,), jnp.float32),
    }
    return {
        "encoder": {
            "fc_in": _dense(keys[5], pose_dim, hid),
            "pos_emb": jax.random.normal(keys[6], (max_len, hid), jnp.float32) * 0.02,
            "layer": enc_layer,
        },
        "decoder": {
            "tok_emb": jax.random.normal(keys[7], (vocab, hid), jnp.float32) * 0.02,
            "pos_emb": jax.random.normal(keys[8], (max_len, hid), jnp.float32) * 0.02,
            "layer": dec_layer,
            "fc_out": _dense(keys[9], hid, vocab),
        },
    }


# ----------------------------------------------------------------------------
if __name__ == "__main__":
    B, S, P, T = 2, 16, 16, 8          # batch, src(pose) len, pose feat dim, trg len
    H, NH, F, V = 32, 4, 64, 32        # hidden, heads, ffn dim, vocab
    SRC_PAD, TRG_PAD = 0, 0

    key = jax.random.PRNGKey(0)
    kp, ksrc, ktrg = jax.random.split(key, 3)

    params = init_params(kp, pose_dim=P, hid=H, pf_dim=F, vocab=V, max_len=max(S, T))
    src = jax.random.normal(ksrc, (B, S, P), jnp.float32)
    trg = jax.random.randint(ktrg, (B, T), 1, V).astype(jnp.int32)
    trg = trg.at[1, T - 2:].set(TRG_PAD)   # introduce some target padding

    model = Pose2Text(params, src_pad_idx=SRC_PAD, trg_pad_idx=TRG_PAD, n_heads=NH)
    output, attention = model.forward(src, trg)
    jax.block_until_ready((output, attention))

    assert output.shape == (B, T, V)
    assert attention.shape == (B, NH, T, S)
    assert bool(jnp.all(jnp.isfinite(output))) and bool(jnp.all(jnp.isfinite(attention)))
    # attention rows must sum to ~1 (exact softmax divide on the probs path)
    assert bool(jnp.all(jnp.abs(jnp.sum(attention, axis=-1) - 1.0) < 1e-3))
    print("KERNEL_OK")
</pallas_src>

<mosaic_0001>
module attributes {stable_mosaic.version = 11 : i64} {
  func.func @_fc_out_kernel(%arg0: i32, %arg1: i32, %arg2: memref<16x32xbf16, #tpu.memory_space<vmem>>, %arg3: memref<32x32xbf16, #tpu.memory_space<vmem>>, %arg4: memref<1x32xf32, #tpu.memory_space<vmem>>, %arg5: memref<16x32xf32, #tpu.memory_space<vmem>>) attributes {dimension_semantics = [#tpu.dimension_semantics<parallel>, #tpu.dimension_semantics<parallel>], iteration_bounds = array<i64: 1, 1>, scalar_prefetch = 0 : i64, scratch_operands = 0 : i64, tpu.core_type = #tpu.core_type<tc>, window_params = [{transform_indices = @transform_0, window_bounds = array<i64: 16, 32>}, {transform_indices = @transform_1, window_bounds = array<i64: 32, 32>}, {transform_indices = @transform_2, window_bounds = array<i64: 1, 32>}, {transform_indices = @transform_3, window_bounds = array<i64: 16, 32>}]} {
    %c0 = arith.constant 0 : index
    %c0_0 = arith.constant 0 : index
    %0 = vector.load %arg2[%c0, %c0_0] : memref<16x32xbf16, #tpu.memory_space<vmem>>, vector<16x32xbf16>
    %c0_1 = arith.constant 0 : index
    %c0_2 = arith.constant 0 : index
    %1 = vector.load %arg3[%c0_1, %c0_2] : memref<32x32xbf16, #tpu.memory_space<vmem>>, vector<32x32xbf16>
    %cst = arith.constant dense<0.000000e+00> : vector<16x32xf32>
    %2 = tpu.matmul %0, %1, %cst {dimension_numbers = #tpu.dot_dimension_numbers<[1], [0], [0], [1], [0, 0, 1, 1], [], []>} : vector<16x32xbf16>, vector<32x32xbf16>, vector<16x32xf32> -> vector<16x32xf32>
    %c0_3 = arith.constant 0 : index
    %c0_4 = arith.constant 0 : index
    %3 = vector.load %arg4[%c0_3, %c0_4] : memref<1x32xf32, #tpu.memory_space<vmem>>, vector<1x32xf32>
    %4 = vector.broadcast %3 : vector<1x32xf32> to vector<16x32xf32>
    %5 = arith.addf %2, %4 : vector<16x32xf32>
    %c0_5 = arith.constant 0 : index
    %c0_6 = arith.constant 0 : index
    %6 = vector.load %arg5[%c0_5, %c0_6] : memref<16x32xf32, #tpu.memory_space<vmem>>, vector<16x32xf32>
    tpu.vector_store %arg5[%c0_5, %c0_6], %5 {strides = array<i32>} : memref<16x32xf32, #tpu.memory_space<vmem>>, vector<16x32xf32>,
    return
  }
  func.func @transform_0(%arg0: i32, %arg1: i32) -> (i32, i32) {
    %c0_i32 = arith.constant 0 : i32
    %c0_i32_0 = arith.constant 0 : i32
    return %arg0, %c0_i32 : i32, i32
  }
  func.func @transform_1(%arg0: i32, %arg1: i32) -> (i32, i32) {
    %c0_i32 = arith.constant 0 : i32
    %c0_i32_0 = arith.constant 0 : i32
    return %c0_i32, %arg1 : i32, i32
  }
  func.func @transform_2(%arg0: i32, %arg1: i32) -> (i32, i32) {
    %c0_i32 = arith.constant 0 : i32
    %c0_i32_0 = arith.constant 0 : i32
    return %c0_i32, %arg1 : i32, i32
  }
  func.func @transform_3(%arg0: i32, %arg1: i32) -> (i32, i32) {
    %c0_i32 = arith.constant 0 : i32
    return %arg0, %arg1 : i32, i32
  }
}

module attributes {stable_mosaic.version = 11 : i64} {
  func.func @_encoder_kernel(%arg0: i32, %arg1: memref<1x16x16xf32, #tpu.memory_space<vmem>>, %arg2: memref<16x32xf32, #tpu.memory_space<vmem>>, %arg3: memref<16x32xbf16, #tpu.memory_space<vmem>>, %arg4: memref<1x32xf32, #tpu.memory_space<vmem>>, %arg5: memref<32x96xbf16, #tpu.memory_space<vmem>>, %arg6: memref<1x96xf32, #tpu.memory_space<vmem>>, %arg7: memref<32x32xbf16, #tpu.memory_space<vmem>>, %arg8: memref<1x32xf32, #tpu.memory_space<vmem>>, %arg9: memref<1x32xf32, #tpu.memory_space<vmem>>, %arg10: memref<1x32xf32, #tpu.memory_space<vmem>>, %arg11: memref<32x64xbf16, #tpu.memory_space<vmem>>, %arg12: memref<1x64xf32, #tpu.memory_space<vmem>>, %arg13: memref<64x32xbf16, #tpu.memory_space<vmem>>, %arg14: memref<1x32xf32, #tpu.memory_space<vmem>>, %arg15: memref<1x32xf32, #tpu.memory_space<vmem>>, %arg16: memref<1x32xf32, #tpu.memory_space<vmem>>, %arg17: memref<1x16x32xbf16, #tpu.memory_space<vmem>>) attributes {dimension_semantics = [#tpu.dimension_semantics<parallel>], iteration_bounds = array<i64: 2>, scalar_prefetch = 0 : i64, scratch_operands = 0 : i64, tpu.core_type = #tpu.core_type<tc>, window_params = [{transform_indices = @transform_0, window_bounds = array<i64: 1, 16, 16>}, {pipeline_mode = #tpu.pipeline_mode<synchronous>, transform_indices = @transform_1, window_bounds = array<i64: 16, 32>}, {pipeline_mode = #tpu.pipeline_mode<synchronous>, transform_indices = @transform_2, window_bounds = array<i64: 16, 32>}, {pipeline_mode = #tpu.pipeline_mode<synchronous>, transform_indices = @transform_3, window_bounds = array<i64: 1, 32>}, {pipeline_mode = #tpu.pipeline_mode<synchronous>, transform_indices = @transform_4, window_bounds = array<i64: 32, 96>}, {pipeline_mode = #tpu.pipeline_mode<synchronous>, transform_indices = @transform_5, window_bounds = array<i64: 1, 96>}, {pipeline_mode = #tpu.pipeline_mode<synchronous>, transform_indices = @transform_6, window_bounds = array<i64: 32, 32>}, {pipeline_mode = #tpu.pipeline_mode<synchronous>, transform_indices = @transform_7, window_bounds = array<i64: 1, 32>}, {pipeline_mode = #tpu.pipeline_mode<synchronous>, transform_indices = @transform_8, window_bounds = array<i64: 1, 32>}, {pipeline_mode = #tpu.pipeline_mode<synchronous>, transform_indices = @transform_9, window_bounds = array<i64: 1, 32>}, {pipeline_mode = #tpu.pipeline_mode<synchronous>, transform_indices = @transform_10, window_bounds = array<i64: 32, 64>}, {pipeline_mode = #tpu.pipeline_mode<synchronous>, transform_indices = @transform_11, window_bounds = array<i64: 1, 64>}, {pipeline_mode = #tpu.pipeline_mode<synchronous>, transform_indices = @transform_12, window_bounds = array<i64: 64, 32>}, {pipeline_mode = #tpu.pipeline_mode<synchronous>, transform_indices = @transform_13, window_bounds = array<i64: 1, 32>}, {pipeline_mode = #tpu.pipeline_mode<synchronous>, transform_indices = @transform_14, window_bounds = array<i64: 1, 32>}, {pipeline_mode = #tpu.pipeline_mode<synchronous>, transform_indices = @transform_15, window_bounds = array<i64: 1, 32>}, {transform_indices = @transform_16, window_bounds = array<i64: 1, 16, 32>}]} {
    %c0 = arith.constant 0 : index
    %c0_0 = arith.constant 0 : index
    %c0_1 = arith.constant 0 : index
    %0 = vector.load %arg1[%c0, %c0_0, %c0_1] : memref<1x16x16xf32, #tpu.memory_space<vmem>>, vector<1x16x16xf32>
    %1 = vector.shape_cast %0 : vector<1x16x16xf32> to vector<16x16xf32>
    %2 = arith.truncf %1 : vector<16x16xf32> to vector<16x16xbf16>
    %c0_2 = arith.constant 0 : index
    %c0_3 = arith.constant 0 : index
    %3 = vector.load %arg3[%c0_2, %c0_3] : memref<16x32xbf16, #tpu.memory_space<vmem>>, vector<16x32xbf16>
    %cst = arith.constant dense<0.000000e+00> : vector<16x32xf32>
    %4 = tpu.matmul %2, %3, %cst {dimension_numbers = #tpu.dot_dimension_numbers<[1], [0], [0], [1], [0, 0, 1, 1], [], []>} : vector<16x16xbf16>, vector<16x32xbf16>, vector<16x32xf32> -> vector<16x32xf32>
    %c0_4 = arith.constant 0 : index
    %c0_5 = arith.constant 0 : index
    %5 = vector.load %arg4[%c0_4, %c0_5] : memref<1x32xf32, #tpu.memory_space<vmem>>, vector<1x32xf32>
    %6 = vector.broadcast %5 : vector<1x32xf32> to vector<16x32xf32>
    %7 = arith.addf %4, %6 : vector<16x32xf32>
    %8 = vector.shape_cast %7 : vector<16x32xf32> to vector<1x16x32xf32>
    %c0_6 = arith.constant 0 : index
    %c0_7 = arith.constant 0 : index
    %9 = vector.load %arg2[%c0_6, %c0_7] : memref<16x32xf32, #tpu.memory_space<vmem>>, vector<16x32xf32>
    %10 = vector.shape_cast %9 : vector<16x32xf32> to vector<1x16x32xf32>
    %11 = arith.addf %8, %10 : vector<1x16x32xf32>
    %12 = vector.shape_cast %11 : vector<1x16x32xf32> to vector<16x32xf32>
    %13 = arith.truncf %12 : vector<16x32xf32> to vector<16x32xbf16>
    %c0_8 = arith.constant 0 : index
    %c0_9 = arith.constant 0 : index
    %14 = vector.load %arg5[%c0_8, %c0_9] : memref<32x96xbf16, #tpu.memory_space<vmem>>, vector<32x96xbf16>
    %cst_10 = arith.constant dense<0.000000e+00> : vector<16x96xf32>
    %15 = tpu.matmul %13, %14, %cst_10 {dimension_numbers = #tpu.dot_dimension_numbers<[1], [0], [0], [1], [0, 0, 1, 1], [], []>} : vector<16x32xbf16>, vector<32x96xbf16>, vector<16x96xf32> -> vector<16x96xf32>
    %c0_11 = arith.constant 0 : index
    %c0_12 = arith.constant 0 : index
    %16 = vector.load %arg6[%c0_11, %c0_12] : memref<1x96xf32, #tpu.memory_space<vmem>>, vector<1x96xf32>
    %17 = vector.broadcast %16 : vector<1x96xf32> to vector<16x96xf32>
    %18 = arith.addf %15, %17 : vector<16x96xf32>
    %19 = vector.extract_strided_slice %18 {offsets = [0, 0], sizes = [16, 32], strides = [1, 1]} : vector<16x96xf32> to vector<16x32xf32>
    %20 = vector.shape_cast %19 : vector<16x32xf32> to vector<1x16x32xf32>
    %21 = vector.extract_strided_slice %18 {offsets = [0, 32], sizes = [16, 32], strides = [1, 1]} : vector<16x96xf32> to vector<16x32xf32>
    %22 = vector.shape_cast %21 : vector<16x32xf32> to vector<1x16x32xf32>
    %23 = vector.extract_strided_slice %18 {offsets = [0, 64], sizes = [16, 32], strides = [1, 1]} : vector<16x96xf32> to vector<16x32xf32>
    %24 = vector.shape_cast %23 : vector<16x32xf32> to vector<1x16x32xf32>
    %25 = arith.truncf %20 : vector<1x16x32xf32> to vector<1x16x32xbf16>
    %26 = vector.shape_cast %25 : vector<1x16x32xbf16> to vector<1x16x4x8xbf16>
    %27 = tpu.transpose %26, [0, 2, 1, 3] : vector<1x16x4x8xbf16> -> vector<1x4x16x8xbf16>
    %28 = vector.shape_cast %27 : vector<1x4x16x8xbf16> to vector<4x16x8xbf16>
    %29 = arith.truncf %22 : vector<1x16x32xf32> to vector<1x16x32xbf16>
    %30 = vector.shape_cast %29 : vector<1x16x32xbf16> to vector<1x16x4x8xbf16>
    %31 = tpu.transpose %30, [0, 2, 1, 3] : vector<1x16x4x8xbf16> -> vector<1x4x16x8xbf16>
    %32 = vector.shape_cast %31 : vector<1x4x16x8xbf16> to vector<4x16x8xbf16>
    %33 = arith.truncf %24 : vector<1x16x32xf32> to vector<1x16x32xbf16>
    %34 = vector.shape_cast %33 : vector<1x16x32xbf16> to vector<1x16x4x8xbf16>
    %35 = tpu.transpose %34, [0, 2, 1, 3] : vector<1x16x4x8xbf16> -> vector<1x4x16x8xbf16>
    %36 = vector.shape_cast %35 : vector<1x4x16x8xbf16> to vector<4x16x8xbf16>
    %cst_13 = arith.constant dense<0.000000e+00> : vector<4x16x16xf32>
    %37 = tpu.matmul %28, %32, %cst_13 {dimension_numbers = #tpu.dot_dimension_numbers<[2], [2], [1], [1], [0, 0, 0, 1, 1, 1], [0], [0]>} : vector<4x16x8xbf16>, vector<4x16x8xbf16>, vector<4x16x16xf32> -> vector<4x16x16xf32>
    %cst_14 = arith.constant dense<0xFF800000> : vector<4x16xf32>
    %38 = vector.multi_reduction <maximumf>, %37, %cst_14 [2] : vector<4x16x16xf32> to vector<4x16xf32>
    %39 = vector.shape_cast %38 : vector<4x16xf32> to vector<4x16x1xf32>
    %40 = vector.broadcast %39 : vector<4x16x1xf32> to vector<4x16x16xf32>
    %41 = arith.subf %37, %40 : vector<4x16x16xf32>
    %42 = math.exp %41 : vector<4x16x16xf32>
    %cst_15 = arith.constant dense<0.000000e+00> : vector<4x16xf32>
    %43 = vector.multi_reduction <add>, %42, %cst_15 [2] : vector<4x16x16xf32> to vector<4x16xf32>
    %44 = vector.shape_cast %43 : vector<4x16xf32> to vector<4x16x1xf32>
    %45 = vector.broadcast %44 : vector<4x16x1xf32> to vector<4x16x16xf32>
    %46 = arith.divf %42, %45 : vector<4x16x16xf32>
    %47 = arith.truncf %46 : vector<4x16x16xf32> to vector<4x16x16xbf16>
    %cst_16 = arith.constant dense<0.000000e+00> : vector<4x16x8xf32>
    %48 = tpu.matmul %47, %36, %cst_16 {dimension_numbers = #tpu.dot_dimension_numbers<[2], [1], [1], [2], [0, 0, 0, 1, 1, 2], [0], [0]>} : vector<4x16x16xbf16>, vector<4x16x8xbf16>, vector<4x16x8xf32> -> vector<4x16x8xf32>
    %49 = vector.shape_cast %48 : vector<4x16x8xf32> to vector<1x4x16x8xf32>
    %50 = tpu.transpose %49, [0, 2, 1, 3] : vector<1x4x16x8xf32> -> vector<1x16x4x8xf32>
    %51 = vector.shape_cast %50 : vector<1x16x4x8xf32> to vector<1x16x32xf32>
    %52 = vector.shape_cast %51 : vector<1x16x32xf32> to vector<16x32xf32>
    %53 = arith.truncf %52 : vector<16x32xf32> to vector<16x32xbf16>
    %c0_17 = arith.constant 0 : index
    %c0_18 = arith.constant 0 : index
    %54 = vector.load %arg7[%c0_17, %c0_18] : memref<32x32xbf16, #tpu.memory_space<vmem>>, vector<32x32xbf16>
    %cst_19 = arith.constant dense<0.000000e+00> : vector<16x32xf32>
    %55 = tpu.matmul %53, %54, %cst_19 {dimension_numbers = #tpu.dot_dimension_numbers<[1], [0], [0], [1], [0, 0, 1, 1], [], []>} : vector<16x32xbf16>, vector<32x32xbf16>, vector<16x32xf32> -> vector<16x32xf32>
    %c0_20 = arith.constant 0 : index
    %c0_21 = arith.constant 0 : index
    %56 = vector.load %arg8[%c0_20, %c0_21] : memref<1x32xf32, #tpu.memory_space<vmem>>, vector<1x32xf32>
    %57 = vector.broadcast %56 : vector<1x32xf32> to vector<16x32xf32>
    %58 = arith.addf %55, %57 : vector<16x32xf32>
    %c0_22 = arith.constant 0 : index
    %c0_23 = arith.constant 0 : index
    %59 = vector.load %arg9[%c0_22, %c0_23] : memref<1x32xf32, #tpu.memory_space<vmem>>, vector<1x32xf32>
    %c0_24 = arith.constant 0 : index
    %c0_25 = arith.constant 0 : index
    %60 = vector.load %arg10[%c0_24, %c0_25] : memref<1x32xf32, #tpu.memory_space<vmem>>, vector<1x32xf32>
    %61 = arith.addf %12, %58 : vector<16x32xf32>
    %cst_26 = arith.constant dense<0.000000e+00> : vector<16xf32>
    %62 = vector.multi_reduction <add>, %61, %cst_26 [1] : vector<16x32xf32> to vector<16xf32>
    %63 = vector.shape_cast %62 : vector<16xf32> to vector<16x1xf32>
    %cst_27 = arith.constant 3.200000e+01 : f32
    %64 = vector.broadcast %cst_27 : f32 to vector<16x1xf32>
    %65 = arith.divf %63, %64 : vector<16x1xf32>
    %66 = vector.broadcast %65 : vector<16x1xf32> to vector<16x32xf32>
    %67 = arith.subf %61, %66 : vector<16x32xf32>
    %68 = arith.mulf %67, %67 : vector<16x32xf32>
    %cst_28 = arith.constant dense<0.000000e+00> : vector<16xf32>
    %69 = vector.multi_reduction <add>, %68, %cst_28 [1] : vector<16x32xf32> to vector<16xf32>
    %70 = vector.shape_cast %69 : vector<16xf32> to vector<16x1xf32>
    %cst_29 = arith.constant 3.200000e+01 : f32
    %71 = vector.broadcast %cst_29 : f32 to vector<16x1xf32>
    %72 = arith.divf %70, %71 : vector<16x1xf32>
    %73 = vector.broadcast %65 : vector<16x1xf32> to vector<16x32xf32>
    %74 = arith.subf %61, %73 : vector<16x32xf32>
    %cst_30 = arith.constant 9.99999974E-6 : f32
    %75 = vector.broadcast %cst_30 : f32 to vector<16x1xf32>
    %76 = arith.addf %72, %75 : vector<16x1xf32>
    %77 = math.rsqrt %76 : vector<16x1xf32>
    %78 = vector.broadcast %77 : vector<16x1xf32> to vector<16x32xf32>
    %79 = arith.mulf %74, %78 : vector<16x32xf32>
    %80 = vector.broadcast %59 : vector<1x32xf32> to vector<16x32xf32>
    %81 = arith.mulf %79, %80 : vector<16x32xf32>
    %82 = vector.broadcast %60 : vector<1x32xf32> to vector<16x32xf32>
    %83 = arith.addf %81, %82 : vector<16x32xf32>
    %84 = arith.truncf %83 : vector<16x32xf32> to vector<16x32xbf16>
    %c0_31 = arith.constant 0 : index
    %c0_32 = arith.constant 0 : index
    %85 = vector.load %arg11[%c0_31, %c0_32] : memref<32x64xbf16, #tpu.memory_space<vmem>>, vector<32x64xbf16>
    %cst_33 = arith.constant dense<0.000000e+00> : vector<16x64xf32>
    %86 = tpu.matmul %84, %85, %cst_33 {dimension_numbers = #tpu.dot_dimension_numbers<[1], [0], [0], [1], [0, 0, 1, 1], [], []>} : vector<16x32xbf16>, vector<32x64xbf16>, vector<16x64xf32> -> vector<16x64xf32>
    %c0_34 = arith.constant 0 : index
    %c0_35 = arith.constant 0 : index
    %87 = vector.load %arg12[%c0_34, %c0_35] : memref<1x64xf32, #tpu.memory_space<vmem>>, vector<1x64xf32>
    %88 = vector.broadcast %87 : vector<1x64xf32> to vector<16x64xf32>
    %89 = arith.addf %86, %88 : vector<16x64xf32>
    %cst_36 = arith.constant 0.000000e+00 : f32
    %90 = vector.broadcast %cst_36 : f32 to vector<16x64xf32>
    %91 = arith.maximumf %89, %90 : vector<16x64xf32>
    %92 = arith.truncf %91 : vector<16x64xf32> to vector<16x64xbf16>
    %c0_37 = arith.constant 0 : index
    %c0_38 = arith.constant 0 : index
    %93 = vector.load %arg13[%c0_37, %c0_38] : memref<64x32xbf16, #tpu.memory_space<vmem>>, vector<64x32xbf16>
    %cst_39 = arith.constant dense<0.000000e+00> : vector<16x32xf32>
    %94 = tpu.matmul %92, %93, %cst_39 {dimension_numbers = #tpu.dot_dimension_numbers<[1], [0], [0], [1], [0, 0, 1, 1], [], []>} : vector<16x64xbf16>, vector<64x32xbf16>, vector<16x32xf32> -> vector<16x32xf32>
    %c0_40 = arith.constant 0 : index
    %c0_41 = arith.constant 0 : index
    %95 = vector.load %arg14[%c0_40, %c0_41] : memref<1x32xf32, #tpu.memory_space<vmem>>, vector<1x32xf32>
    %96 = vector.broadcast %95 : vector<1x32xf32> to vector<16x32xf32>
    %97 = arith.addf %94, %96 : vector<16x32xf32>
    %c0_42 = arith.constant 0 : index
    %c0_43 = arith.constant 0 : index
    %98 = vector.load %arg15[%c0_42, %c0_43] : memref<1x32xf32, #tpu.memory_space<vmem>>, vector<1x32xf32>
    %c0_44 = arith.constant 0 : index
    %c0_45 = arith.constant 0 : index
    %99 = vector.load %arg16[%c0_44, %c0_45] : memref<1x32xf32, #tpu.memory_space<vmem>>, vector<1x32xf32>
    %100 = arith.addf %83, %97 : vector<16x32xf32>
    %cst_46 = arith.constant dense<0.000000e+00> : vector<16xf32>
    %101 = vector.multi_reduction <add>, %100, %cst_46 [1] : vector<16x32xf32> to vector<16xf32>
    %102 = vector.shape_cast %101 : vector<16xf32> to vector<16x1xf32>
    %cst_47 = arith.constant 3.200000e+01 : f32
    %103 = vector.broadcast %cst_47 : f32 to vector<16x1xf32>
    %104 = arith.divf %102, %103 : vector<16x1xf32>
    %105 = vector.broadcast %104 : vector<16x1xf32> to vector<16x32xf32>
    %106 = arith.subf %100, %105 : vector<16x32xf32>
    %107 = arith.mulf %106, %106 : vector<16x32xf32>
    %cst_48 = arith.constant dense<0.000000e+00> : vector<16xf32>
    %108 = vector.multi_reduction <add>, %107, %cst_48 [1] : vector<16x32xf32> to vector<16xf32>
    %109 = vector.shape_cast %108 : vector<16xf32> to vector<16x1xf32>
    %cst_49 = arith.constant 3.200000e+01 : f32
    %110 = vector.broadcast %cst_49 : f32 to vector<16x1xf32>
    %111 = arith.divf %109, %110 : vector<16x1xf32>
    %112 = vector.broadcast %104 : vector<16x1xf32> to vector<16x32xf32>
    %113 = arith.subf %100, %112 : vector<16x32xf32>
    %cst_50 = arith.constant 9.99999974E-6 : f32
    %114 = vector.broadcast %cst_50 : f32 to vector<16x1xf32>
    %115 = arith.addf %111, %114 : vector<16x1xf32>
    %116 = math.rsqrt %115 : vector<16x1xf32>
    %117 = vector.broadcast %116 : vector<16x1xf32> to vector<16x32xf32>
    %118 = arith.mulf %113, %117 : vector<16x32xf32>
    %119 = vector.broadcast %98 : vector<1x32xf32> to vector<16x32xf32>
    %120 = arith.mulf %118, %119 : vector<16x32xf32>
    %121 = vector.broadcast %99 : vector<1x32xf32> to vector<16x32xf32>
    %122 = arith.addf %120, %121 : vector<16x32xf32>
    %123 = vector.shape_cast %122 : vector<16x32xf32> to vector<1x16x32xf32>
    %124 = arith.truncf %123 : vector<1x16x32xf32> to vector<1x16x32xbf16>
    %c0_51 = arith.constant 0 : index
    %c0_52 = arith.constant 0 : index
    %c0_53 = arith.constant 0 : index
    %125 = vector.load %arg17[%c0_51, %c0_52, %c0_53] : memref<1x16x32xbf16, #tpu.memory_space<vmem>>, vector<1x16x32xbf16>
    tpu.vector_store %arg17[%c0_51, %c0_52, %c0_53], %124 {strides = array<i32>} : memref<1x16x32xbf16, #tpu.memory_space<vmem>>, vector<1x16x32xbf16>,
    return
  }
  func.func @transform_0(%arg0: i32) -> (i32, i32, i32) {
    %c0_i32 = arith.constant 0 : i32
    %c0_i32_0 = arith.constant 0 : i32
    %c0_i32_1 = arith.constant 0 : i32
    return %arg0, %c0_i32, %c0_i32_0 : i32, i32, i32
  }
  func.func @transform_1(%arg0: i32) -> (i32, i32) {
    %c0_i32 = arith.constant 0 : i32
    %c0_i32_0 = arith.constant 0 : i32
    %c0_i32_1 = arith.constant 0 : i32
    return %c0_i32, %c0_i32_0 : i32, i32
  }
  func.func @transform_2(%arg0: i32) -> (i32, i32) {
    %c0_i32 = arith.constant 0 : i32
    %c0_i32_0 = arith.constant 0 : i32
    %c0_i32_1 = arith.constant 0 : i32
    return %c0_i32, %c0_i32_0 : i32, i32
  }
  func.func @transform_3(%arg0: i32) -> (i32, i32) {
    %c0_i32 = arith.constant 0 : i32
    %c0_i32_0 = arith.constant 0 : i32
    %c0_i32_1 = arith.constant 0 : i32
    return %c0_i32, %c0_i32_0 : i32, i32
  }
  func.func @transform_4(%arg0: i32) -> (i32, i32) {
    %c0_i32 = arith.constant 0 : i32
    %c0_i32_0 = arith.constant 0 : i32
    %c0_i32_1 = arith.constant 0 : i32
    return %c0_i32, %c0_i32_0 : i32, i32
  }
  func.func @transform_5(%arg0: i32) -> (i32, i32) {
    %c0_i32 = arith.constant 0 : i32
    %c0_i32_0 = arith.constant 0 : i32
    %c0_i32_1 = arith.constant 0 : i32
    return %c0_i32, %c0_i32_0 : i32, i32
  }
  func.func @transform_6(%arg0: i32) -> (i32, i32) {
    %c0_i32 = arith.constant 0 : i32
    %c0_i32_0 = arith.constant 0 : i32
    %c0_i32_1 = arith.constant 0 : i32
    return %c0_i32, %c0_i32_0 : i32, i32
  }
  func.func @transform_7(%arg0: i32) -> (i32, i32) {
    %c0_i32 = arith.constant 0 : i32
    %c0_i32_0 = arith.constant 0 : i32
    %c0_i32_1 = arith.constant 0 : i32
    return %c0_i32, %c0_i32_0 : i32, i32
  }
  func.func @transform_8(%arg0: i32) -> (i32, i32) {
    %c0_i32 = arith.constant 0 : i32
    %c0_i32_0 = arith.constant 0 : i32
    %c0_i32_1 = arith.constant 0 : i32
    return %c0_i32, %c0_i32_0 : i32, i32
  }
  func.func @transform_9(%arg0: i32) -> (i32, i32) {
    %c0_i32 = arith.constant 0 : i32
    %c0_i32_0 = arith.constant 0 : i32
    %c0_i32_1 = arith.constant 0 : i32
    return %c0_i32, %c0_i32_0 : i32, i32
  }
  func.func @transform_10(%arg0: i32) -> (i32, i32) {
    %c0_i32 = arith.constant 0 : i32
    %c0_i32_0 = arith.constant 0 : i32
    %c0_i32_1 = arith.constant 0 : i32
    return %c0_i32, %c0_i32_0 : i32, i32
  }
  func.func @transform_11(%arg0: i32) -> (i32, i32) {
    %c0_i32 = arith.constant 0 : i32
    %c0_i32_0 = arith.constant 0 : i32
    %c0_i32_1 = arith.constant 0 : i32
    return %c0_i32, %c0_i32_0 : i32, i32
  }
  func.func @transform_12(%arg0: i32) -> (i32, i32) {
    %c0_i32 = arith.constant 0 : i32
    %c0_i32_0 = arith.constant 0 : i32
    %c0_i32_1 = arith.constant 0 : i32
    return %c0_i32, %c0_i32_0 : i32, i32
  }
  func.func @transform_13(%arg0: i32) -> (i32, i32) {
    %c0_i32 = arith.constant 0 : i32
    %c0_i32_0 = arith.constant 0 : i32
    %c0_i32_1 = arith.constant 0 : i32
    return %c0_i32, %c0_i32_0 : i32, i32
  }
  func.func @transform_14(%arg0: i32) -> (i32, i32) {
    %c0_i32 = arith.constant 0 : i32
    %c0_i32_0 = arith.constant 0 : i32
    %c0_i32_1 = arith.constant 0 : i32
    return %c0_i32, %c0_i32_0 : i32, i32
  }
  func.func @transform_15(%arg0: i32) -> (i32, i32) {
    %c0_i32 = arith.constant 0 : i32
    %c0_i32_0 = arith.constant 0 : i32
    %c0_i32_1 = arith.constant 0 : i32
    return %c0_i32, %c0_i32_0 : i32, i32
  }
  func.func @transform_16(%arg0: i32) -> (i32, i32, i32) {
    %c0_i32 = arith.constant 0 : i32
    %c0_i32_0 = arith.constant 0 : i32
    %c0_i32_1 = arith.constant 0 : i32
    return %arg0, %c0_i32, %c0_i32_0 : i32, i32, i32
  }
}

module attributes {stable_mosaic.version = 11 : i64} {
  func.func @_decoder_kernel(%arg0: i32, %arg1: memref<1x8x32xf32, #tpu.memory_space<vmem>>, %arg2: memref<1x16x32xbf16, #tpu.memory_space<vmem>>, %arg3: memref<1x1x8xf32, #tpu.memory_space<vmem>>, %arg4: memref<32x96xbf16, #tpu.memory_space<vmem>>, %arg5: memref<1x96xf32, #tpu.memory_space<vmem>>, %arg6: memref<32x32xbf16, #tpu.memory_space<vmem>>, %arg7: memref<1x32xf32, #tpu.memory_space<vmem>>, %arg8: memref<1x32xf32, #tpu.memory_space<vmem>>, %arg9: memref<1x32xf32, #tpu.memory_space<vmem>>, %arg10: memref<32x32xbf16, #tpu.memory_space<vmem>>, %arg11: memref<1x32xf32, #tpu.memory_space<vmem>>, %arg12: memref<32x64xbf16, #tpu.memory_space<vmem>>, %arg13: memref<1x64xf32, #tpu.memory_space<vmem>>, %arg14: memref<32x32xbf16, #tpu.memory_space<vmem>>, %arg15: memref<1x32xf32, #tpu.memory_space<vmem>>, %arg16: memref<1x32xf32, #tpu.memory_space<vmem>>, %arg17: memref<1x32xf32, #tpu.memory_space<vmem>>, %arg18: memref<32x64xbf16, #tpu.memory_space<vmem>>, %arg19: memref<1x64xf32, #tpu.memory_space<vmem>>, %arg20: memref<64x32xbf16, #tpu.memory_space<vmem>>, %arg21: memref<1x32xf32, #tpu.memory_space<vmem>>, %arg22: memref<1x32xf32, #tpu.memory_space<vmem>>, %arg23: memref<1x32xf32, #tpu.memory_space<vmem>>, %arg24: memref<1x8x32xbf16, #tpu.memory_space<vmem>>, %arg25: memref<1x4x8x16xf32, #tpu.memory_space<vmem>>) attributes {dimension_semantics = [#tpu.dimension_semantics<parallel>], iteration_bounds = array<i64: 2>, scalar_prefetch = 0 : i64, scratch_operands = 0 : i64, tpu.core_type = #tpu.core_type<tc>, window_params = [{transform_indices = @transform_0, window_bounds = array<i64: 1, 8, 32>}, {transform_indices = @transform_1, window_bounds = array<i64: 1, 16, 32>}, {transform_indices = @transform_2, window_bounds = array<i64: 1, 1, 8>}, {pipeline_mode = #tpu.pipeline_mode<synchronous>, transform_indices = @transform_3, window_bounds = array<i64: 32, 96>}, {pipeline_mode = #tpu.pipeline_mode<synchronous>, transform_indices = @transform_4, window_bounds = array<i64: 1, 96>}, {pipeline_mode = #tpu.pipeline_mode<synchronous>, transform_indices = @transform_5, window_bounds = array<i64: 32, 32>}, {pipeline_mode = #tpu.pipeline_mode<synchronous>, transform_indices = @transform_6, window_bounds = array<i64: 1, 32>}, {pipeline_mode = #tpu.pipeline_mode<synchronous>, transform_indices = @transform_7, window_bounds = array<i64: 1, 32>}, {pipeline_mode = #tpu.pipeline_mode<synchronous>, transform_indices = @transform_8, window_bounds = array<i64: 1, 32>}, {pipeline_mode = #tpu.pipeline_mode<synchronous>, transform_indices = @transform_9, window_bounds = array<i64: 32, 32>}, {pipeline_mode = #tpu.pipeline_mode<synchronous>, transform_indices = @transform_10, window_bounds = array<i64: 1, 32>}, {pipeline_mode = #tpu.pipeline_mode<synchronous>, transform_indices = @transform_11, window_bounds = array<i64: 32, 64>}, {pipeline_mode = #tpu.pipeline_mode<synchronous>, transform_indices = @transform_12, window_bounds = array<i64: 1, 64>}, {pipeline_mode = #tpu.pipeline_mode<synchronous>, transform_indices = @transform_13, window_bounds = array<i64: 32, 32>}, {pipeline_mode = #tpu.pipeline_mode<synchronous>, transform_indices = @transform_14, window_bounds = array<i64: 1, 32>}, {pipeline_mode = #tpu.pipeline_mode<synchronous>, transform_indices = @transform_15, window_bounds = array<i64: 1, 32>}, {pipeline_mode = #tpu.pipeline_mode<synchronous>, transform_indices = @transform_16, window_bounds = array<i64: 1, 32>}, {pipeline_mode = #tpu.pipeline_mode<synchronous>, transform_indices = @transform_17, window_bounds = array<i64: 32, 64>}, {pipeline_mode = #tpu.pipeline_mode<synchronous>, transform_indices = @transform_18, window_bounds = array<i64: 1, 64>}, {pipeline_mode = #tpu.pipeline_mode<synchronous>, transform_indices = @transform_19, window_bounds = array<i64: 64, 32>}, {pipeline_mode = #tpu.pipeline_mode<synchronous>, transform_indices = @transform_20, window_bounds = array<i64: 1, 32>}, {pipeline_mode = #tpu.pipeline_mode<synchronous>, transform_indices = @transform_21, window_bounds = array<i64: 1, 32>}, {pipeline_mode = #tpu.pipeline_mode<synchronous>, transform_indices = @transform_22, window_bounds = array<i64: 1, 32>}, {transform_indices = @transform_23, window_bounds = array<i64: 1, 8, 32>}, {transform_indices = @transform_24, window_bounds = array<i64: 1, 4, 8, 16>}]} {
    %c0 = arith.constant 0 : index
    %c0_0 = arith.constant 0 : index
    %c0_1 = arith.constant 0 : index
    %0 = vector.load %arg1[%c0, %c0_0, %c0_1] : memref<1x8x32xf32, #tpu.memory_space<vmem>>, vector<1x8x32xf32>
    %1 = vector.shape_cast %0 : vector<1x8x32xf32> to vector<8x32xf32>
    %c0_2 = arith.constant 0 : index
    %c0_3 = arith.constant 0 : index
    %c0_4 = arith.constant 0 : index
    %2 = vector.load %arg2[%c0_2, %c0_3, %c0_4] : memref<1x16x32xbf16, #tpu.memory_space<vmem>>, vector<1x16x32xbf16>
    %3 = vector.shape_cast %2 : vector<1x16x32xbf16> to vector<16x32xbf16>
    %4 = tpu.iota {dimensions = array<i32: 0>} : vector<8x8xi32>
    %5 = tpu.iota {dimensions = array<i32: 1>} : vector<8x8xi32>
    %6 = arith.cmpi sle, %5, %4 : vector<8x8xi32>
    %c0_5 = arith.constant 0 : index
    %c0_6 = arith.constant 0 : index
    %c0_7 = arith.constant 0 : index
    %7 = vector.load %arg3[%c0_5, %c0_6, %c0_7] : memref<1x1x8xf32, #tpu.memory_space<vmem>>, vector<1x1x8xf32>
    %8 = vector.shape_cast %7 : vector<1x1x8xf32> to vector<1x8xf32>
    %cst = arith.constant 5.000000e-01 : f32
    %9 = vector.broadcast %cst : f32 to vector<1x8xf32>
    %10 = arith.cmpf ogt, %8, %9 : vector<1x8xf32>
    %11 = vector.shape_cast %6 : vector<8x8xi1> to vector<1x1x8x8xi1>
    %12 = vector.shape_cast %10 : vector<1x8xi1> to vector<1x1x1x8xi1>
    %13 = vector.broadcast %12 : vector<1x1x1x8xi1> to vector<1x1x8x8xi1>
    %14 = arith.andi %11, %13 : vector<1x1x8x8xi1>
    %15 = vector.shape_cast %14 : vector<1x1x8x8xi1> to vector<1x1x8x8xi1>
    %16 = vector.broadcast %15 : vector<1x1x8x8xi1> to vector<1x4x8x8xi1>
    %17 = vector.shape_cast %16 : vector<1x4x8x8xi1> to vector<4x8x8xi1>
    %18 = arith.truncf %1 : vector<8x32xf32> to vector<8x32xbf16>
    %c0_8 = arith.constant 0 : index
    %c0_9 = arith.constant 0 : index
    %19 = vector.load %arg4[%c0_8, %c0_9] : memref<32x96xbf16, #tpu.memory_space<vmem>>, vector<32x96xbf16>
    %cst_10 = arith.constant dense<0.000000e+00> : vector<8x96xf32>
    %20 = tpu.matmul %18, %19, %cst_10 {dimension_numbers = #tpu.dot_dimension_numbers<[1], [0], [0], [1], [0, 0, 1, 1], [], []>} : vector<8x32xbf16>, vector<32x96xbf16>, vector<8x96xf32> -> vector<8x96xf32>
    %c0_11 = arith.constant 0 : index
    %c0_12 = arith.constant 0 : index
    %21 = vector.load %arg5[%c0_11, %c0_12] : memref<1x96xf32, #tpu.memory_space<vmem>>, vector<1x96xf32>
    %22 = vector.broadcast %21 : vector<1x96xf32> to vector<8x96xf32>
    %23 = arith.addf %20, %22 : vector<8x96xf32>
    %24 = vector.extract_strided_slice %23 {offsets = [0, 0], sizes = [8, 32], strides = [1, 1]} : vector<8x96xf32> to vector<8x32xf32>
    %25 = vector.shape_cast %24 : vector<8x32xf32> to vector<1x8x32xf32>
    %26 = vector.extract_strided_slice %23 {offsets = [0, 32], sizes = [8, 32], strides = [1, 1]} : vector<8x96xf32> to vector<8x32xf32>
    %27 = vector.shape_cast %26 : vector<8x32xf32> to vector<1x8x32xf32>
    %28 = vector.extract_strided_slice %23 {offsets = [0, 64], sizes = [8, 32], strides = [1, 1]} : vector<8x96xf32> to vector<8x32xf32>
    %29 = vector.shape_cast %28 : vector<8x32xf32> to vector<1x8x32xf32>
    %30 = arith.truncf %25 : vector<1x8x32xf32> to vector<1x8x32xbf16>
    %31 = vector.shape_cast %30 : vector<1x8x32xbf16> to vector<1x8x4x8xbf16>
    %32 = tpu.transpose %31, [0, 2, 1, 3] : vector<1x8x4x8xbf16> -> vector<1x4x8x8xbf16>
    %33 = vector.shape_cast %32 : vector<1x4x8x8xbf16> to vector<4x8x8xbf16>
    %34 = arith.truncf %27 : vector<1x8x32xf32> to vector<1x8x32xbf16>
    %35 = vector.shape_cast %34 : vector<1x8x32xbf16> to vector<1x8x4x8xbf16>
    %36 = tpu.transpose %35, [0, 2, 1, 3] : vector<1x8x4x8xbf16> -> vector<1x4x8x8xbf16>
    %37 = vector.shape_cast %36 : vector<1x4x8x8xbf16> to vector<4x8x8xbf16>
    %38 = arith.truncf %29 : vector<1x8x32xf32> to vector<1x8x32xbf16>
    %39 = vector.shape_cast %38 : vector<1x8x32xbf16> to vector<1x8x4x8xbf16>
    %40 = tpu.transpose %39, [0, 2, 1, 3] : vector<1x8x4x8xbf16> -> vector<1x4x8x8xbf16>
    %41 = vector.shape_cast %40 : vector<1x4x8x8xbf16> to vector<4x8x8xbf16>
    %cst_13 = arith.constant dense<0.000000e+00> : vector<4x8x8xf32>
    %42 = tpu.matmul %33, %37, %cst_13 {dimension_numbers = #tpu.dot_dimension_numbers<[2], [2], [1], [1], [0, 0, 0, 1, 1, 1], [0], [0]>} : vector<4x8x8xbf16>, vector<4x8x8xbf16>, vector<4x8x8xf32> -> vector<4x8x8xf32>
    %cst_14 = arith.constant -1.000000e+10 : f32
    %43 = vector.broadcast %cst_14 : f32 to vector<4x8x8xf32>
    %44 = arith.select %17, %42, %43 : vector<4x8x8xi1>, vector<4x8x8xf32>
    %cst_15 = arith.constant dense<0xFF800000> : vector<4x8xf32>
    %45 = vector.multi_reduction <maximumf>, %44, %cst_15 [2] : vector<4x8x8xf32> to vector<4x8xf32>
    %46 = vector.shape_cast %45 : vector<4x8xf32> to vector<4x8x1xf32>
    %47 = vector.broadcast %46 : vector<4x8x1xf32> to vector<4x8x8xf32>
    %48 = arith.subf %44, %47 : vector<4x8x8xf32>
    %49 = math.exp %48 : vector<4x8x8xf32>
    %cst_16 = arith.constant dense<0.000000e+00> : vector<4x8xf32>
    %50 = vector.multi_reduction <add>, %49, %cst_16 [2] : vector<4x8x8xf32> to vector<4x8xf32>
    %51 = vector.shape_cast %50 : vector<4x8xf32> to vector<4x8x1xf32>
    %52 = vector.broadcast %51 : vector<4x8x1xf32> to vector<4x8x8xf32>
    %53 = arith.divf %49, %52 : vector<4x8x8xf32>
    %54 = arith.truncf %53 : vector<4x8x8xf32> to vector<4x8x8xbf16>
    %cst_17 = arith.constant dense<0.000000e+00> : vector<4x8x8xf32>
    %55 = tpu.matmul %54, %41, %cst_17 {dimension_numbers = #tpu.dot_dimension_numbers<[2], [1], [1], [2], [0, 0, 0, 1, 1, 2], [0], [0]>} : vector<4x8x8xbf16>, vector<4x8x8xbf16>, vector<4x8x8xf32> -> vector<4x8x8xf32>
    %56 = vector.shape_cast %55 : vector<4x8x8xf32> to vector<1x4x8x8xf32>
    %57 = tpu.transpose %56, [0, 2, 1, 3] : vector<1x4x8x8xf32> -> vector<1x8x4x8xf32>
    %58 = vector.shape_cast %57 : vector<1x8x4x8xf32> to vector<1x8x32xf32>
    %59 = vector.shape_cast %58 : vector<1x8x32xf32> to vector<8x32xf32>
    %60 = arith.truncf %59 : vector<8x32xf32> to vector<8x32xbf16>
    %c0_18 = arith.constant 0 : index
    %c0_19 = arith.constant 0 : index
    %61 = vector.load %arg6[%c0_18, %c0_19] : memref<32x32xbf16, #tpu.memory_space<vmem>>, vector<32x32xbf16>
    %cst_20 = arith.constant dense<0.000000e+00> : vector<8x32xf32>
    %62 = tpu.matmul %60, %61, %cst_20 {dimension_numbers = #tpu.dot_dimension_numbers<[1], [0], [0], [1], [0, 0, 1, 1], [], []>} : vector<8x32xbf16>, vector<32x32xbf16>, vector<8x32xf32> -> vector<8x32xf32>
    %c0_21 = arith.constant 0 : index
    %c0_22 = arith.constant 0 : index
    %63 = vector.load %arg7[%c0_21, %c0_22] : memref<1x32xf32, #tpu.memory_space<vmem>>, vector<1x32xf32>
    %64 = vector.broadcast %63 : vector<1x32xf32> to vector<8x32xf32>
    %65 = arith.addf %62, %64 : vector<8x32xf32>
    %c0_23 = arith.constant 0 : index
    %c0_24 = arith.constant 0 : index
    %66 = vector.load %arg8[%c0_23, %c0_24] : memref<1x32xf32, #tpu.memory_space<vmem>>, vector<1x32xf32>
    %c0_25 = arith.constant 0 : index
    %c0_26 = arith.constant 0 : index
    %67 = vector.load %arg9[%c0_25, %c0_26] : memref<1x32xf32, #tpu.memory_space<vmem>>, vector<1x32xf32>
    %68 = arith.addf %1, %65 : vector<8x32xf32>
    %cst_27 = arith.constant dense<0.000000e+00> : vector<8xf32>
    %69 = vector.multi_reduction <add>, %68, %cst_27 [1] : vector<8x32xf32> to vector<8xf32>
    %70 = vector.shape_cast %69 : vector<8xf32> to vector<8x1xf32>
    %cst_28 = arith.constant 3.200000e+01 : f32
    %71 = vector.broadcast %cst_28 : f32 to vector<8x1xf32>
    %72 = arith.divf %70, %71 : vector<8x1xf32>
    %73 = vector.broadcast %72 : vector<8x1xf32> to vector<8x32xf32>
    %74 = arith.subf %68, %73 : vector<8x32xf32>
    %75 = arith.mulf %74, %74 : vector<8x32xf32>
    %cst_29 = arith.constant dense<0.000000e+00> : vector<8xf32>
    %76 = vector.multi_reduction <add>, %75, %cst_29 [1] : vector<8x32xf32> to vector<8xf32>
    %77 = vector.shape_cast %76 : vector<8xf32> to vector<8x1xf32>
    %cst_30 = arith.constant 3.200000e+01 : f32
    %78 = vector.broadcast %cst_30 : f32 to vector<8x1xf32>
    %79 = arith.divf %77, %78 : vector<8x1xf32>
    %80 = vector.broadcast %72 : vector<8x1xf32> to vector<8x32xf32>
    %81 = arith.subf %68, %80 : vector<8x32xf32>
    %cst_31 = arith.constant 9.99999974E-6 : f32
    %82 = vector.broadcast %cst_31 : f32 to vector<8x1xf32>
    %83 = arith.addf %79, %82 : vector<8x1xf32>
    %84 = math.rsqrt %83 : vector<8x1xf32>
    %85 = vector.broadcast %84 : vector<8x1xf32> to vector<8x32xf32>
    %86 = arith.mulf %81, %85 : vector<8x32xf32>
    %87 = vector.broadcast %66 : vector<1x32xf32> to vector<8x32xf32>
    %88 = arith.mulf %86, %87 : vector<8x32xf32>
    %89 = vector.broadcast %67 : vector<1x32xf32> to vector<8x32xf32>
    %90 = arith.addf %88, %89 : vector<8x32xf32>
    %91 = arith.truncf %90 : vector<8x32xf32> to vector<8x32xbf16>
    %c0_32 = arith.constant 0 : index
    %c0_33 = arith.constant 0 : index
    %92 = vector.load %arg10[%c0_32, %c0_33] : memref<32x32xbf16, #tpu.memory_space<vmem>>, vector<32x32xbf16>
    %cst_34 = arith.constant dense<0.000000e+00> : vector<8x32xf32>
    %93 = tpu.matmul %91, %92, %cst_34 {dimension_numbers = #tpu.dot_dimension_numbers<[1], [0], [0], [1], [0, 0, 1, 1], [], []>} : vector<8x32xbf16>, vector<32x32xbf16>, vector<8x32xf32> -> vector<8x32xf32>
    %c0_35 = arith.constant 0 : index
    %c0_36 = arith.constant 0 : index
    %94 = vector.load %arg11[%c0_35, %c0_36] : memref<1x32xf32, #tpu.memory_space<vmem>>, vector<1x32xf32>
    %95 = vector.broadcast %94 : vector<1x32xf32> to vector<8x32xf32>
    %96 = arith.addf %93, %95 : vector<8x32xf32>
    %c0_37 = arith.constant 0 : index
    %c0_38 = arith.constant 0 : index
    %97 = vector.load %arg12[%c0_37, %c0_38] : memref<32x64xbf16, #tpu.memory_space<vmem>>, vector<32x64xbf16>
    %cst_39 = arith.constant dense<0.000000e+00> : vector<16x64xf32>
    %98 = tpu.matmul %3, %97, %cst_39 {dimension_numbers = #tpu.dot_dimension_numbers<[1], [0], [0], [1], [0, 0, 1, 1], [], []>} : vector<16x32xbf16>, vector<32x64xbf16>, vector<16x64xf32> -> vector<16x64xf32>
    %c0_40 = arith.constant 0 : index
    %c0_41 = arith.constant 0 : index
    %99 = vector.load %arg13[%c0_40, %c0_41] : memref<1x64xf32, #tpu.memory_space<vmem>>, vector<1x64xf32>
    %100 = vector.broadcast %99 : vector<1x64xf32> to vector<16x64xf32>
    %101 = arith.addf %98, %100 : vector<16x64xf32>
    %102 = vector.shape_cast %96 : vector<8x32xf32> to vector<1x8x32xf32>
    %103 = vector.extract_strided_slice %101 {offsets = [0, 0], sizes = [16, 32], strides = [1, 1]} : vector<16x64xf32> to vector<16x32xf32>
    %104 = vector.shape_cast %103 : vector<16x32xf32> to vector<1x16x32xf32>
    %105 = vector.extract_strided_slice %101 {offsets = [0, 32], sizes = [16, 32], strides = [1, 1]} : vector<16x64xf32> to vector<16x32xf32>
    %106 = vector.shape_cast %105 : vector<16x32xf32> to vector<1x16x32xf32>
    %107 = arith.truncf %102 : vector<1x8x32xf32> to vector<1x8x32xbf16>
    %108 = vector.shape_cast %107 : vector<1x8x32xbf16> to vector<1x8x4x8xbf16>
    %109 = tpu.transpose %108, [0, 2, 1, 3] : vector<1x8x4x8xbf16> -> vector<1x4x8x8xbf16>
    %110 = vector.shape_cast %109 : vector<1x4x8x8xbf16> to vector<4x8x8xbf16>
    %111 = arith.truncf %104 : vector<1x16x32xf32> to vector<1x16x32xbf16>
    %112 = vector.shape_cast %111 : vector<1x16x32xbf16> to vector<1x16x4x8xbf16>
    %113 = tpu.transpose %112, [0, 2, 1, 3] : vector<1x16x4x8xbf16> -> vector<1x4x16x8xbf16>
    %114 = vector.shape_cast %113 : vector<1x4x16x8xbf16> to vector<4x16x8xbf16>
    %115 = arith.truncf %106 : vector<1x16x32xf32> to vector<1x16x32xbf16>
    %116 = vector.shape_cast %115 : vector<1x16x32xbf16> to vector<1x16x4x8xbf16>
    %117 = tpu.transpose %116, [0, 2, 1, 3] : vector<1x16x4x8xbf16> -> vector<1x4x16x8xbf16>
    %118 = vector.shape_cast %117 : vector<1x4x16x8xbf16> to vector<4x16x8xbf16>
    %cst_42 = arith.constant dense<0.000000e+00> : vector<4x8x16xf32>
    %119 = tpu.matmul %110, %114, %cst_42 {dimension_numbers = #tpu.dot_dimension_numbers<[2], [2], [1], [1], [0, 0, 0, 1, 1, 1], [0], [0]>} : vector<4x8x8xbf16>, vector<4x16x8xbf16>, vector<4x8x16xf32> -> vector<4x8x16xf32>
    %cst_43 = arith.constant dense<0xFF800000> : vector<4x8xf32>
    %120 = vector.multi_reduction <maximumf>, %119, %cst_43 [2] : vector<4x8x16xf32> to vector<4x8xf32>
    %121 = vector.shape_cast %120 : vector<4x8xf32> to vector<4x8x1xf32>
    %122 = vector.broadcast %121 : vector<4x8x1xf32> to vector<4x8x16xf32>
    %123 = arith.subf %119, %122 : vector<4x8x16xf32>
    %124 = math.exp %123 : vector<4x8x16xf32>
    %cst_44 = arith.constant dense<0.000000e+00> : vector<4x8xf32>
    %125 = vector.multi_reduction <add>, %124, %cst_44 [2] : vector<4x8x16xf32> to vector<4x8xf32>
    %126 = vector.shape_cast %125 : vector<4x8xf32> to vector<4x8x1xf32>
    %127 = vector.broadcast %126 : vector<4x8x1xf32> to vector<4x8x16xf32>
    %128 = arith.divf %124, %127 : vector<4x8x16xf32>
    %129 = arith.truncf %128 : vector<4x8x16xf32> to vector<4x8x16xbf16>
    %cst_45 = arith.constant dense<0.000000e+00> : vector<4x8x8xf32>
    %130 = tpu.matmul %129, %118, %cst_45 {dimension_numbers = #tpu.dot_dimension_numbers<[2], [1], [1], [2], [0, 0, 0, 1, 1, 2], [0], [0]>} : vector<4x8x16xbf16>, vector<4x16x8xbf16>, vector<4x8x8xf32> -> vector<4x8x8xf32>
    %131 = vector.shape_cast %130 : vector<4x8x8xf32> to vector<1x4x8x8xf32>
    %132 = tpu.transpose %131, [0, 2, 1, 3] : vector<1x4x8x8xf32> -> vector<1x8x4x8xf32>
    %133 = vector.shape_cast %132 : vector<1x8x4x8xf32> to vector<1x8x32xf32>
    %134 = vector.shape_cast %128 : vector<4x8x16xf32> to vector<1x4x8x16xf32>
    %c0_46 = arith.constant 0 : index
    %c0_47 = arith.constant 0 : index
    %c0_48 = arith.constant 0 : index
    %c0_49 = arith.constant 0 : index
    %135 = vector.load %arg25[%c0_46, %c0_47, %c0_48, %c0_49] : memref<1x4x8x16xf32, #tpu.memory_space<vmem>>, vector<1x4x8x16xf32>
    tpu.vector_store %arg25[%c0_46, %c0_47, %c0_48, %c0_49], %134 {strides = array<i32>} : memref<1x4x8x16xf32, #tpu.memory_space<vmem>>, vector<1x4x8x16xf32>,
    %136 = vector.shape_cast %133 : vector<1x8x32xf32> to vector<8x32xf32>
    %137 = arith.truncf %136 : vector<8x32xf32> to vector<8x32xbf16>
    %c0_50 = arith.constant 0 : index
    %c0_51 = arith.constant 0 : index
    %138 = vector.load %arg14[%c0_50, %c0_51] : memref<32x32xbf16, #tpu.memory_space<vmem>>, vector<32x32xbf16>
    %cst_52 = arith.constant dense<0.000000e+00> : vector<8x32xf32>
    %139 = tpu.matmul %137, %138, %cst_52 {dimension_numbers = #tpu.dot_dimension_numbers<[1], [0], [0], [1], [0, 0, 1, 1], [], []>} : vector<8x32xbf16>, vector<32x32xbf16>, vector<8x32xf32> -> vector<8x32xf32>
    %c0_53 = arith.constant 0 : index
    %c0_54 = arith.constant 0 : index
    %140 = vector.load %arg15[%c0_53, %c0_54] : memref<1x32xf32, #tpu.memory_space<vmem>>, vector<1x32xf32>
    %141 = vector.broadcast %140 : vector<1x32xf32> to vector<8x32xf32>
    %142 = arith.addf %139, %141 : vector<8x32xf32>
    %c0_55 = arith.constant 0 : index
    %c0_56 = arith.constant 0 : index
    %143 = vector.load %arg16[%c0_55, %c0_56] : memref<1x32xf32, #tpu.memory_space<vmem>>, vector<1x32xf32>
    %c0_57 = arith.constant 0 : index
    %c0_58 = arith.constant 0 : index
    %144 = vector.load %arg17[%c0_57, %c0_58] : memref<1x32xf32, #tpu.memory_space<vmem>>, vector<1x32xf32>
    %145 = arith.addf %90, %142 : vector<8x32xf32>
    %cst_59 = arith.constant dense<0.000000e+00> : vector<8xf32>
    %146 = vector.multi_reduction <add>, %145, %cst_59 [1] : vector<8x32xf32> to vector<8xf32>
    %147 = vector.shape_cast %146 : vector<8xf32> to vector<8x1xf32>
    %cst_60 = arith.constant 3.200000e+01 : f32
    %148 = vector.broadcast %cst_60 : f32 to vector<8x1xf32>
    %149 = arith.divf %147, %148 : vector<8x1xf32>
    %150 = vector.broadcast %149 : vector<8x1xf32> to vector<8x32xf32>
    %151 = arith.subf %145, %150 : vector<8x32xf32>
    %152 = arith.mulf %151, %151 : vector<8x32xf32>
    %cst_61 = arith.constant dense<0.000000e+00> : vector<8xf32>
    %153 = vector.multi_reduction <add>, %152, %cst_61 [1] : vector<8x32xf32> to vector<8xf32>
    %154 = vector.shape_cast %153 : vector<8xf32> to vector<8x1xf32>
    %cst_62 = arith.constant 3.200000e+01 : f32
    %155 = vector.broadcast %cst_62 : f32 to vector<8x1xf32>
    %156 = arith.divf %154, %155 : vector<8x1xf32>
    %157 = vector.broadcast %149 : vector<8x1xf32> to vector<8x32xf32>
    %158 = arith.subf %145, %157 : vector<8x32xf32>
    %cst_63 = arith.constant 9.99999974E-6 : f32
    %159 = vector.broadcast %cst_63 : f32 to vector<8x1xf32>
    %160 = arith.addf %156, %159 : vector<8x1xf32>
    %161 = math.rsqrt %160 : vector<8x1xf32>
    %162 = vector.broadcast %161 : vector<8x1xf32> to vector<8x32xf32>
    %163 = arith.mulf %158, %162 : vector<8x32xf32>
    %164 = vector.broadcast %143 : vector<1x32xf32> to vector<8x32xf32>
    %165 = arith.mulf %163, %164 : vector<8x32xf32>
    %166 = vector.broadcast %144 : vector<1x32xf32> to vector<8x32xf32>
    %167 = arith.addf %165, %166 : vector<8x32xf32>
    %168 = arith.truncf %167 : vector<8x32xf32> to vector<8x32xbf16>
    %c0_64 = arith.constant 0 : index
    %c0_65 = arith.constant 0 : index
    %169 = vector.load %arg18[%c0_64, %c0_65] : memref<32x64xbf16, #tpu.memory_space<vmem>>, vector<32x64xbf16>
    %cst_66 = arith.constant dense<0.000000e+00> : vector<8x64xf32>
    %170 = tpu.matmul %168, %169, %cst_66 {dimension_numbers = #tpu.dot_dimension_numbers<[1], [0], [0], [1], [0, 0, 1, 1], [], []>} : vector<8x32xbf16>, vector<32x64xbf16>, vector<8x64xf32> -> vector<8x64xf32>
    %c0_67 = arith.constant 0 : index
    %c0_68 = arith.constant 0 : index
    %171 = vector.load %arg19[%c0_67, %c0_68] : memref<1x64xf32, #tpu.memory_space<vmem>>, vector<1x64xf32>
    %172 = vector.broadcast %171 : vector<1x64xf32> to vector<8x64xf32>
    %173 = arith.addf %170, %172 : vector<8x64xf32>
    %cst_69 = arith.constant 0.000000e+00 : f32
    %174 = vector.broadcast %cst_69 : f32 to vector<8x64xf32>
    %175 = arith.maximumf %173, %174 : vector<8x64xf32>
    %176 = arith.truncf %175 : vector<8x64xf32> to vector<8x64xbf16>
    %c0_70 = arith.constant 0 : index
    %c0_71 = arith.constant 0 : index
    %177 = vector.load %arg20[%c0_70, %c0_71] : memref<64x32xbf16, #tpu.memory_space<vmem>>, vector<64x32xbf16>
    %cst_72 = arith.constant dense<0.000000e+00> : vector<8x32xf32>
    %178 = tpu.matmul %176, %177, %cst_72 {dimension_numbers = #tpu.dot_dimension_numbers<[1], [0], [0], [1], [0, 0, 1, 1], [], []>} : vector<8x64xbf16>, vector<64x32xbf16>, vector<8x32xf32> -> vector<8x32xf32>
    %c0_73 = arith.constant 0 : index
    %c0_74 = arith.constant 0 : index
    %179 = vector.load %arg21[%c0_73, %c0_74] : memref<1x32xf32, #tpu.memory_space<vmem>>, vector<1x32xf32>
    %180 = vector.broadcast %179 : vector<1x32xf32> to vector<8x32xf32>
    %181 = arith.addf %178, %180 : vector<8x32xf32>
    %c0_75 = arith.constant 0 : index
    %c0_76 = arith.constant 0 : index
    %182 = vector.load %arg22[%c0_75, %c0_76] : memref<1x32xf32, #tpu.memory_space<vmem>>, vector<1x32xf32>
    %c0_77 = arith.constant 0 : index
    %c0_78 = arith.constant 0 : index
    %183 = vector.load %arg23[%c0_77, %c0_78] : memref<1x32xf32, #tpu.memory_space<vmem>>, vector<1x32xf32>
    %184 = arith.addf %167, %181 : vector<8x32xf32>
    %cst_79 = arith.constant dense<0.000000e+00> : vector<8xf32>
    %185 = vector.multi_reduction <add>, %184, %cst_79 [1] : vector<8x32xf32> to vector<8xf32>
    %186 = vector.shape_cast %185 : vector<8xf32> to vector<8x1xf32>
    %cst_80 = arith.constant 3.200000e+01 : f32
    %187 = vector.broadcast %cst_80 : f32 to vector<8x1xf32>
    %188 = arith.divf %186, %187 : vector<8x1xf32>
    %189 = vector.broadcast %188 : vector<8x1xf32> to vector<8x32xf32>
    %190 = arith.subf %184, %189 : vector<8x32xf32>
    %191 = arith.mulf %190, %190 : vector<8x32xf32>
    %cst_81 = arith.constant dense<0.000000e+00> : vector<8xf32>
    %192 = vector.multi_reduction <add>, %191, %cst_81 [1] : vector<8x32xf32> to vector<8xf32>
    %193 = vector.shape_cast %192 : vector<8xf32> to vector<8x1xf32>
    %cst_82 = arith.constant 3.200000e+01 : f32
    %194 = vector.broadcast %cst_82 : f32 to vector<8x1xf32>
    %195 = arith.divf %193, %194 : vector<8x1xf32>
    %196 = vector.broadcast %188 : vector<8x1xf32> to vector<8x32xf32>
    %197 = arith.subf %184, %196 : vector<8x32xf32>
    %cst_83 = arith.constant 9.99999974E-6 : f32
    %198 = vector.broadcast %cst_83 : f32 to vector<8x1xf32>
    %199 = arith.addf %195, %198 : vector<8x1xf32>
    %200 = math.rsqrt %199 : vector<8x1xf32>
    %201 = vector.broadcast %200 : vector<8x1xf32> to vector<8x32xf32>
    %202 = arith.mulf %197, %201 : vector<8x32xf32>
    %203 = vector.broadcast %182 : vector<1x32xf32> to vector<8x32xf32>
    %204 = arith.mulf %202, %203 : vector<8x32xf32>
    %205 = vector.broadcast %183 : vector<1x32xf32> to vector<8x32xf32>
    %206 = arith.addf %204, %205 : vector<8x32xf32>
    %207 = vector.shape_cast %206 : vector<8x32xf32> to vector<1x8x32xf32>
    %208 = arith.truncf %207 : vector<1x8x32xf32> to vector<1x8x32xbf16>
    %c0_84 = arith.constant 0 : index
    %c0_85 = arith.constant 0 : index
    %c0_86 = arith.constant 0 : index
    %209 = vector.load %arg24[%c0_84, %c0_85, %c0_86] : memref<1x8x32xbf16, #tpu.memory_space<vmem>>, vector<1x8x32xbf16>
    tpu.vector_store %arg24[%c0_84, %c0_85, %c0_86], %208 {strides = array<i32>} : memref<1x8x32xbf16, #tpu.memory_space<vmem>>, vector<1x8x32xbf16>,
    return
  }
  func.func @transform_0(%arg0: i32) -> (i32, i32, i32) {
    %c0_i32 = arith.constant 0 : i32
    %c0_i32_0 = arith.constant 0 : i32
    %c0_i32_1 = arith.constant 0 : i32
    return %arg0, %c0_i32, %c0_i32_0 : i32, i32, i32
  }
  func.func @transform_1(%arg0: i32) -> (i32, i32, i32) {
    %c0_i32 = arith.constant 0 : i32
    %c0_i32_0 = arith.constant 0 : i32
    %c0_i32_1 = arith.constant 0 : i32
    return %arg0, %c0_i32, %c0_i32_0 : i32, i32, i32
  }
  func.func @transform_2(%arg0: i32) -> (i32, i32, i32) {
    %c0_i32 = arith.constant 0 : i32
    %c0_i32_0 = arith.constant 0 : i32
    %c0_i32_1 = arith.constant 0 : i32
    return %arg0, %c0_i32, %c0_i32_0 : i32, i32, i32
  }
  func.func @transform_3(%arg0: i32) -> (i32, i32) {
    %c0_i32 = arith.constant 0 : i32
    %c0_i32_0 = arith.constant 0 : i32
    %c0_i32_1 = arith.constant 0 : i32
    return %c0_i32, %c0_i32_0 : i32, i32
  }
  func.func @transform_4(%arg0: i32) -> (i32, i32) {
    %c0_i32 = arith.constant 0 : i32
    %c0_i32_0 = arith.constant 0 : i32
    %c0_i32_1 = arith.constant 0 : i32
    return %c0_i32, %c0_i32_0 : i32, i32
  }
  func.func @transform_5(%arg0: i32) -> (i32, i32) {
    %c0_i32 = arith.constant 0 : i32
    %c0_i32_0 = arith.constant 0 : i32
    %c0_i32_1 = arith.constant 0 : i32
    return %c0_i32, %c0_i32_0 : i32, i32
  }
  func.func @transform_6(%arg0: i32) -> (i32, i32) {
    %c0_i32 = arith.constant 0 : i32
    %c0_i32_0 = arith.constant 0 : i32
    %c0_i32_1 = arith.constant 0 : i32
    return %c0_i32, %c0_i32_0 : i32, i32
  }
  func.func @transform_7(%arg0: i32) -> (i32, i32) {
    %c0_i32 = arith.constant 0 : i32
    %c0_i32_0 = arith.constant 0 : i32
    %c0_i32_1 = arith.constant 0 : i32
    return %c0_i32, %c0_i32_0 : i32, i32
  }
  func.func @transform_8(%arg0: i32) -> (i32, i32) {
    %c0_i32 = arith.constant 0 : i32
    %c0_i32_0 = arith.constant 0 : i32
    %c0_i32_1 = arith.constant 0 : i32
    return %c0_i32, %c0_i32_0 : i32, i32
  }
  func.func @transform_9(%arg0: i32) -> (i32, i32) {
    %c0_i32 = arith.constant 0 : i32
    %c0_i32_0 = arith.constant 0 : i32
    %c0_i32_1 = arith.constant 0 : i32
    return %c0_i32, %c0_i32_0 : i32, i32
  }
  func.func @transform_10(%arg0: i32) -> (i32, i32) {
    %c0_i32 = arith.constant 0 : i32
    %c0_i32_0 = arith.constant 0 : i32
    %c0_i32_1 = arith.constant 0 : i32
    return %c0_i32, %c0_i32_0 : i32, i32
  }
  func.func @transform_11(%arg0: i32) -> (i32, i32) {
    %c0_i32 = arith.constant 0 : i32
    %c0_i32_0 = arith.constant 0 : i32
    %c0_i32_1 = arith.constant 0 : i32
    return %c0_i32, %c0_i32_0 : i32, i32
  }
  func.func @transform_12(%arg0: i32) -> (i32, i32) {
    %c0_i32 = arith.constant 0 : i32
    %c0_i32_0 = arith.constant 0 : i32
    %c0_i32_1 = arith.constant 0 : i32
    return %c0_i32, %c0_i32_0 : i32, i32
  }
  func.func @transform_13(%arg0: i32) -> (i32, i32) {
    %c0_i32 = arith.constant 0 : i32
    %c0_i32_0 = arith.constant 0 : i32
    %c0_i32_1 = arith.constant 0 : i32
    return %c0_i32, %c0_i32_0 : i32, i32
  }
  func.func @transform_14(%arg0: i32) -> (i32, i32) {
    %c0_i32 = arith.constant 0 : i32
    %c0_i32_0 = arith.constant 0 : i32
    %c0_i32_1 = arith.constant 0 : i32
    return %c0_i32, %c0_i32_0 : i32, i32
  }
  func.func @transform_15(%arg0: i32) -> (i32, i32) {
    %c0_i32 = arith.constant 0 : i32
    %c0_i32_0 = arith.constant 0 : i32
    %c0_i32_1 = arith.constant 0 : i32
    return %c0_i32, %c0_i32_0 : i32, i32
  }
  func.func @transform_16(%arg0: i32) -> (i32, i32) {
    %c0_i32 = arith.constant 0 : i32
    %c0_i32_0 = arith.constant 0 : i32
    %c0_i32_1 = arith.constant 0 : i32
    return %c0_i32, %c0_i32_0 : i32, i32
  }
  func.func @transform_17(%arg0: i32) -> (i32, i32) {
    %c0_i32 = arith.constant 0 : i32
    %c0_i32_0 = arith.constant 0 : i32
    %c0_i32_1 = arith.constant 0 : i32
    return %c0_i32, %c0_i32_0 : i32, i32
  }
  func.func @transform_18(%arg0: i32) -> (i32, i32) {
    %c0_i32 = arith.constant 0 : i32
    %c0_i32_0 = arith.constant 0 : i32
    %c0_i32_1 = arith.constant 0 : i32
    return %c0_i32, %c0_i32_0 : i32, i32
  }
  func.func @transform_19(%arg0: i32) -> (i32, i32) {
    %c0_i32 = arith.constant 0 : i32
    %c0_i32_0 = arith.constant 0 : i32
    %c0_i32_1 = arith.constant 0 : i32
    return %c0_i32, %c0_i32_0 : i32, i32
  }
  func.func @transform_20(%arg0: i32) -> (i32, i32) {
    %c0_i32 = arith.constant 0 : i32
    %c0_i32_0 = arith.constant 0 : i32
    %c0_i32_1 = arith.constant 0 : i32
    return %c0_i32, %c0_i32_0 : i32, i32
  }
  func.func @transform_21(%arg0: i32) -> (i32, i32) {
    %c0_i32 = arith.constant 0 : i32
    %c0_i32_0 = arith.constant 0 : i32
    %c0_i32_1 = arith.constant 0 : i32
    return %c0_i32, %c0_i32_0 : i32, i32
  }
  func.func @transform_22(%arg0: i32) -> (i32, i32) {
    %c0_i32 = arith.constant 0 : i32
    %c0_i32_0 = arith.constant 0 : i32
    %c0_i32_1 = arith.constant 0 : i32
    return %c0_i32, %c0_i32_0 : i32, i32
  }
  func.func @transform_23(%arg0: i32) -> (i32, i32, i32) {
    %c0_i32 = arith.constant 0 : i32
    %c0_i32_0 = arith.constant 0 : i32
    %c0_i32_1 = arith.constant 0 : i32
    return %arg0, %c0_i32, %c0_i32_0 : i32, i32, i32
  }
  func.func @transform_24(%arg0: i32) -> (i32, i32, i32, i32) {
    %c0_i32 = arith.constant 0 : i32
    %c0_i32_0 = arith.constant 0 : i32
    %c0_i32_1 = arith.constant 0 : i32
    %c0_i32_2 = arith.constant 0 : i32
    return %arg0, %c0_i32, %c0_i32_0, %c0_i32_1 : i32, i32, i32, i32
  }
}

</mosaic_0001>

<bundles_post_ra>
// kernel: _forward.5
= control target key start
LH: loop header
LB: loop body
LE: loop exit
PB: predicated region body
PF: predicated region fallthrough
CT: control target
= control target key end

     0   :  { %s165_s0 = inlined_call_operand.vmem [shape: bf16[16,32], index: 0, kind: input, shape index: {}]   ;;  %s166_s1 = inlined_call_operand.vmem [shape: bf16[32,32], index: 1, kind: input, shape index: {}]   ;;  %s167_s2 = inlined_call_operand.vmem [shape: f32[1,32], index: 2, kind: input, shape index: {}]   ;;  %s168_s3 = inlined_call_operand.hbm [shape: f32[16,32], index: 3, kind: output, shape index: {}]  }
   0x1   :  { %v96_v0 = vld [vmem:[%s166_s1 + $0x8] sm:$0xff] }
   0x2   :  { %8 = vsyncpa [#allocation3], 0  ;;  %53 = vmatpush.bf16.msra.mxu0 %v96_v0  ;;  %v95_v1 = vld [vmem:[%s166_s1] sm:$0xff]  ;;  %vm43_vm0 = vcmask 261120   ;;  %s127_s20 = smov [#allocation2]   ;;  %s69_s1 = sshll.u32 %s168_s3, 4  ;;  %s70_s1 = int_to_ptr.hbm [resolvable:$true] %s69_s1 }
   0x3   :  { %v94_v2 = vld [vmem:[%s165_s0] sm:$0xff]  ;;  %s67_s21 = sshll.u32 %s127_s20, 4  ;;  %s128_s0 = smov 128   ;;  %s68_s21 = int_to_ptr.vmem [resolvable:$true] %s67_s21 }
   0x4   :  { %v100_v3 = vld [vmem:[%s167_s2] ss:$0 sm:$0xff]  ;;  %s129_s24 = smov 8  }
   0x6   :  { %54 = vmatpush.bf16.msra.mxu0 %v95_v1 }
   0x9   :  { %93 = vmatmul.msk.bf16.vlgmr.msra.gmra.mxu0 %vm43_vm0, %v94_v2 }
  0x86   :  { %v56_v4 = vpop.f32.mrf.mxu0 }
  0x87   :  { %v57_v5 = vadd.f32 %v100_v3, %v56_v4 }
  0x89   :  { %61 = vst.msk [vmem:[#allocation2] sm:$0xff] %vm43_vm0, %v57_v5 }
  0x8e   :  { %v58_v6 = vpop.f32.mrf.mxu0 }
  0x8f   :  { %v59_v7 = vadd.f32 %v100_v3, %v58_v6 }
  0x91   :  { %62 = vst.msk [vmem:[#allocation2 + $0x8] sm:$0xff] %vm43_vm0, %v59_v7 }
  0x92   :  { %75 = dma.vmem_to_hbm [thread:$0]  %s68_s21, 256, %s70_s1, [#allocation3], %s128_s0, %s128_s0, %s129_s24  }
  0x93   :  { %125 = dma.done.wait [#allocation3], 256  }
  0x94   :  { %126 = vsyncadd [#allocation3], 4294967040 }
  0x95   :  { %80 = vsyncpa [#allocation3], 1 }

// kernel: _forward.3
= control target key start
LH: loop header
LB: loop body
LE: loop exit
PB: predicated region body
PF: predicated region fallthrough
CT: control target
= control target key end

     0   :  { %s2579_s21 = smov 0   ;;  %s3239_s0 = inlined_call_operand.vmem [shape: f32[2,16,16], index: 0, kind: input, shape index: {}]   ;;  %s3240_s1 = inlined_call_operand.vmem [shape: f32[16,32], index: 1, kind: input, shape index: {}]   ;;  %s3241_s2 = inlined_call_operand.vmem [shape: bf16[16,32], index: 2, kind: input, shape index: {}]   ;;  %s3242_s3 = inlined_call_operand.vmem [shape: f32[1,32], index: 3, kind: input, shape index: {}]   ;;  %s3243_s4 = inlined_call_operand.vmem [shape: bf16[32,96], index: 4, kind: input, shape index: {}]   ;;  %s3244_s5 = inlined_call_operand.vmem [shape: f32[1,96], index: 5, kind: input, shape index: {}]   ;;  %s3245_s6 = inlined_call_operand.vmem [shape: bf16[32,32], index: 6, kind: input, shape index: {}]   ;;  %s3246_s7 = inlined_call_operand.vmem [shape: f32[1,32], index: 7, kind: input, shape index: {}]   ;;  %s3247_s8 = inlined_call_operand.vmem [shape: f32[1,32], index: 8, kind: input, shape index: {}]   ;;  %s3248_s9 = inlined_call_operand.vmem [shape: f32[1,32], index: 9, kind: input, shape index: {}]   ;;  %s3249_s10 = inlined_call_operand.vmem [shape: bf16[32,64], index: 10, kind: input, shape index: {}]   ;;  %s3250_s11 = inlined_call_operand.vmem [shape: f32[1,64], index: 11, kind: input, shape index: {}]   ;;  %s3251_s12 = inlined_call_operand.vmem [shape: bf16[64,32], index: 12, kind: input, shape index: {}]   ;;  %s3252_s13 = inlined_call_operand.vmem [shape: f32[1,32], index: 13, kind: input, shape index: {}]   ;;  %s3253_s14 = inlined_call_operand.vmem [shape: f32[1,32], index: 14, kind: input, shape index: {}]   ;;  %s3254_s15 = inlined_call_operand.vmem [shape: f32[1,32], index: 15, kind: input, shape index: {}]   ;;  %s3255_s16 = inlined_call_operand.vmem [shape: bf16[2,16,32], index: 16, kind: output, shape index: {}]  }
   0x1   :  { %3256 = sst [smem:[#allocation2_spill]] %s3239_s0 }
   0x2 LB: > { %s2309_s22 = sadd.s32 4294967295, %s2481_s21   ;;  %p2313_p0 = scmp.ge.s32.totalorder %s2481_s21, 1  ;;  %s2481_s21 = sphi %s2579_s21, %s26_s21  }
   0x3   : > { %p462_p1 = scmp.lt.s32.totalorder %s2481_s21, 3 }
   0x5   : > { %p463_p2 = pnand %p2313_p0, %p462_p1 }
   0x6   : > { %p512_p3 = scmp.lt.s32.totalorder (!%p463_p2), %s2309_s22, 1  ;;  %s3257_s28 = sld [smem:[#allocation2_spill]] (!%p463_p2) }
   0x7   : > { %466 = sbr.rel (%p463_p2) target bundleno = 2255 (0x8cf), region = 84  ;;  %s2484_s30 = smov (!%p463_p2), 112  }
   0x8   : > { %s2485_s0 = smov (!%p463_p2), 120   ;;  %s2486_s17 = smov (!%p463_p2), 96  }
   0x9   : > { %s2489_s18 = smov (!%p463_p2), 64   ;;  %s2490_s19 = smov (!%p463_p2), 16  }
   0xa   : > { %s2491_s20 = smov (!%p463_p2), 24   ;;  %s2492_s23 = smov (!%p463_p2), 8  }
   0xc   : > { %v2379_v0 = vld [vmem:[%s3241_s2] sm:$0xff]  ;;  %s3275_s22 = smov (!%p512_p3, %s2309_s22), 1  ;;  %vm538_vm0 = vcmask 130048   ;;  %v2381_v4 = vld [vmem:[%s3243_s4 + $0x8] sm:$0xff]  ;;  %vm581_vm1 = vcmask 261120   ;;  %vm650_vm2 = vcmask 1047556  }
   0xd   : > { %549 = vmatpush.bf16.msra.mxu0 %v2379_v0  ;;  %s2377_s25 = sshll.u32 %s3275_s22, 4  ;;  %591 = vmatpush.bf16.msra.mxu1 %v2381_v4  ;;  %v2380_v5 = vld [vmem:[%s3243_s4] sm:$0xff]  ;;  %v557_v11 = vld [vmem:[%s3240_s1 + $0x8] sm:$0xff]  ;;  %v2487_v24 = vmov 1983009808   ;;  %vm1338_vm3 = vcmask 64512  }
   0xe   : > { %s516_s29 = scalar_lea.vmem %s3257_s28, %s2377_s25  ;;  %v2424_v7 = vld [vmem:[%s3242_s3] ss:$0 sm:$0xff]  ;;  %v641_v25 = vunpack.c.l.s4 %v2487_v24  ;;  %v2488_v28 = vmov 1934713408   ;;  %s2378_s28 = sshll.u32 %s3275_s22, 3 }
   0xf   : > { %v523_v1 = vld [vmem:[%s516_s29] sm:$0xff]  ;;  %v524_v2 = vld [vmem:[%s516_s29 + $0x8] sm:$0xff]  ;;  %s2483_s29 = smov 104   ;;  %v655_v29 = vunpack.c.l.s4 %v2488_v28 }
  0x10   : > { %v525_v3 = vpack.c.bf16 %v524_v2, %v523_v1  ;;  %v556_v9 = vld [vmem:[%s3240_s1] sm:$0xff]  ;;  %v2638_v26 = vunpack.c.0.s8 %v641_v25 }
  0x11   : > { %592 = vmatpush.bf16.msra.mxu1 %v2380_v5  ;;  %v2425_v16 = vld [vmem:[%s3244_s5] ss:$0 sm:$0xff]  ;;  %v2657_v39 = vunpack.c.0.s8 %v655_v29 }
  0x12   : > { %2322 = vmatmul.msk.bf16.vlgmr.msra.gmra.mxu0 %vm538_vm0, %v525_v3 }
  0x8f   : > { %v551_v6 = vpop.f32.mrf.mxu0 }
  0x90   : > { %v552_v8 = vadd.f32 %v2424_v7, %v551_v6 }
  0x92   : > { %v2612_v13 = vadd.f32 %v556_v9, %v552_v8 }
  0x97   : > { %v553_v10 = vpop.f32.mrf.mxu0 }
  0x98   : > { %v554_v12 = vadd.f32 %v2424_v7, %v553_v10 }
  0x9a   : > { %v2614_v14 = vadd.f32 %v557_v11, %v554_v12 }
  0x9c   : > { %v560_v15 = vpack.c.bf16 %v2614_v14, %v2612_v13 }
  0x9e   : > { %2331 = vmatmul.msk.bf16.vlgmr.msra.gmra.mxu1 %vm581_vm1, %v560_v15 }
 0x11b   : > { %v594_v17 = vpop.f32.mrf.mxu1 }
 0x11c   : > { %v595_v18 = vadd.f32 %v2425_v16, %v594_v17 }
 0x11e   : > { %v2622_v19 = vpack.c.bf16 %v595_v18, %v595_v18 }
 0x120   : > { %611 = vrot.lane.b32.xlu2 %v2622_v19, %s2483_s29  ;;  %607 = vrot.lane.b32.xlu1 %v2622_v19, %s2484_s30  ;;  %v618_v35 = vshrl.u32 %v2622_v19, 16 }
 0x121   : > { %603 = vrot.lane.b32.xlu0 %v2622_v19, %s2485_s0 }
 0x123   : > { %v596_v20 = vpop.f32.mrf.mxu1 }
 0x124   : > { %v597_v21 = vadd.f32 %v2425_v16, %v596_v20 }
 0x126   : > { %v2627_v22 = vpack.c.bf16 %v597_v21, %v597_v21 }
 0x128   : > { %613 = vrot.lane.b32.xlu2 %v2627_v22, %s2483_s29  ;;  %609 = vrot.lane.b32.xlu1 %v2627_v22, %s2484_s30  ;;  %v630_v4 = vshrl.u32 %v2627_v22, 16 }
 0x129   : > { %605 = vrot.lane.b32.xlu0 %v2627_v22, %s2485_s0  ;;  %s521_s0 = scalar_lea.vmem %s3255_s16, %s2378_s28 }
 0x130   : > { %846 = vrot.lane.b32.xlu1 %v2627_v22, %s2486_s17 }
 0x131   : > { %844 = vrot.lane.b32.xlu0 %v2622_v19, %s2486_s17 }
 0x17a   : > { %v2636_v23 = vpop.permute.xlu2 %611 }
 0x17b   : > { %v625_v30 = vshrl.u32 %v2636_v23, 16 }
 0x182   : > { %v2660_v42 = vpop.permute.xlu2 %613 }
 0x183   : > { %v637_v49 = vshrl.u32 %v2660_v42, 16 }
 0x192   : > { %v2640_v27 = vpop.permute.xlu1 %607 }
 0x193   : > { %v623_v31 = vpack.i.b16 %v2636_v23, %v2640_v27  ;;  %v624_v32 = vshrl.u32 %v2640_v27, 16  ;;  %v2646_v33 = vpop.permute.xlu0 %603  ;;  %852 = vrot.lane.b32.xlu1 %v2640_v27, %s2486_s17 }
 0x194   : > { %v617_v34 = vpack.i.b16 %v2646_v33, %v2622_v19  ;;  %v619_v36 = vshrl.u32 %v2646_v33, 16  ;;  %848 = vrot.lane.b32.xlu2 %v2646_v33, %s2486_s17 }
 0x195   : > { %v626_v37 = vpack.i.b16 %v625_v30, %v624_v32  ;;  %v648_v38 = vperm.slane %v623_v31, %v2638_v26 }
 0x196   : > { %v620_v40 = vpack.i.b16 %v619_v36, %v618_v35  ;;  %v643_v41 = vperm.slane %v617_v34, %v2638_v26 }
 0x197   : > { %v649_v43 = vrot.slane %v648_v38, 4  ;;  %v675_v44 = vperm.slane %v626_v37, %v2638_v26 }
 0x198   : > { %v652_v45 = vrot.slane %v643_v41, 4  ;;  %v670_v46 = vperm.slane %v620_v40, %v2638_v26 }
 0x199   : > { %v676_v47 = vrot.slane %v675_v44, 4  ;;  %v651_v48 = vsel %vm650_vm2, %v649_v43, %v643_v41 }
 0x19a   : > { %v653_v50 = vsel %vm650_vm2, %v648_v38, %v652_v45  ;;  %v657_v51 = vperm.slane %v651_v48, %v2657_v39  ;;  %v678_v52 = vrot.slane %v670_v46, 4  ;;  %v2668_v53 = vpop.permute.xlu1 %609 }
 0x19b   : > { %v661_v54 = vperm.slane %v653_v50, %v2657_v39  ;;  %v677_v55 = vsel %vm650_vm2, %v676_v47, %v670_v46  ;;  %v635_v56 = vpack.i.b16 %v2660_v42, %v2668_v53  ;;  %v636_v57 = vshrl.u32 %v2668_v53, 16  ;;  %v2675_v58 = vpop.permute.xlu0 %605  ;;  %858 = vrot.lane.b32.xlu1 %v2660_v42, %s2486_s17 }
 0x19c   : > { %v662_v59 = vrot.slane %v657_v51, 4  ;;  %v679_v60 = vsel %vm650_vm2, %v675_v44, %v678_v52  ;;  %v683_v61 = vperm.slane %v677_v55, %v2657_v39  ;;  %v629_v62 = vpack.i.b16 %v2675_v58, %v2627_v22  ;;  %854 = vrot.lane.b32.xlu2 %v2668_v53, %s2486_s17  ;;  %850 = vrot.lane.b32.xlu0 %v2675_v58, %s2486_s17 }
 0x19d   : > { %v664_v63 = vrot.slane %v661_v54, 4  ;;  %v687_v0 = vperm.slane %v679_v60, %v2657_v39  ;;  %v638_v1 = vpack.i.b16 %v637_v49, %v636_v57  ;;  %v701_v2 = vperm.slane %v635_v56, %v2638_v26 }
 0x19e   : > { %v663_v3 = vsel %vm650_vm2, 0, %v662_v59  ;;  %v631_v5 = vshrl.u32 %v2675_v58, 16  ;;  %v696_v6 = vperm.slane %v629_v62, %v2638_v26  ;;  %v688_v11 = vrot.slane %v683_v61, 4 }
 0x19f   : > { %v665_v7 = vsel %vm650_vm2, 0, %v664_v63  ;;  %v690_v8 = vrot.slane %v687_v0, 4  ;;  %v702_v9 = vrot.slane %v701_v2, 4  ;;  %v727_v10 = vperm.slane %v638_v1, %v2638_v26 }
 0x1a0   : > { %v749_v12 = vrot.slane %v665_v7, 4  ;;  %v632_v15 = vpack.i.b16 %v631_v5, %v630_v4  ;;  %v704_v16 = vrot.slane %v696_v6, 4  ;;  %v744_v21 = vsel %vm650_vm2, %v664_v63, %v657_v51 }
 0x1a1   : > { %v691_v17 = vsel %vm650_vm2, 0, %v690_v8  ;;  %v728_v18 = vrot.slane %v727_v10, 4  ;;  %v703_v20 = vsel %vm650_vm2, %v702_v9, %v696_v6  ;;  %v689_v32 = vsel %vm650_vm2, 0, %v688_v11 }
 0x1a2   : > { %v768_v24 = vrot.slane %v691_v17, 4  ;;  %v705_v25 = vsel %vm650_vm2, %v701_v2, %v704_v16  ;;  %v709_v28 = vperm.slane %v703_v20, %v2657_v39  ;;  %v722_v29 = vperm.slane %v632_v15, %v2638_v26 }
 0x1a3   : > { %v713_v30 = vperm.slane %v705_v25, %v2657_v39  ;;  %1090 = vrot.lane.b32.xlu1 %v2627_v22, %s2489_s18  ;;  %v750_v31 = vsel %vm650_vm2, %v749_v12, %v663_v3  ;;  %v763_v22 = vsel %vm650_vm2, %v690_v8, %v683_v61 }
 0x1a4   : > { %v714_v34 = vrot.slane %v709_v28, 4  ;;  %v729_v35 = vsel %vm650_vm2, %v728_v18, %v722_v29  ;;  %v730_v36 = vrot.slane %v722_v29, 4  ;;  %1092 = vrot.lane.b32.xlu2 %v2646_v33, %s2489_s18  ;;  %856 = vrot.lane.b32.xlu0 %v2636_v23, %s2486_s17  ;;  %v754_v40 = vperm.slane %v750_v31, %v2638_v26 }
 0x1a5   : > { %v716_v37 = vrot.slane %v713_v30, 4  ;;  %v735_v38 = vperm.slane %v729_v35, %v2657_v39  ;;  %v769_v43 = vsel %vm650_vm2, %v768_v24, %v689_v32  ;;  %v748_v33 = vperm.slane %v744_v21, %v2638_v26 }
 0x1a6   : > { %v731_v41 = vsel %vm650_vm2, %v727_v10, %v730_v36  ;;  %v755_v46 = vrot.slane %v754_v40, 4  ;;  %v773_v49 = vperm.slane %v769_v43, %v2638_v26  ;;  %v715_v50 = vsel %vm650_vm2, 0, %v714_v34 }
 0x1a7   : > { %v717_v44 = vsel %vm650_vm2, 0, %v716_v37  ;;  %v739_v45 = vperm.slane %v731_v41, %v2657_v39  ;;  %v740_v47 = vrot.slane %v735_v38, 4  ;;  %v767_v54 = vperm.slane %v763_v22, %v2638_v26 }
 0x1a8   : > { %v787_v48 = vrot.slane %v717_v44, 4  ;;  %v756_v52 = vsel %vm650_vm2, %v755_v46, %v748_v33  ;;  %v774_v56 = vrot.slane %v773_v49, 4  ;;  %v782_v57 = vsel %vm650_vm2, %v716_v37, %v709_v28 }
 0x1a9   : > { %v742_v51 = vrot.slane %v739_v45, 4  ;;  %v760_v55 = vperm.slane %v756_v52, %v2657_v39  ;;  %v741_v62 = vsel %vm650_vm2, 0, %v740_v47  ;;  %v786_v2 = vperm.slane %v782_v57, %v2638_v26 }
 0x1aa   : > { %v788_v59 = vsel %vm650_vm2, %v787_v48, %v715_v50  ;;  %v775_v0 = vsel %vm650_vm2, %v774_v56, %v767_v54 }
 0x1ab   : > { %v743_v60 = vsel %vm650_vm2, 0, %v742_v51  ;;  %1096 = vrot.lane.b32.xlu1 %v2640_v27, %s2489_s18  ;;  %v792_v61 = vperm.slane %v788_v59, %v2638_v26  ;;  %v779_v1 = vperm.slane %v775_v0, %v2657_v39  ;;  %v761_v4 = vrot.slane %v760_v55, 4  ;;  %v845_v59 = vpop.permute.xlu0 %844 }
 0x1ac   : > { %v806_v63 = vrot.slane %v743_v60, 4  ;;  %1088 = vrot.lane.b32.xlu0 %v2622_v19, %s2489_s18  ;;  %v801_v5 = vsel %vm650_vm2, %v742_v51, %v735_v38  ;;  %v823_v6 = vshrl.u32 %v760_v55, 16 }
 0x1ad   : > { %v793_v3 = vrot.slane %v792_v61, 4  ;;  %v822_v9 = vpack.i.b16 %v779_v1, %v760_v55  ;;  %v824_v10 = vshrl.u32 %v779_v1, 16  ;;  %v762_v11 = vsel %vm650_vm2, 0, %v761_v4  ;;  %v847_v55 = vpop.permute.xlu1 %846 }
 0x1ae   : > { %v807_v27 = vsel %vm650_vm2, %v806_v63, %v741_v62  ;;  %v780_v12 = vrot.slane %v779_v1, 4  ;;  %v805_v15 = vperm.slane %v801_v5, %v2638_v26  ;;  %v829_v25 = vshrl.u32 %v762_v11, 16 }
 0x1af   : > { %v794_v7 = vsel %vm650_vm2, %v793_v3, %v786_v2  ;;  %v811_v8 = vperm.slane %v807_v27, %v2638_v26  ;;  %v825_v17 = vpack.i.b16 %v824_v10, %v823_v6  ;;  %v2749_v37 = vunpack.c.l.b16 %v822_v9 }
 0x1b0   : > { %v798_v19 = vperm.slane %v794_v7, %v2657_v39  ;;  %v781_v18 = vsel %vm650_vm2, 0, %v780_v12  ;;  %v875_v2 = vshrl.u32 %v847_v55, 16 }
 0x1b1   : > { %v812_v16 = vrot.slane %v811_v8, 4  ;;  %v828_v24 = vpack.i.b16 %v781_v18, %v762_v11  ;;  %v830_v28 = vshrl.u32 %v781_v18, 16  ;;  %v1359_v45 = vunpack.c.l.b16 %v825_v17 }
 0x1b2   : > { %v799_v20 = vrot.slane %v798_v19, 4  ;;  %v835_v30 = vshrl.u32 %v798_v19, 16  ;;  %v863_v8 = vshrl.u32 %v845_v59, 16 }
 0x1b3   : > { %v813_v21 = vsel %vm650_vm2, %v812_v16, %v805_v15  ;;  %v831_v31 = vpack.i.b16 %v830_v28, %v829_v25  ;;  %v2756_v46 = vunpack.c.l.b16 %v828_v24 }
 0x1b4   : > { %1094 = vrot.lane.b32.xlu0 %v2675_v58, %s2489_s18  ;;  %v817_v29 = vperm.slane %v813_v21, %v2657_v39  ;;  %v800_v35 = vsel %vm650_vm2, 0, %v799_v20 }
 0x1b5   : > { %v841_v43 = vshrl.u32 %v800_v35, 16  ;;  %v1411_v51 = vunpack.c.l.b16 %v831_v31 }
 0x1b6   : > { %v834_v32 = vpack.i.b16 %v817_v29, %v798_v19  ;;  %v836_v34 = vshrl.u32 %v817_v29, 16  ;;  %v818_v36 = vrot.slane %v817_v29, 4 }
 0x1b8   : > { %v2751_v38 = vunpack.c.l.b16 %v834_v32  ;;  %v837_v40 = vpack.i.b16 %v836_v34, %v835_v30  ;;  %v819_v22 = vsel %vm650_vm2, 0, %v818_v36 }
 0x1b9   : > { %v840_v41 = vpack.i.b16 %v819_v22, %v800_v35  ;;  %v842_v44 = vshrl.u32 %v819_v22, 16 }
 0x1ba   : > { %v1334_v58 = vpack.c.b16 %v2751_v38, %v2749_v37  ;;  %v1360_v33 = vunpack.c.l.b16 %v837_v40 }
 0x1bb   : > { %v2758_v47 = vunpack.c.l.b16 %v840_v41  ;;  %v843_v48 = vpack.i.b16 %v842_v44, %v841_v43 }
 0x1bc   : > { %v2760_v49 = vpack.c.b16 %v1360_v33, %v1359_v45 }
 0x1bd   : > { %v1387_v50 = vpack.c.b16 %v2758_v47, %v2756_v46  ;;  %v1412_v52 = vunpack.c.l.b16 %v843_v48 }
 0x1bf   : > { %v2764_v54 = vpack.c.b16 %v1412_v52, %v1411_v51 }
 0x1ee   : > { %v849_v56 = vpop.permute.xlu2 %848 }
 0x1ef   : > { %v864_v3 = vshrl.u32 %v849_v56, 16  ;;  %v862_v27 = vpack.i.b16 %v849_v56, %v845_v59 }
 0x1f1   : > { %v865_v12 = vpack.i.b16 %v864_v3, %v863_v8  ;;  %v888_v17 = vperm.slane %v862_v27, %v2638_v26 }
 0x1f3   : > { %v914_v30 = vperm.slane %v865_v12, %v2638_v26  ;;  %v896_v22 = vrot.slane %v888_v17, 4 }
 0x1f5   : > { %v922_v56 = vrot.slane %v914_v30, 4 }
 0x1f6   : > { %v855_v60 = vpop.permute.xlu2 %854 }
 0x1f7   : > { %v881_v62 = vshrl.u32 %v855_v60, 16 }
 0x205   : > { %v853_v57 = vpop.permute.xlu1 %852 }
 0x206   : > { %v869_v34 = vshrl.u32 %v853_v57, 16 }
 0x20d   : > { %v859_v61 = vpop.permute.xlu1 %858 }
 0x20e   : > { %v880_v63 = vpack.i.b16 %v859_v61, %v855_v60  ;;  %v882_v0 = vshrl.u32 %v859_v61, 16  ;;  %v851_v1 = vpop.permute.xlu0 %850 }
 0x20f   : > { %v874_v4 = vpack.i.b16 %v851_v1, %v847_v55  ;;  %v876_v5 = vshrl.u32 %v851_v1, 16 }
 0x210   : > { %v883_v6 = vpack.i.b16 %v882_v0, %v881_v62  ;;  %v945_v7 = vperm.slane %v880_v63, %v2638_v26 }
 0x211   : > { %v877_v9 = vpack.i.b16 %v876_v5, %v875_v2  ;;  %v940_v10 = vperm.slane %v874_v4, %v2638_v26 }
 0x212   : > { %v946_v19 = vrot.slane %v945_v7, 4  ;;  %v971_v11 = vperm.slane %v883_v6, %v2638_v26 }
 0x213   : > { %v948_v15 = vrot.slane %v940_v10, 4  ;;  %v966_v16 = vperm.slane %v877_v9, %v2638_v26 }
 0x214   : > { %v947_v18 = vsel %vm650_vm2, %v946_v19, %v940_v10  ;;  %v972_v20 = vrot.slane %v971_v11, 4 }
 0x215   : > { %v949_v21 = vsel %vm650_vm2, %v945_v7, %v948_v15  ;;  %v953_v24 = vperm.slane %v947_v18, %v2657_v39  ;;  %v974_v25 = vrot.slane %v966_v16, 4 }
 0x216   : > { %v957_v28 = vperm.slane %v949_v21, %v2657_v39  ;;  %v857_v29 = vpop.permute.xlu0 %856  ;;  %v973_v43 = vsel %vm650_vm2, %v972_v20, %v966_v16 }
 0x217   : > { %v975_v31 = vsel %vm650_vm2, %v971_v11, %v974_v25  ;;  %v868_v32 = vpack.i.b16 %v857_v29, %v853_v57  ;;  %v870_v40 = vshrl.u32 %v857_v29, 16  ;;  %v958_v41 = vrot.slane %v953_v24, 4 }
 0x218   : > { %v960_v35 = vrot.slane %v957_v28, 4  ;;  %v983_v36 = vperm.slane %v975_v31, %v2657_v39  ;;  %v979_v57 = vperm.slane %v973_v43, %v2657_v39 }
 0x219   : > { %v893_v44 = vperm.slane %v868_v32, %v2638_v26  ;;  %v871_v33 = vpack.i.b16 %v870_v40, %v869_v34  ;;  %v959_v61 = vsel %vm650_vm2, 0, %v958_v41 }
 0x21a   : > { %v961_v45 = vsel %vm650_vm2, 0, %v960_v35  ;;  %v986_v48 = vrot.slane %v983_v36, 4  ;;  %v984_v27 = vrot.slane %v979_v57, 4  ;;  %v1026_v9 = vsel %vm650_vm2, %v960_v35, %v953_v24 }
 0x21b   : > { %v1031_v51 = vrot.slane %v961_v45, 4  ;;  %v894_v52 = vrot.slane %v893_v44, 4  ;;  %v897_v55 = vsel %vm650_vm2, %v893_v44, %v896_v22  ;;  %v919_v60 = vperm.slane %v871_v33, %v2638_v26 }
 0x21c   : > { %v905_v59 = vperm.slane %v897_v55, %v2657_v39  ;;  %v987_v3 = vsel %vm650_vm2, 0, %v986_v48  ;;  %v985_v25 = vsel %vm650_vm2, 0, %v984_v27  ;;  %v1030_v31 = vperm.slane %v1026_v9, %v2638_v26 }
 0x21d   : > { %v895_v62 = vsel %vm650_vm2, %v894_v52, %v888_v17  ;;  %v920_v1 = vrot.slane %v919_v60, 4  ;;  %v923_v2 = vsel %vm650_vm2, %v919_v60, %v922_v56  ;;  %v1032_v4 = vsel %vm650_vm2, %v1031_v51, %v959_v61 }
 0x21e   : > { %v901_v63 = vperm.slane %v895_v62, %v2657_v39  ;;  %v908_v0 = vrot.slane %v905_v59, 4  ;;  %v931_v5 = vperm.slane %v923_v2, %v2657_v39  ;;  %v1050_v12 = vrot.slane %v987_v3, 4 }
 0x21f   : > { %v921_v8 = vsel %vm650_vm2, %v920_v1, %v914_v30  ;;  %v1036_v17 = vperm.slane %v1032_v4, %v2638_v26  ;;  %v1045_v43 = vsel %vm650_vm2, %v986_v48, %v979_v57 }
 0x220   : > { %v906_v6 = vrot.slane %v901_v63, 4  ;;  %v909_v7 = vsel %vm650_vm2, 0, %v908_v0  ;;  %v927_v10 = vperm.slane %v921_v8, %v2657_v39  ;;  %v934_v19 = vrot.slane %v931_v5, 4 }
 0x221   : > { %v993_v11 = vrot.slane %v909_v7, 4  ;;  %v988_v16 = vsel %vm650_vm2, %v908_v0, %v901_v63  ;;  %v1037_v32 = vrot.slane %v1036_v17, 4  ;;  %v1051_v40 = vsel %vm650_vm2, %v1050_v12, %v985_v25 }
 0x222   : > { %v907_v15 = vsel %vm650_vm2, 0, %v906_v6  ;;  %v932_v18 = vrot.slane %v927_v10, 4  ;;  %v935_v20 = vsel %vm650_vm2, 0, %v934_v19  ;;  %v992_v30 = vperm.slane %v988_v16, %v2638_v26 }
 0x223   : > { %v994_v21 = vsel %vm650_vm2, %v993_v11, %v907_v15  ;;  %v1012_v28 = vrot.slane %v935_v20, 4  ;;  %v1007_v35 = vsel %vm650_vm2, %v934_v19, %v927_v10  ;;  %v1038_v41 = vsel %vm650_vm2, %v1037_v32, %v1030_v31 }
 0x224   : > { %v998_v24 = vperm.slane %v994_v21, %v2638_v26  ;;  %v933_v29 = vsel %vm650_vm2, 0, %v932_v18  ;;  %v1042_v45 = vperm.slane %v1038_v41, %v2657_v39  ;;  %v1055_v33 = vperm.slane %v1051_v40, %v2638_v26 }
 0x225   : > { %v1013_v36 = vsel %vm650_vm2, %v1012_v28, %v933_v29  ;;  %v1011_v52 = vperm.slane %v1007_v35, %v2638_v26  ;;  %v1049_v56 = vperm.slane %v1045_v43, %v2638_v26 }
 0x226   : > { %v999_v34 = vrot.slane %v998_v24, 4  ;;  %v1017_v22 = vperm.slane %v1013_v36, %v2638_v26  ;;  %v1056_v59 = vrot.slane %v1055_v33, 4  ;;  %v1043_v60 = vrot.slane %v1042_v45, 4 }
 0x227   : > { %v1079_v2 = vshrl.u32 %v1042_v45, 16 }
 0x228   : > { %v1000_v44 = vsel %vm650_vm2, %v999_v34, %v992_v30  ;;  %v1018_v55 = vrot.slane %v1017_v22, 4  ;;  %v1057_v48 = vsel %vm650_vm2, %v1056_v59, %v1049_v56  ;;  %v1044_v63 = vsel %vm650_vm2, 0, %v1043_v60 }
 0x229   : > { %v1004_v51 = vperm.slane %v1000_v44, %v2657_v39  ;;  %v1061_v0 = vperm.slane %v1057_v48, %v2657_v39  ;;  %v1085_v9 = vshrl.u32 %v1044_v63, 16  ;;  %v2859_v48 = vpop.permute.xlu1 %1090 }
 0x22a   : > { %v1019_v61 = vsel %vm650_vm2, %v1018_v55, %v1011_v52 }
 0x22b   : > { %v1023_v62 = vperm.slane %v1019_v61, %v2657_v39  ;;  %v1005_v57 = vrot.slane %v1004_v51, 4  ;;  %v1067_v1 = vshrl.u32 %v1004_v51, 16  ;;  %v1078_v6 = vpack.i.b16 %v1061_v0, %v1042_v45 }
 0x22c   : > { %v1080_v7 = vshrl.u32 %v1061_v0, 16  ;;  %v1062_v8 = vrot.slane %v1061_v0, 4 }
 0x22d   : > { %v1066_v3 = vpack.i.b16 %v1023_v62, %v1004_v51  ;;  %v1068_v4 = vshrl.u32 %v1023_v62, 16  ;;  %v1006_v5 = vsel %vm650_vm2, 0, %v1005_v57  ;;  %v1024_v27 = vrot.slane %v1023_v62, 4  ;;  %v1089_v57 = vpop.permute.xlu0 %1088 }
 0x22e   : > { %v1073_v12 = vshrl.u32 %v1006_v5, 16  ;;  %v1336_v15 = vunpack.c.l.b16 %v1078_v6  ;;  %v1081_v16 = vpack.i.b16 %v1080_v7, %v1079_v2  ;;  %v1063_v17 = vsel %vm650_vm2, 0, %v1062_v8 }
 0x22f   : > { %v1335_v10 = vunpack.c.l.b16 %v1066_v3  ;;  %v1069_v19 = vpack.i.b16 %v1068_v4, %v1067_v1  ;;  %v1025_v11 = vsel %vm650_vm2, 0, %v1024_v27  ;;  %v1084_v21 = vpack.i.b16 %v1063_v17, %v1044_v63  ;;  %v1093_v63 = vpop.permute.xlu2 %1092 }
 0x230   : > { %v1072_v18 = vpack.i.b16 %v1025_v11, %v1006_v5  ;;  %v1074_v25 = vshrl.u32 %v1025_v11, 16  ;;  %v1086_v28 = vshrl.u32 %v1063_v17, 16  ;;  %v1363_v29 = vunpack.c.l.b16 %v1081_v16 }
 0x231   : > { %v1362_v20 = vunpack.c.l.b16 %v1069_v19  ;;  %v1337_v24 = vpack.c.b16 %v1336_v15, %v1335_v10  ;;  %v1389_v31 = vunpack.c.l.b16 %v1084_v21  ;;  %v2861_v0 = vpop.permute.xlu1 %1096 }
 0x232   : > { %v1388_v30 = vunpack.c.l.b16 %v1072_v18  ;;  %v1075_v32 = vpack.i.b16 %v1074_v25, %v1073_v12  ;;  %v1087_v34 = vpack.i.b16 %v1086_v28, %v1085_v9  ;;  %v1107_v28 = vshrl.u32 %v1089_v57, 16 }
 0x233   : > { %v1343_v35 = vsel %vm1338_vm3, %v1337_v24, 0  ;;  %v1364_v36 = vpack.c.b16 %v1363_v29, %v1362_v20  ;;  %v1108_v29 = vshrl.u32 %v1093_v63, 16 }
 0x234   : > { %1352 = vmatpush.bf16.xpose.msra.mxu2 %v1343_v35  ;;  %v1390_v40 = vpack.c.b16 %v1389_v31, %v1388_v30  ;;  %v1414_v22 = vunpack.c.l.b16 %v1075_v32  ;;  %v1415_v41 = vunpack.c.l.b16 %v1087_v34  ;;  %v1106_v34 = vpack.i.b16 %v1093_v63, %v1089_v57 }
 0x235   : > { %v1369_v43 = vsel %vm1338_vm3, %v1364_v36, 0  ;;  %v2863_v1 = vpop.permute.xlu0 %1094  ;;  %v1109_v35 = vpack.i.b16 %v1108_v29, %v1107_v28 }
 0x236   : > { %1378 = vmatpush.bf16.xpose.msra.mxu3 %v1369_v43  ;;  %v1395_v44 = vsel %vm1338_vm3, %v1390_v40, 0  ;;  %v1416_v45 = vpack.c.b16 %v1415_v41, %v1414_v22  ;;  %v1120_v43 = vshrl.u32 %v2863_v1, 16 }
 0x237   : > { %1404 = vmatpush.bf16.xpose.msrb.mxu0 %v1395_v44  ;;  %v1119_v44 = vshrl.u32 %v2859_v48, 16 }
 0x238   : > { %v1421_v33 = vsel %vm1338_vm3, %v1416_v45, 0 }
 0x239   : > { %1430 = vmatpush.bf16.xpose.msrb.mxu1 %v1421_v33  ;;  %v1132_v33 = vperm.slane %v1106_v34, %v2638_v26 }
 0x23b   : > { %2332 = vmatmul.msk.bf16.vlgmr.msra.gmra.mxu2 %vm1338_vm3, %v1334_v58 }
 0x23d   : > { %2333 = vmatmul.msk.bf16.vlgmr.msra.gmra.mxu3 %vm1338_vm3, %v2760_v49 }
 0x23e   : > { %2334 = vmatmul.msk.bf16.vlgmr.msrb.gmra.mxu0 %vm1338_vm3, %v1387_v50 }
 0x240   : > { %2335 = vmatmul.msk.bf16.vlgmr.msrb.gmra.mxu1 %vm1338_vm3, %v2764_v54 }
 0x2bb   : > { %v1406_v51 = vpop.f32.mrf.mxu0 }
 0x2bc   : > { %v1449_v52 = vsel %vm538_vm0, %v1406_v51, -inf }
 0x2bd   : > { %v2843_v55 = vpop.f32.mrf.mxu1  ;;  %1450 = vmax.xlane.f32.xlu2 %v1449_v52 }
 0x2be   : > { %v1455_v37 = vsel %vm538_vm0, %v2843_v55, -inf  ;;  %v1354_v38 = vpop.f32.mrf.mxu2 }
 0x2bf   : > { %1456 = vmax.xlane.f32.xlu1 %v1455_v37  ;;  %v1437_v46 = vsel %vm538_vm0, %v1354_v38, -inf  ;;  %v1118_v37 = vpack.i.b16 %v2863_v1, %v2859_v48 }
 0x2c0   : > { %v1380_v58 = vpop.f32.mrf.mxu3 }
 0x2c1   : > { %v1443_v50 = vsel %vm538_vm0, %v1380_v58, -inf }
 0x2c3   : > { %v1408_v49 = vpop.f32.mrf.mxu0 }
 0x2c4   : > { %v1452_v47 = vsel %vm538_vm0, %v1408_v49, -inf }
 0x2c5   : > { %1438 = vmax.xlane.f32.xlu2 %v1437_v46  ;;  %1453 = vmax.xlane.f32.xlu0 %v1452_v47  ;;  %v1434_v54 = vpop.f32.mrf.mxu1 }
 0x2c6   : > { %v1356_v56 = vpop.f32.mrf.mxu2  ;;  %v1458_v59 = vsel %vm538_vm0, %v1434_v54, -inf }
 0x2c7   : > { %1444 = vmax.xlane.f32.xlu1 %v1443_v50  ;;  %v1440_v60 = vsel %vm538_vm0, %v1356_v56, -inf }
 0x2c8   : > { %v1382_v61 = vpop.f32.mrf.mxu3 }
 0x2c9   : > { %v1446_v62 = vsel %vm538_vm0, %v1382_v61, -inf }
 0x2cd   : > { %1459 = vmax.xlane.f32.xlu2 %v1458_v59  ;;  %1441 = vmax.xlane.f32.xlu0 %v1440_v60 }
 0x2d5   : > { %1447 = vmax.xlane.f32.xlu2 %v1446_v62 }
 0x2e0   : > { %1102 = vrot.lane.b32.xlu1 %v2660_v42, %s2489_s18 }
 0x2e1   : > { %1098 = vrot.lane.b32.xlu0 %v2668_v53, %s2489_s18 }
 0x2ed   : > { %1100 = vrot.lane.b32.xlu2 %v2636_v23, %s2489_s18 }
 0x330   : > { %v1451_v2 = vpop.xlane.xlu2 %1450 }
 0x331   : > { %v1465_v3 = vsub.f32 %v1406_v51, %v1451_v2  ;;  %v1158_v51 = vperm.slane %v1109_v35, %v2638_v26 }
 0x332   : > { %v1457_v4 = vpop.xlane.xlu1 %1456 }
 0x333   : > { %v1477_v5 = vmul.f32 1.442695, %v1465_v3  ;;  %v1467_v36 = vsub.f32 %v2843_v55, %v1457_v4 }
 0x335   : > { %2433 = vpow2.f32 %v1477_v5  ;;  %v1481_v52 = vmul.f32 1.442695, %v1467_v36 }
 0x338   : > { %v1439_v42 = vpop.xlane.xlu2 %1438  ;;  %v1454_v27 = vpop.xlane.xlu0 %1453 }
 0x339   : > { %v1461_v6 = vsub.f32 %v1354_v38, %v1439_v42  ;;  %v1466_v10 = vsub.f32 %v1408_v49, %v1454_v27  ;;  %v1121_v38 = vpack.i.b16 %v1120_v43, %v1119_v44  ;;  %v1113_v49 = vshrl.u32 %v2861_v0, 16 }
 0x33a   : > { %v1445_v53 = vpop.xlane.xlu1 %1444 }
 0x33b   : > { %v2865_v7 = vpop.eup %2433  ;;  %v1469_v23 = vmul.f32 1.442695, %v1461_v6  ;;  %v1463_v8 = vsub.f32 %v1380_v58, %v1445_v53  ;;  %v1479_v15 = vmul.f32 1.442695, %v1466_v10  ;;  %v1210_v1 = vperm.slane %v1121_v38, %v2638_v26 }
 0x33c   : > { %v1497_v9 = vsel %vm538_vm0, %v2865_v7, 0.0 }
 0x33d   : > { %2435 = vpow2.f32 %v1469_v23  ;;  %v1473_v19 = vmul.f32 1.442695, %v1463_v8  ;;  %1498 = vadd.xlane.f32.xlu2 %v1497_v9 }
 0x33f   : > { %2437 = vpow2.f32 %v1473_v19 }
 0x340   : > { %v1460_v11 = vpop.xlane.xlu2 %1459  ;;  %v1442_v12 = vpop.xlane.xlu0 %1441  ;;  %2439 = vpow2.f32 %v1479_v15 }
 0x341   : > { %v1462_v16 = vsub.f32 %v1356_v56, %v1442_v12  ;;  %v1468_v20 = vsub.f32 %v1434_v54, %v1460_v11  ;;  %v1140_v54 = vrot.slane %v1132_v33, 4  ;;  %v1166_v56 = vrot.slane %v1158_v51, 4 }
 0x343   : > { %v2869_v17 = vpop.eup %2435  ;;  %v1471_v18 = vmul.f32 1.442695, %v1462_v16  ;;  %v1483_v30 = vmul.f32 1.442695, %v1468_v20  ;;  %v1218_v20 = vrot.slane %v1210_v1, 4 }
 0x344   : > { %v1485_v21 = vsel %vm538_vm0, %v2869_v17, 0.0 }
 0x345   : > { %v2873_v25 = vpop.eup %2437  ;;  %1486 = vadd.xlane.f32.xlu0 %v1485_v21  ;;  %2441 = vpow2.f32 %v1471_v18 }
 0x346   : > { %v1491_v24 = vsel %vm538_vm0, %v2873_v25, 0.0  ;;  %v2878_v40 = vpop.eup %2439  ;;  %2443 = vpow2.f32 %v1483_v30 }
 0x347   : > { %1492 = vadd.xlane.f32.xlu1 %v1491_v24  ;;  %v1500_v55 = vsel %vm538_vm0, %v2878_v40, 0.0 }
 0x348   : > { %v1448_v31 = vpop.xlane.xlu2 %1447 }
 0x349   : > { %v1464_v32 = vsub.f32 %v1382_v61, %v1448_v31  ;;  %v1184_v61 = vperm.slane %v1118_v37, %v2638_v26 }
 0x34b   : > { %v1475_v22 = vmul.f32 1.442695, %v1464_v32  ;;  %v2880_v41 = vpop.eup %2441  ;;  %v1192_v8 = vrot.slane %v1184_v61, 4 }
 0x34c   : > { %v1488_v45 = vsel %vm538_vm0, %v2880_v41, 0.0  ;;  %v2894_v50 = vpop.eup %2443 }
 0x34d   : > { %2445 = vpow2.f32 %v1475_v22  ;;  %1489 = vadd.xlane.f32.xlu2 %v1488_v45  ;;  %v1506_v27 = vsel %vm538_vm0, %v2894_v50, 0.0 }
 0x34e   : > { %2447 = vpow2.f32 %v1481_v52 }
 0x34f   : > { %1501 = vadd.xlane.f32.xlu1 %v1500_v55 }
 0x350   : > { %v1101_v58 = vpop.permute.xlu2 %1100 }
 0x351   : > { %v1112_v46 = vpack.i.b16 %v1101_v58, %v2861_v0  ;;  %v1114_v47 = vshrl.u32 %v1101_v58, 16 }
 0x352   : > { %v1103_v59 = vpop.permute.xlu1 %1102 }
 0x353   : > { %v2896_v60 = vpop.eup %2445  ;;  %v1115_v62 = vpack.i.b16 %v1114_v47, %v1113_v49  ;;  %v1137_v48 = vperm.slane %v1112_v46, %v2638_v26  ;;  %v1126_v57 = vshrl.u32 %v1103_v59, 16  ;;  %v1099_v63 = vpop.permute.xlu0 %1098 }
 0x354   : > { %v1124_v2 = vpack.i.b16 %v1103_v59, %v1099_v63  ;;  %v1125_v0 = vshrl.u32 %v1099_v63, 16  ;;  %v1494_v3 = vsel %vm538_vm0, %v2896_v60, 0.0  ;;  %v2911_v11 = vpop.eup %2447 }
 0x355   : > { %v1138_v4 = vrot.slane %v1137_v48, 4  ;;  %v1141_v5 = vsel %vm650_vm2, %v1137_v48, %v1140_v54  ;;  %v1163_v42 = vperm.slane %v1115_v62, %v2638_v26  ;;  %1495 = vadd.xlane.f32.xlu0 %v1494_v3  ;;  %1507 = vadd.xlane.f32.xlu2 %v1506_v27  ;;  %v1503_v22 = vsel %vm538_vm0, %v2911_v11, 0.0 }
 0x356   : > { %v1149_v6 = vperm.slane %v1141_v5, %v2657_v39  ;;  %v1127_v53 = vpack.i.b16 %v1126_v57, %v1125_v0  ;;  %v1189_v23 = vperm.slane %v1124_v2, %v2638_v26 }
 0x357   : > { %v1139_v9 = vsel %vm650_vm2, %v1138_v4, %v1132_v33  ;;  %v1164_v10 = vrot.slane %v1163_v42, 4  ;;  %v1167_v19 = vsel %vm650_vm2, %v1163_v42, %v1166_v56 }
 0x358   : > { %v1145_v12 = vperm.slane %v1139_v9, %v2657_v39  ;;  %v1152_v15 = vrot.slane %v1149_v6, 4  ;;  %v1175_v16 = vperm.slane %v1167_v19, %v2657_v39  ;;  %v1190_v18 = vrot.slane %v1189_v23, 4 }
 0x359   : > { %v1165_v21 = vsel %vm650_vm2, %v1164_v10, %v1158_v51  ;;  %v1193_v28 = vsel %vm650_vm2, %v1189_v23, %v1192_v8  ;;  %v1215_v24 = vperm.slane %v1127_v53, %v2638_v26 }
 0x35a   : > { %v1150_v29 = vrot.slane %v1145_v12, 4  ;;  %v1153_v30 = vsel %vm650_vm2, 0, %v1152_v15  ;;  %v1171_v31 = vperm.slane %v1165_v21, %v2657_v39  ;;  %v1178_v32 = vrot.slane %v1175_v16, 4 }
 0x35b   : > { %v1237_v34 = vrot.slane %v1153_v30, 4  ;;  %v1191_v35 = vsel %vm650_vm2, %v1190_v18, %v1184_v61  ;;  %v1201_v36 = vperm.slane %v1193_v28, %v2657_v39  ;;  %v1216_v55 = vrot.slane %v1215_v24, 4 }
 0x35c   : > { %v1151_v43 = vsel %vm650_vm2, 0, %v1150_v29  ;;  %v1176_v44 = vrot.slane %v1171_v31, 4  ;;  %v1179_v45 = vsel %vm650_vm2, 0, %v1178_v32  ;;  %v1197_v33 = vperm.slane %v1191_v35, %v2657_v39 }
 0x35d   : > { %v1256_v51 = vrot.slane %v1179_v45, 4  ;;  %v1204_v52 = vrot.slane %v1201_v36, 4  ;;  %v1219_v37 = vsel %vm650_vm2, %v1215_v24, %v1218_v20  ;;  %1504 = vadd.xlane.f32.xlu0 %v1503_v22  ;;  %v1232_v46 = vsel %vm650_vm2, %v1152_v15, %v1145_v12 }
 0x35e   : > { %v1177_v38 = vsel %vm650_vm2, 0, %v1176_v44  ;;  %v1202_v58 = vrot.slane %v1197_v33, 4  ;;  %v1227_v49 = vperm.slane %v1219_v37, %v2657_v39  ;;  %v1217_v54 = vsel %vm650_vm2, %v1216_v55, %v1210_v1 }
 0x35f   : > { %v1205_v47 = vsel %vm650_vm2, 0, %v1204_v52  ;;  %v1238_v56 = vsel %vm650_vm2, %v1237_v34, %v1151_v43  ;;  %v1223_v61 = vperm.slane %v1217_v54, %v2657_v39  ;;  %v1251_v63 = vsel %vm650_vm2, %v1178_v32, %v1171_v31 }
 0x360   : > { %v1203_v59 = vsel %vm650_vm2, 0, %v1202_v58  ;;  %v1230_v62 = vrot.slane %v1227_v49, 4  ;;  %v1275_v48 = vrot.slane %v1205_v47, 4  ;;  %v1242_v57 = vperm.slane %v1238_v56, %v2638_v26 }
 0x361   : > { %v1257_v2 = vsel %vm650_vm2, %v1256_v51, %v1177_v38  ;;  %v1228_v0 = vrot.slane %v1223_v61, 4  ;;  %v1270_v4 = vsel %vm650_vm2, %v1204_v52, %v1197_v33  ;;  %v1236_v42 = vperm.slane %v1232_v46, %v2638_v26 }
 0x362   : > { %v1231_v3 = vsel %vm650_vm2, 0, %v1230_v62  ;;  %v1261_v1 = vperm.slane %v1257_v2, %v2638_v26  ;;  %v1243_v27 = vrot.slane %v1242_v57, 4  ;;  %v1276_v6 = vsel %vm650_vm2, %v1275_v48, %v1203_v59 }
 0x363   : > { %v1294_v5 = vrot.slane %v1231_v3, 4  ;;  %v1229_v53 = vsel %vm650_vm2, 0, %v1228_v0  ;;  %v1255_v23 = vperm.slane %v1251_v63, %v2638_v26  ;;  %v1280_v9 = vperm.slane %v1276_v6, %v2638_v26 }
 0x364   : > { %v1262_v8 = vrot.slane %v1261_v1, 4  ;;  %v1244_v10 = vsel %vm650_vm2, %v1243_v27, %v1236_v42  ;;  %v1274_v19 = vperm.slane %v1270_v4, %v2638_v26  ;;  %v1289_v12 = vsel %vm650_vm2, %v1230_v62, %v1223_v61 }
 0x365   : > { %v1295_v15 = vsel %vm650_vm2, %v1294_v5, %v1229_v53  ;;  %v1248_v16 = vperm.slane %v1244_v10, %v2657_v39  ;;  %v1281_v20 = vrot.slane %v1280_v9, 4  ;;  %v1293_v29 = vperm.slane %v1289_v12, %v2638_v26 }
 0x366   : > { %v1263_v18 = vsel %vm650_vm2, %v1262_v8, %v1255_v23  ;;  %v1299_v21 = vperm.slane %v1295_v15, %v2638_v26 }
 0x367   : > { %v1267_v28 = vperm.slane %v1263_v18, %v2657_v39  ;;  %v1282_v24 = vsel %vm650_vm2, %v1281_v20, %v1274_v19  ;;  %v1249_v31 = vrot.slane %v1248_v16, 4  ;;  %v1311_v22 = vshrl.u32 %v1248_v16, 16 }
 0x368   : > { %v1300_v30 = vrot.slane %v1299_v21, 4  ;;  %v1286_v32 = vperm.slane %v1282_v24, %v2657_v39 }
 0x369   : > { %v1312_v34 = vshrl.u32 %v1267_v28, 16  ;;  %v1268_v35 = vrot.slane %v1267_v28, 4  ;;  %v1310_v44 = vpack.i.b16 %v1267_v28, %v1248_v16  ;;  %v1250_v45 = vsel %vm650_vm2, 0, %v1249_v31 }
 0x36a   : > { %v1301_v36 = vsel %vm650_vm2, %v1300_v30, %v1293_v29  ;;  %v1287_v52 = vrot.slane %v1286_v32, 4  ;;  %v1323_v37 = vshrl.u32 %v1286_v32, 16  ;;  %v1317_v47 = vshrl.u32 %v1250_v45, 16 }
 0x36b   : > { %v1305_v43 = vperm.slane %v1301_v36, %v2657_v39  ;;  %v1313_v33 = vpack.i.b16 %v1312_v34, %v1311_v22  ;;  %v1269_v51 = vsel %vm650_vm2, 0, %v1268_v35  ;;  %v1642_v56 = vunpack.c.l.b16 %v1310_v44 }
 0x36c   : > { %v1288_v49 = vsel %vm650_vm2, 0, %v1287_v52  ;;  %v1316_v46 = vpack.i.b16 %v1269_v51, %v1250_v45  ;;  %v1318_v54 = vshrl.u32 %v1269_v51, 16 }
 0x36d   : > { %v1322_v55 = vpack.i.b16 %v1305_v43, %v1286_v32  ;;  %v1324_v38 = vshrl.u32 %v1305_v43, 16  ;;  %v1306_v58 = vrot.slane %v1305_v43, 4  ;;  %v1329_v63 = vshrl.u32 %v1288_v49, 16 }
 0x36e   : > { %v1319_v57 = vpack.i.b16 %v1318_v54, %v1317_v47  ;;  %v1668_v3 = vunpack.c.l.b16 %v1313_v33  ;;  %v1694_v1 = vunpack.c.l.b16 %v1316_v46 }
 0x36f   : > { %v1643_v59 = vunpack.c.l.b16 %v1322_v55  ;;  %v1325_v61 = vpack.i.b16 %v1324_v38, %v1323_v37  ;;  %v1307_v62 = vsel %vm650_vm2, 0, %v1306_v58 }
 0x370   : > { %v1328_v48 = vpack.i.b16 %v1307_v62, %v1288_v49  ;;  %v1330_v2 = vshrl.u32 %v1307_v62, 16  ;;  %v1720_v53 = vunpack.c.l.b16 %v1319_v57 }
 0x371   : > { %v1644_v0 = vpack.c.b16 %v1643_v59, %v1642_v56  ;;  %v1669_v4 = vunpack.c.l.b16 %v1325_v61 }
 0x372   : > { %v1695_v5 = vunpack.c.l.b16 %v1328_v48  ;;  %v1331_v42 = vpack.i.b16 %v1330_v2, %v1329_v63 }
 0x373   : > { %1656 = vmatpush.bf16.msrb.mxu2 %v1644_v0  ;;  %v1670_v27 = vpack.c.b16 %v1669_v4, %v1668_v3 }
 0x374   : > { %v1696_v6 = vpack.c.b16 %v1695_v5, %v1694_v1  ;;  %v1721_v23 = vunpack.c.l.b16 %v1331_v42 }
 0x375   : > { %1682 = vmatpush.bf16.msrb.mxu3 %v1670_v27 }
 0x376   : > { %1708 = vmatpush.bf16.msra.mxu0 %v1696_v6  ;;  %v1722_v8 = vpack.c.b16 %v1721_v23, %v1720_v53 }
 0x378   : > { %1734 = vmatpush.bf16.msra.mxu1 %v1722_v8 }
 0x3b0   : > { %v1499_v9 = vpop.xlane.xlu2 %1498 }
 0x3b1   : > { %2449 = vrcp.f32 %v1499_v9  ;;  %v1580_v20 = vand.u32 2147483648, %v1499_v9  ;;  %v1578_v21 = vand.u32 2147483647, %v1499_v9  ;;  %vm1574_vm5 = vweird.f32 %v1499_v9 }
 0x3b3   : > { %v1581_v30 = vor.u32 1.1754944e-38, %v1580_v20  ;;  %vm1579_vm7 = vcmp.eq.f32.partialorder %v1578_v21, 8.507059e+37 }
 0x3b7   : > { %v2450_v10 = vpop.eup %2449 }
 0x3b8   : > { %v1570_v19 = vmul.f32 %v2450_v10, %v1499_v9  ;;  %v1487_v12 = vpop.xlane.xlu0 %1486  ;;  %vm1575_vm4 = vweird.f32 %v2450_v10 }
 0x3b9   : > { %2451 = vrcp.f32 %v1487_v12  ;;  %vm1576_vm6 = vmor %vm1574_vm5, %vm1575_vm4  ;;  %v1518_v44 = vand.u32 2147483647, %v1487_v12  ;;  %v1520_v45 = vand.u32 2147483648, %v1487_v12  ;;  %vm1514_vm9 = vweird.f32 %v1487_v12 }
 0x3ba   : > { %v1571_v15 = vsub.f32 1.0, %v1570_v19  ;;  %v1493_v16 = vpop.xlane.xlu1 %1492 }
 0x3bb   : > { %2453 = vrcp.f32 %v1493_v16  ;;  %vm2975_vm10 = vcmp.eq.f32.partialorder %v1518_v44, 8.507059e+37  ;;  %v1521_v58 = vor.u32 1.1754944e-38, %v1520_v45  ;;  %v1548_v49 = vand.u32 2147483647, %v1493_v16 }
 0x3bc   : > { %v1572_v18 = vmul.f32 %v2450_v10, %v1571_v15  ;;  %v1550_v46 = vand.u32 2147483648, %v1493_v16  ;;  %vm1544_vm12 = vweird.f32 %v1493_v16 }
 0x3bd   : > { %vm2998_vm14 = vcmp.eq.f32.partialorder %v1548_v49, 8.507059e+37 }
 0x3be   : > { %v1573_v28 = vadd.f32 %v2450_v10, %v1572_v18  ;;  %v1551_v1 = vor.u32 1.1754944e-38, %v1550_v46 }
 0x3bf   : > { %v2452_v24 = vpop.eup %2451 }
 0x3c0   : > { %v1577_v29 = vsel %vm1576_vm6, %v2450_v10, %v1573_v28  ;;  %v1510_v31 = vmul.f32 %v2452_v24, %v1487_v12  ;;  %v2966_v34 = vpop.xlane.xlu2 %1489  ;;  %vm1515_vm8 = vweird.f32 %v2452_v24 }
 0x3c1   : > { %v2964_v32 = vpop.eup %2453  ;;  %v1582_v35 = vsel %vm1579_vm7, %v1581_v30, %v1577_v29  ;;  %2455 = vrcp.f32 %v2966_v34  ;;  %vm2979_vm11 = vmor %vm1514_vm9, %vm1515_vm8  ;;  %v1535_v54 = vand.u32 2147483648, %v2966_v34  ;;  %vm1529_vm15 = vweird.f32 %v2966_v34 }
 0x3c2   : > { %v1511_v36 = vsub.f32 1.0, %v1510_v31  ;;  %v1540_v22 = vmul.f32 %v2964_v32, %v1493_v16  ;;  %v2969_v43 = vpop.xlane.xlu1 %1501  ;;  %v1583_v52 = vmul.f32 %v2865_v7, %v1582_v35  ;;  %vm1545_vm13 = vweird.f32 %v2964_v32 }
 0x3c3   : > { %2457 = vrcp.f32 %v2969_v43  ;;  %v1533_v7 = vand.u32 2147483647, %v2966_v34  ;;  %v1593_v0 = vand.u32 2147483647, %v2969_v43  ;;  %v1595_v3 = vand.u32 2147483648, %v2969_v43  ;;  %vm3009_vm4 = vmor %vm1544_vm12, %vm1545_vm13 }
 0x3c4   : > { %v1512_v33 = vmul.f32 %v2452_v24, %v1511_v36  ;;  %v1541_v51 = vsub.f32 1.0, %v1540_v22  ;;  %v1633_v61 = vpack.c.bf16 %v1583_v52, %v1583_v52  ;;  %v1536_v23 = vor.u32 1.1754944e-38, %v1535_v54 }
 0x3c5   : > { %vm3013_vm5 = vcmp.eq.f32.partialorder %v1533_v7, 8.507059e+37  ;;  %vm1589_vm6 = vweird.f32 %v2969_v43  ;;  %vm3023_vm8 = vcmp.eq.f32.partialorder %v1593_v0, 8.507059e+37  ;;  %v1596_v15 = vor.u32 1.1754944e-38, %v1595_v3 }
 0x3c6   : > { %v1513_v55 = vadd.f32 %v2452_v24, %v1512_v33  ;;  %v1542_v37 = vmul.f32 %v2964_v32, %v1541_v51  ;;  %v3017_v8 = vunpack.c.l.b16 %v1633_v61 }
 0x3c7   : > { %v2456_v59 = vpop.eup %2455 }
 0x3c8   : > { %v2986_v56 = vpop.xlane.xlu0 %1495  ;;  %v1517_v62 = vsel %vm2979_vm11, %v2452_v24, %v1513_v55  ;;  %v1543_v48 = vadd.f32 %v2964_v32, %v1542_v37  ;;  %v2991_v57 = vpop.xlane.xlu2 %1507  ;;  %v1525_v2 = vmul.f32 %v2456_v59, %v2966_v34  ;;  %vm1530_vm7 = vweird.f32 %v2456_v59 }
 0x3c9   : > { %2459 = vrcp.f32 %v2986_v56  ;;  %v2458_v63 = vpop.eup %2457  ;;  %v1522_v42 = vsel %vm2975_vm10, %v1521_v58, %v1517_v62  ;;  %vm1559_vm10 = vweird.f32 %v2986_v56  ;;  %v1563_v30 = vand.u32 2147483647, %v2986_v56  ;;  %vm1531_vm11 = vmor %vm1529_vm15, %vm1530_vm7 }
 0x3ca   : > { %2461 = vrcp.f32 %v2991_v57  ;;  %v1585_v5 = vmul.f32 %v2458_v63, %v2969_v43  ;;  %v1526_v6 = vsub.f32 1.0, %v1525_v2  ;;  %v1547_v9 = vsel %vm3009_vm4, %v2964_v32, %v1543_v48 }
 0x3cb   : > { %vm1590_vm9 = vweird.f32 %v2458_v63  ;;  %v1523_v20 = vmul.f32 %v2869_v17, %v1522_v42  ;;  %v1552_v28 = vsel %vm2998_vm14, %v1551_v1, %v1547_v9  ;;  %vm1619_vm12 = vweird.f32 %v2991_v57 }
 0x3cc   : > { %v1586_v10 = vsub.f32 1.0, %v1585_v5  ;;  %v1527_v19 = vmul.f32 %v2456_v59, %v1526_v6  ;;  %vm1591_vm13 = vmor %vm1589_vm6, %vm1590_vm9  ;;  %v1623_v36 = vand.u32 2147483647, %v2991_v57  ;;  %v1565_v44 = vand.u32 2147483648, %v2986_v56 }
 0x3cd   : > { %v1629_v51 = vpack.c.bf16 %v1523_v20, %v1523_v20  ;;  %v1625_v58 = vand.u32 2147483648, %v2991_v57  ;;  %vm3052_vm4 = vcmp.eq.f32.partialorder %v1563_v30, 8.507059e+37  ;;  %v1553_v7 = vmul.f32 %v2873_v25, %v1552_v28 }
 0x3ce   : > { %v1587_v18 = vmul.f32 %v2458_v63, %v1586_v10  ;;  %v1528_v24 = vadd.f32 %v2456_v59, %v1527_v19 }
 0x3cf   : > { %v2460_v16 = vpop.eup %2459  ;;  %v1626_v3 = vor.u32 1.1754944e-38, %v1625_v58  ;;  %v1631_v42 = vpack.c.bf16 %v1553_v7, %v1553_v7 }
 0x3d0   : > { %v2462_v21 = vpop.eup %2461  ;;  %v1555_v29 = vmul.f32 %v2460_v16, %v2986_v56  ;;  %v3033_v31 = vpop.xlane.xlu0 %1504  ;;  %v1588_v32 = vadd.f32 %v2458_v63, %v1587_v18  ;;  %v1532_v17 = vsel %vm1531_vm11, %v2456_v59, %v1528_v24  ;;  %vm1560_vm14 = vweird.f32 %v2460_v16 }
 0x3d1   : > { %v1615_v35 = vmul.f32 %v2462_v21, %v2991_v57  ;;  %2463 = vrcp.f32 %v3033_v31  ;;  %v1537_v34 = vsel %vm3013_vm5, %v1536_v23, %v1532_v17  ;;  %vm1620_vm15 = vweird.f32 %v2462_v21  ;;  %vm1561_vm6 = vmor %vm1559_vm10, %vm1560_vm14 }
 0x3d2   : > { %v1556_v22 = vsub.f32 1.0, %v1555_v29  ;;  %v1592_v45 = vsel %vm1591_vm13, %v2458_v63, %v1588_v32  ;;  %v1538_v37 = vmul.f32 %v2880_v41, %v1537_v34  ;;  %vm3057_vm5 = vcmp.eq.f32.partialorder %v1623_v36, 8.507059e+37  ;;  %vm1621_vm7 = vmor %vm1619_vm12, %vm1620_vm15 }
 0x3d3   : > { %v1616_v33 = vsub.f32 1.0, %v1615_v35  ;;  %v1597_v52 = vsel %vm3023_vm8, %v1596_v15, %v1592_v45  ;;  %v1639_v63 = vunpack.c.l.b16 %v1629_v51  ;;  %v1610_v27 = vand.u32 2147483648, %v3033_v31 }
 0x3d4   : > { %v1557_v55 = vmul.f32 %v2460_v16, %v1556_v22  ;;  %v1598_v43 = vmul.f32 %v2878_v40, %v1597_v52  ;;  %v1630_v47 = vpack.c.bf16 %v1538_v37, %v1538_v37  ;;  %v1566_v40 = vor.u32 1.1754944e-38, %v1565_v44 }
 0x3d5   : > { %v1617_v38 = vmul.f32 %v2462_v21, %v1616_v33  ;;  %v1608_v23 = vand.u32 2147483647, %v3033_v31  ;;  %vm1604_vm9 = vweird.f32 %v3033_v31  ;;  %v1665_v19 = vunpack.c.l.b16 %v1631_v42 }
 0x3d6   : > { %v1558_v49 = vadd.f32 %v2460_v16, %v1557_v55  ;;  %v1634_v59 = vpack.c.bf16 %v1598_v43, %v1598_v43  ;;  %v1640_v2 = vunpack.c.l.b16 %v1630_v47  ;;  %v1611_v15 = vor.u32 1.1754944e-38, %v1610_v27 }
 0x3d7   : > { %v2464_v54 = vpop.eup %2463  ;;  %v1618_v61 = vadd.f32 %v2462_v21, %v1617_v38  ;;  %vm1609_vm11 = vcmp.eq.f32.partialorder %v1608_v23, 8.507059e+37 }
 0x3d8   : > { %v1562_v41 = vsel %vm1561_vm6, %v2460_v16, %v1558_v49  ;;  %v1600_v48 = vmul.f32 %v2464_v54, %v3033_v31  ;;  %v1692_v25 = vunpack.c.l.b16 %v1634_v59  ;;  %v1641_v5 = vpack.c.b16 %v1640_v2, %v1639_v63 }
 0x3d9   : > { %v1622_v0 = vsel %vm1621_vm7, %v2462_v21, %v1618_v61  ;;  %v1567_v4 = vsel %vm3052_vm4, %v1566_v40, %v1562_v41  ;;  %vm1605_vm8 = vweird.f32 %v2464_v54 }
 0x3da   : > { %v1601_v1 = vsub.f32 1.0, %v1600_v48  ;;  %v1568_v56 = vmul.f32 %v2896_v60, %v1567_v4  ;;  %v1627_v57 = vsel %vm3057_vm5, %v1626_v3, %v1622_v0  ;;  %v1693_v6 = vpack.c.b16 %v1692_v25, %v3017_v8  ;;  %2336 = vmatmul.msk.bf16.vlgmr.msrb.gmra.mxu2 %vm538_vm0, %v1641_v5  ;;  %vm1606_vm10 = vmor %vm1604_vm9, %vm1605_vm8 }
 0x3db   : > { %v1628_v60 = vmul.f32 %v2894_v50, %v1627_v57  ;;  %vm2173_vm5 = vcmask 523264   ;;  %vm2251_vm9 = vcmask 257024  }
 0x3dc   : > { %v1602_v53 = vmul.f32 %v2464_v54, %v1601_v1  ;;  %v1632_v9 = vpack.c.bf16 %v1568_v56, %v1568_v56  ;;  %2338 = vmatmul.msk.bf16.vlgmr.msra.gmra.mxu0 %vm538_vm0, %v1693_v6 }
 0x3dd   : > { %v1636_v20 = vpack.c.bf16 %v1628_v60, %v1628_v60 }
 0x3de   : > { %v1603_v10 = vadd.f32 %v2464_v54, %v1602_v53  ;;  %v1666_v12 = vunpack.c.l.b16 %v1632_v9 }
 0x3df   : > { %v1718_v24 = vunpack.c.l.b16 %v1636_v20 }
 0x3e0   : > { %v1607_v16 = vsel %vm1606_vm10, %v2464_v54, %v1603_v10  ;;  %v1667_v8 = vpack.c.b16 %v1666_v12, %v1665_v19 }
 0x3e1   : > { %v1612_v18 = vsel %vm1609_vm11, %v1611_v15, %v1607_v16 }
 0x3e2   : > { %v1613_v21 = vmul.f32 %v2911_v11, %v1612_v18  ;;  %2337 = vmatmul.msk.bf16.vlgmr.msrb.gmra.mxu3 %vm538_vm0, %v1667_v8 }
 0x3e4   : > { %v1635_v28 = vpack.c.bf16 %v1613_v21, %v1613_v21 }
 0x3e6   : > { %v1717_v29 = vunpack.c.l.b16 %v1635_v28 }
 0x3e8   : > { %v1719_v30 = vpack.c.b16 %v1718_v24, %v1717_v29 }
 0x3ea   : > { %2339 = vmatmul.msk.bf16.vlgmr.msra.gmra.mxu1 %vm538_vm0, %v1719_v30 }
 0x459   : > { %v1710_v50 = vpop.f32.mrf.mxu0 }
 0x45a   : > { %v1741_v35 = vrot.slane %v1710_v50, 4 }
 0x45d   : > { %v1658_v31 = vpop.f32.mrf.mxu2 }
 0x45e   : > { %v1744_v32 = vrot.slane %v1658_v31, 4  ;;  %v1743_v36 = vsel %vm650_vm2, %v1741_v35, %v1658_v31 }
 0x45f   : > { %v1749_v45 = vperm.slane %v1743_v36, %v2638_v26 }
 0x460   : > { %v1745_v17 = vsel %vm650_vm2, %v1710_v50, %v1744_v32 }
 0x461   : > { %v1712_v22 = vpop.f32.mrf.mxu0  ;;  %v1753_v11 = vperm.slane %v1745_v17, %v2638_v26  ;;  %v1768_v7 = vrot.slane %v1749_v45, 4 }
 0x462   : > { %v1798_v33 = vrot.slane %v1712_v22, 4 }
 0x463   : > { %v1780_v49 = vrot.slane %v1753_v11, 4 }
 0x465   : > { %v1684_v44 = vpop.f32.mrf.mxu3  ;;  %v1660_v51 = vpop.f32.mrf.mxu2 }
 0x466   : > { %v1756_v34 = vrot.slane %v1684_v44, 4  ;;  %v1800_v55 = vrot.slane %v1660_v51, 4  ;;  %v1799_v38 = vsel %vm650_vm2, %v1798_v33, %v1660_v51 }
 0x467   : > { %v1736_v52 = vpop.f32.mrf.mxu1  ;;  %v1805_v61 = vperm.slane %v1799_v38, %v2638_v26 }
 0x468   : > { %v1754_v37 = vrot.slane %v1736_v52, 4  ;;  %v1757_v43 = vsel %vm650_vm2, %v1736_v52, %v1756_v34  ;;  %v1801_v46 = vsel %vm650_vm2, %v1712_v22, %v1800_v55 }
 0x469   : > { %v1765_v58 = vperm.slane %v1757_v43, %v2638_v26  ;;  %v1809_v40 = vperm.slane %v1801_v46, %v2638_v26  ;;  %v1824_v6 = vrot.slane %v1805_v61, 4 }
 0x46a   : > { %v1755_v47 = vsel %vm650_vm2, %v1754_v37, %v1684_v44 }
 0x46b   : > { %v1761_v54 = vperm.slane %v1755_v47, %v2638_v26  ;;  %v1778_v59 = vrot.slane %v1765_v58, 4  ;;  %v1781_v62 = vsel %vm650_vm2, %v1765_v58, %v1780_v49  ;;  %v1836_v53 = vrot.slane %v1809_v40, 4 }
 0x46c   : > { %v1789_v3 = vperm.slane %v1781_v62, %v2657_v39 }
 0x46d   : > { %v1766_v41 = vrot.slane %v1761_v54, 4  ;;  %v1769_v48 = vsel %vm650_vm2, %v1761_v54, %v1768_v7  ;;  %v1779_v63 = vsel %vm650_vm2, %v1778_v59, %v1753_v11  ;;  %v1686_v2 = vpop.f32.mrf.mxu3 }
 0x46e   : > { %v1777_v25 = vperm.slane %v1769_v48, %v2657_v39  ;;  %v1785_v0 = vperm.slane %v1779_v63, %v2657_v39  ;;  %v1812_v4 = vrot.slane %v1686_v2, 4  ;;  %v1796_v27 = vrot.slane %v1789_v3, 4 }
 0x46f   : > { %v1767_v1 = vsel %vm650_vm2, %v1766_v41, %v1749_v45  ;;  %v1738_v5 = vpop.f32.mrf.mxu1 }
 0x470   : > { %v1773_v56 = vperm.slane %v1767_v1, %v2657_v39  ;;  %v1792_v42 = vrot.slane %v1777_v25, 4  ;;  %v1794_v57 = vrot.slane %v1785_v0, 4  ;;  %v1810_v23 = vrot.slane %v1738_v5, 4 }
 0x471   : > { %v1813_v9 = vsel %vm650_vm2, %v1738_v5, %v1812_v4  ;;  %v1797_v12 = vsel %vm650_vm2, 0.0, %v1796_v27  ;;  %v1865_v8 = vsel %vm650_vm2, %v1796_v27, %v1785_v0 }
 0x472   : > { %v1790_v60 = vrot.slane %v1773_v56, 4  ;;  %v1793_v10 = vsel %vm650_vm2, 0.0, %v1792_v42  ;;  %v1795_v19 = vsel %vm650_vm2, 0.0, %v1794_v57  ;;  %v1854_v15 = vsel %vm650_vm2, %v1792_v42, %v1773_v56 }
 0x473   : > { %v1859_v16 = vrot.slane %v1793_v10, 4  ;;  %v1870_v18 = vrot.slane %v1797_v12, 4  ;;  %v1869_v20 = vperm.slane %v1865_v8, %v2638_v26  ;;  %v1811_v21 = vsel %vm650_vm2, %v1810_v23, %v1686_v2 }
 0x474   : > { %v1821_v28 = vperm.slane %v1813_v9, %v2638_v26  ;;  %v1791_v24 = vsel %vm650_vm2, 0.0, %v1790_v60  ;;  %v1817_v30 = vperm.slane %v1811_v21, %v2638_v26  ;;  %v1858_v50 = vperm.slane %v1854_v15, %v2638_v26 }
 0x475   : > { %v1871_v29 = vsel %vm650_vm2, %v1870_v18, %v1795_v19  ;;  %v1860_v31 = vsel %vm650_vm2, %v1859_v16, %v1791_v24  ;;  %v1890_v35 = vrot.slane %v1869_v20, 4 }
 0x476   : > { %v1875_v32 = vperm.slane %v1871_v29, %v2638_v26  ;;  %v1834_v17 = vrot.slane %v1821_v28, 4  ;;  %v1837_v36 = vsel %vm650_vm2, %v1821_v28, %v1836_v53  ;;  %v1822_v22 = vrot.slane %v1817_v30, 4 }
 0x477   : > { %v1825_v44 = vsel %vm650_vm2, %v1817_v30, %v1824_v6  ;;  %v1845_v11 = vperm.slane %v1837_v36, %v2657_v39  ;;  %v1864_v34 = vperm.slane %v1860_v31, %v2638_v26  ;;  %v1878_v51 = vrot.slane %v1858_v50, 4 }
 0x478   : > { %v1833_v45 = vperm.slane %v1825_v44, %v2657_v39  ;;  %v1835_v33 = vsel %vm650_vm2, %v1834_v17, %v1809_v40  ;;  %v1891_v52 = vsel %vm650_vm2, %v1875_v32, %v1890_v35  ;;  %v1823_v55 = vsel %vm650_vm2, %v1822_v22, %v1805_v61 }
 0x479   : > { %v1841_v37 = vperm.slane %v1835_v33, %v2657_v39  ;;  %v1852_v43 = vrot.slane %v1845_v11, 4  ;;  %v1829_v38 = vperm.slane %v1823_v55, %v2657_v39  ;;  %v1879_v49 = vsel %vm650_vm2, %v1864_v34, %v1878_v51  ;;  %v2382_v55 = vld [vmem:[%s3245_s6] sm:$0xff] }
 0x47a   : > { %v1848_v58 = vrot.slane %v1833_v45, 4  ;;  %v1899_v46 = vperm.slane %v1891_v52, %v2657_v39  ;;  %v1876_v59 = vrot.slane %v1864_v34, 4  ;;  %v1887_v25 = vperm.slane %v1879_v49, %v2657_v39  ;;  %v2383_v52 = vld [vmem:[%s3245_s6 + $0x8] sm:$0xff] }
 0x47b   : > { %v1850_v47 = vrot.slane %v1841_v37, 4  ;;  %v1853_v7 = vsel %vm650_vm2, 0.0, %v1852_v43  ;;  %v1919_v54 = vsel %vm650_vm2, %v1852_v43, %v1841_v37  ;;  %v1846_v62 = vrot.slane %v1829_v38, 4  ;;  %2023 = vmatpush.bf16.msra.mxu2 %v2383_v52  ;;  %v2427_v52 = vld [vmem:[%s3247_s8] ss:$0 sm:$0xff] }
 0x47c   : > { %v1849_v40 = vsel %vm650_vm2, 0.0, %v1848_v58  ;;  %v1908_v61 = vsel %vm650_vm2, %v1848_v58, %v1829_v38  ;;  %v1923_v41 = vperm.slane %v1919_v54, %v2638_v26  ;;  %v1924_v2 = vrot.slane %v1853_v7, 4 }
 0x47d   : > { %v1851_v48 = vsel %vm650_vm2, 0.0, %v1850_v47  ;;  %v1913_v63 = vrot.slane %v1849_v40, 4  ;;  %v1847_v0 = vsel %vm650_vm2, 0.0, %v1846_v62  ;;  %v1912_v4 = vperm.slane %v1908_v61, %v2638_v26 }
 0x47e   : > { %v1944_v3 = vrot.slane %v1923_v41, 4  ;;  %v1925_v1 = vsel %vm650_vm2, %v1924_v2, %v1851_v48  ;;  %v1877_v56 = vsel %vm650_vm2, %v1876_v59, %v1858_v50  ;;  %v1904_v6 = vrot.slane %v1899_v46, 4  ;;  %v2426_v2 = vld [vmem:[%s3246_s7] ss:$0 sm:$0xff] }
 0x47f   : > { %v1914_v5 = vsel %vm650_vm2, %v1913_v63, %v1847_v0  ;;  %v1929_v42 = vperm.slane %v1925_v1, %v2638_v26  ;;  %v1932_v27 = vrot.slane %v1912_v4, 4  ;;  %v1906_v53 = vrot.slane %v1887_v25, 4  ;;  %2024 = vmatpush.bf16.msra.mxu2 %v2382_v55 }
 0x480   : > { %v1918_v57 = vperm.slane %v1914_v5, %v2638_v26  ;;  %v1883_v23 = vperm.slane %v1877_v56, %v2657_v39  ;;  %v1888_v9 = vrot.slane %v1875_v32, 4  ;;  %v1905_v31 = vsel %vm650_vm2, %v1904_v6, %v1887_v25 }
 0x481   : > { %v1945_v10 = vsel %vm650_vm2, %v1929_v42, %v1944_v3  ;;  %v1942_v12 = vrot.slane %v1929_v42, 4  ;;  %v1907_v32 = vsel %vm650_vm2, %v1899_v46, %v1906_v53 }
 0x482   : > { %v1933_v60 = vsel %vm650_vm2, %v1918_v57, %v1932_v27  ;;  %v1930_v19 = vrot.slane %v1918_v57, 4  ;;  %v1953_v16 = vperm.slane %v1945_v10, %v2657_v39  ;;  %v1889_v8 = vsel %vm650_vm2, %v1888_v9, %v1869_v20 }
 0x483   : > { %v1941_v15 = vperm.slane %v1933_v60, %v2657_v39  ;;  %v1895_v26 = vperm.slane %v1889_v8, %v2657_v39  ;;  %v1902_v18 = vrot.slane %v1883_v23, 4  ;;  %v1943_v28 = vsel %vm650_vm2, %v1942_v12, %v1923_v41 }
 0x484   : > { %v1931_v21 = vsel %vm650_vm2, %v1930_v19, %v1912_v4  ;;  %v1958_v24 = vrot.slane %v1953_v16, 4  ;;  %v1949_v50 = vperm.slane %v1943_v28, %v2657_v39  ;;  %v2493_v57 = vmov 32.0  }
 0x485   : > { %v1960_v29 = vrot.slane %v1941_v15, 4  ;;  %v1937_v30 = vperm.slane %v1931_v21, %v2657_v39  ;;  %v1900_v35 = vrot.slane %v1895_v26, 4  ;;  %v1903_v45 = vsel %vm650_vm2, %v1895_v26, %v1902_v18 }
 0x486   : > { %v1959_v20 = vsel %vm650_vm2, %v1958_v24, %v1941_v15  ;;  %v1954_v36 = vrot.slane %v1949_v50, 4  ;;  %2465 = vrcp.f32 %v2493_v57 }
 0x487   : > { %v1961_v17 = vsel %vm650_vm2, %v1953_v16, %v1960_v29  ;;  %v1956_v22 = vrot.slane %v1937_v30, 4  ;;  %v2414_v44 = vpack.i.bf16 %v1959_v20, %v1905_v31  ;;  %v1901_v34 = vsel %vm650_vm2, %v1900_v35, %v1883_v23  ;;  %v2385_v29 = vld [vmem:[%s3249_s10 + $0x8] sm:$0xff] }
 0x488   : > { %v2419_v11 = vpack.i.bf16 %v1961_v17, %v1907_v32  ;;  %v1955_v39 = vsel %vm650_vm2, %v1954_v36, %v1937_v30  ;;  %2126 = vmatpush.bf16.msra.mxu3 %v2385_v29  ;;  %v2384_v30 = vld [vmem:[%s3249_s10] sm:$0xff] }
 0x489   : > { %v1957_v33 = vsel %vm650_vm2, %v1949_v50, %v1956_v22  ;;  %2415 = vrot.lane.b32.xlu0 %v2414_v44, %s2490_s19  ;;  %vm1990_vm2 = vcmask 195584  }
 0x48a   : > { %2420 = vrot.lane.b32.xlu2 %v2419_v11, %s2491_s20  ;;  %v2409_v51 = vpack.i.bf16 %v1957_v33, %v1903_v45 }
 0x48c   : > { %2410 = vrot.lane.b32.xlu1 %v2409_v51, %s2492_s23  ;;  %v2466_v27 = vpop.eup %2465  ;;  %2127 = vmatpush.bf16.msra.mxu3 %v2384_v30 }
 0x48d   : > { %v2042_v6 = vmul.f32 32.0, %v2466_v27 }
 0x48f   : > { %v2043_v53 = vsub.f32 1.0, %v2042_v6 }
 0x491   : > { %v2044_v23 = vmul.f32 %v2466_v27, %v2043_v53 }
 0x493   : > { %v2045_v9 = vadd.f32 %v2466_v27, %v2044_v23 }
 0x4e4   : > { %v2421_v43 = vpop.permute.xlu2 %2420 }
 0x4e5   : > { %v2423_v7 = vunpack.i.h.bf16 %v2421_v43  ;;  %v2422_v54 = vunpack.i.l.bf16 %v2421_v43 }
 0x4fb   : > { %v2416_v37 = vpop.permute.xlu0 %2415 }
 0x4fc   : > { %v2418_v46 = vunpack.i.h.bf16 %v2416_v37  ;;  %v2417_v47 = vunpack.i.l.bf16 %v2416_v37 }
 0x4fe   : > { %v2411_v38 = vpop.permute.xlu1 %2410 }
 0x4ff   : > { %v2413_v58 = vunpack.i.h.bf16 %v2411_v38  ;;  %v2412_v49 = vunpack.i.l.bf16 %v2411_v38  ;;  %v2428_v38 = vld [vmem:[%s3248_s9] ss:$0 sm:$0xff] }
 0x501   : > { %v1986_v59 = vsel %vm1338_vm3, %v1901_v34, %v2412_v49  ;;  %v1987_v62 = vsel %vm1338_vm3, %v1955_v39, %v2413_v58 }
 0x502   : > { %v1988_v40 = vsel %vm538_vm0, %v1986_v59, %v2417_v47  ;;  %v1989_v61 = vsel %vm538_vm0, %v1987_v62, %v2418_v46  ;;  %vm2046_vm0 = vweird.f32 %v2466_v27  ;;  %v2389_v59 = vld [vmem:[%s3251_s12 + $0x18] sm:$0xff]  ;;  %v2388_v62 = vld [vmem:[%s3251_s12 + $0x10] sm:$0xff] }
 0x503   : > { %v1991_v41 = vsel %vm1990_vm2, %v1988_v40, %v2422_v54  ;;  %v1992_v48 = vsel %vm1990_vm2, %v1989_v61, %v2423_v7  ;;  %v3179_v60 = vsel %vm2046_vm0, %v2466_v27, %v2045_v9  ;;  %2181 = vmatpush.bf16.msrb.mxu0 %v2389_v59  ;;  %v2387_v40 = vld [vmem:[%s3251_s12 + $0x8] sm:$0xff]  ;;  %v2386_v61 = vld [vmem:[%s3251_s12] sm:$0xff] }
 0x504   : > { %v1993_v63 = vpack.c.bf16 %v1992_v48, %v1991_v41  ;;  %v2429_v48 = vld [vmem:[%s3250_s11] ss:$0 sm:$0xff] }
 0x506   : > { %2348 = vmatmul.msk.bf16.vlgmr.msra.gmra.mxu2 %vm581_vm1, %v1993_v63 }
 0x507   : > { %2182 = vmatpush.bf16.msrb.mxu0 %v2388_v62 }
 0x50b   : > { %2183 = vmatpush.bf16.msrb.mxu0 %v2387_v40 }
 0x50f   : > { %2184 = vmatpush.bf16.msrb.mxu0 %v2386_v61 }
 0x589   : > { %v2026_v25 = vpop.f32.mrf.mxu2 }
 0x58a   : > { %v2027_v0 = vadd.f32 %v2426_v2, %v2026_v25 }
 0x58c   : > { %v2033_v3 = vadd.f32 %v2027_v0, %v2612_v13 }
 0x58e   : > { %v2035_v4 = vsel %vm581_vm1, %v2033_v3, 0.0 }
 0x58f   : > { %2036 = vadd.xlane.f32.xlu0 %v2035_v4 }
 0x591   : > { %v2028_v1 = vpop.f32.mrf.mxu2 }
 0x592   : > { %v2029_v5 = vadd.f32 %v2426_v2, %v2028_v1  ;;  %v2430_v1 = vld [vmem:[%s3252_s13] ss:$0 sm:$0xff] }
 0x594   : > { %v2034_v56 = vadd.f32 %v2029_v5, %v2614_v14 }
 0x596   : > { %v2038_v42 = vsel %vm581_vm1, %v2034_v56, 0.0 }
 0x597   : > { %2039 = vadd.xlane.f32.xlu1 %v2038_v42 }
 0x602   : > { %v2037_v13 = vpop.xlane.xlu0 %2036 }
 0x603   : > { %v2048_v10 = vmul.f32 %v3179_v60, %v2037_v13 }
 0x605   : > { %v2050_v19 = vsub.f32 %v2033_v3, %v2048_v10 }
 0x607   : > { %v2052_v12 = vmul.f32 %v2050_v19, %v2050_v19 }
 0x609   : > { %v2054_v14 = vsel %vm581_vm1, %v2052_v12, 0.0 }
 0x60a   : > { %v2040_v15 = vpop.xlane.xlu1 %2039  ;;  %2055 = vadd.xlane.f32.xlu2 %v2054_v14 }
 0x60b   : > { %v2049_v16 = vmul.f32 %v3179_v60, %v2040_v15 }
 0x60d   : > { %v2051_v8 = vsub.f32 %v2034_v56, %v2049_v16 }
 0x60f   : > { %v2053_v26 = vmul.f32 %v2051_v8, %v2051_v8 }
 0x611   : > { %v2057_v18 = vsel %vm581_vm1, %v2053_v26, 0.0 }
 0x612   : > { %2058 = vadd.xlane.f32.xlu0 %v2057_v18 }
 0x67d   : > { %v2056_v21 = vpop.xlane.xlu2 %2055 }
 0x67e   : > { %v2060_v28 = vmul.f32 %v2056_v21, %v3179_v60 }
 0x680   : > { %v2062_v24 = vadd.f32 1e-05, %v2060_v28 }
 0x682   : > { %2467 = vrsqrt.f32 %v2062_v24  ;;  %vm2070_vm12 = vweird.f32 %v2062_v24 }
 0x685   : > { %v2059_v50 = vpop.xlane.xlu0 %2058 }
 0x686   : > { %v2061_v31 = vmul.f32 %v2059_v50, %v3179_v60 }
 0x688   : > { %v2468_v32 = vpop.eup %2467  ;;  %v2063_v35 = vadd.f32 1e-05, %v2061_v31 }
 0x689   : > { %v2065_v20 = vmul.f32 %v2468_v32, %v2062_v24  ;;  %vm2071_vm3 = vweird.f32 %v2468_v32 }
 0x68a   : > { %2469 = vrsqrt.f32 %v2063_v35  ;;  %vm2072_vm13 = vmor %vm2070_vm12, %vm2071_vm3  ;;  %vm2080_vm15 = vweird.f32 %v2063_v35 }
 0x68b   : > { %v2066_v17 = vmul.f32 %v2468_v32, %v2065_v20 }
 0x68d   : > { %v2067_v36 = vmul.f32 0.5, %v2066_v17 }
 0x68f   : > { %v2068_v22 = vsub.f32 1.5, %v2067_v36 }
 0x690   : > { %v2470_v44 = vpop.eup %2469 }
 0x691   : > { %v2069_v11 = vmul.f32 %v2468_v32, %v2068_v22  ;;  %v2075_v34 = vmul.f32 %v2470_v44, %v2063_v35  ;;  %vm2081_vm14 = vweird.f32 %v2470_v44 }
 0x692   : > { %vm2082_vm4 = vmor %vm2080_vm15, %vm2081_vm14 }
 0x693   : > { %v2076_v45 = vmul.f32 %v2470_v44, %v2075_v34  ;;  %v2073_v33 = vsel %vm2072_vm13, %v2468_v32, %v2069_v11  ;;  %v2432_v34 = vld [vmem:[%s3254_s15] ss:$0 sm:$0xff] }
 0x694   : > { %v2084_v55 = vmul.f32 %v2073_v33, %v2050_v19 }
 0x695   : > { %v2077_v39 = vmul.f32 0.5, %v2076_v45 }
 0x696   : > { %v2089_v58 = vmul.f32 %v2427_v52, %v2084_v55 }
 0x697   : > { %v2078_v51 = vsub.f32 1.5, %v2077_v39 }
 0x698   : > { %v2094_v47 = vadd.f32 %v2428_v38, %v2089_v58 }
 0x699   : > { %v2079_v37 = vmul.f32 %v2470_v44, %v2078_v51 }
 0x69b   : > { %v2083_v43 = vsel %vm2082_vm4, %v2470_v44, %v2079_v37  ;;  %v2431_v44 = vld [vmem:[%s3253_s14] ss:$0 sm:$0xff] }
 0x69c   : > { %v2085_v49 = vmul.f32 %v2083_v43, %v2051_v8 }
 0x69e   : > { %v2090_v46 = vmul.f32 %v2427_v52, %v2085_v49 }
 0x6a0   : > { %v2095_v7 = vadd.f32 %v2428_v38, %v2090_v46 }
 0x6a2   : > { %v2096_v54 = vpack.c.bf16 %v2095_v7, %v2094_v47 }
 0x6a4   : > { %2357 = vmatmul.msk.bf16.vlgmr.msra.gmra.mxu3 %vm581_vm1, %v2096_v54 }
 0x727   : > { %v2129_v41 = vpop.f32.mrf.mxu3 }
 0x728   : > { %v2130_v63 = vadd.f32 %v2429_v48, %v2129_v41 }
 0x72a   : > { %v2134_v0 = vmax.f32 %v2130_v63, 0.0 }
 0x72f   : > { %v2131_v2 = vpop.f32.mrf.mxu3 }
 0x730   : > { %v2132_v25 = vadd.f32 %v2429_v48, %v2131_v2 }
 0x732   : > { %v2135_v3 = vmax.f32 %v2132_v25, 0.0 }
 0x734   : > { %v2136_v4 = vpack.c.bf16 %v2135_v3, %v2134_v0 }
 0x736   : > { %2374 = vmatmul.msk.bf16.vlgmr.msrb.gmra.mxu0 %vm2173_vm5, %v2136_v4 }
 0x7b3   : > { %v2186_v5 = vpop.f32.mrf.mxu0 }
 0x7b4   : > { %v2187_v56 = vadd.f32 %v2430_v1, %v2186_v5 }
 0x7b6   : > { %v2193_v42 = vadd.f32 %v2187_v56, %v2094_v47 }
 0x7b8   : > { %v2195_v57 = vsel %vm581_vm1, %v2193_v42, 0.0 }
 0x7b9   : > { %2196 = vadd.xlane.f32.xlu1 %v2195_v57 }
 0x7bb   : > { %v2188_v27 = vpop.f32.mrf.mxu0 }
 0x7bc   : > { %v2189_v6 = vadd.f32 %v2430_v1, %v2188_v27 }
 0x7be   : > { %v2194_v53 = vadd.f32 %v2189_v6, %v2095_v7 }
 0x7c0   : > { %v2198_v23 = vsel %vm581_vm1, %v2194_v53, 0.0 }
 0x7c1   : > { %2199 = vadd.xlane.f32.xlu2 %v2198_v23 }
 0x82c   : > { %v2197_v9 = vpop.xlane.xlu1 %2196 }
 0x82d   : > { %v2201_v13 = vmul.f32 %v2197_v9, %v3179_v60 }
 0x82f   : > { %v2203_v10 = vsub.f32 %v2193_v42, %v2201_v13 }
 0x831   : > { %v2205_v19 = vmul.f32 %v2203_v10, %v2203_v10 }
 0x833   : > { %v2207_v12 = vsel %vm581_vm1, %v2205_v19, 0.0 }
 0x834   : > { %v2200_v14 = vpop.xlane.xlu2 %2199  ;;  %2208 = vadd.xlane.f32.xlu0 %v2207_v12 }
 0x835   : > { %v2202_v15 = vmul.f32 %v2200_v14, %v3179_v60 }
 0x837   : > { %v2204_v16 = vsub.f32 %v2194_v53, %v2202_v15 }
 0x839   : > { %v2206_v8 = vmul.f32 %v2204_v16, %v2204_v16 }
 0x83b   : > { %v2210_v26 = vsel %vm581_vm1, %v2206_v8, 0.0 }
 0x83c   : > { %2211 = vadd.xlane.f32.xlu1 %v2210_v26 }
 0x8a7   : > { %v2209_v18 = vpop.xlane.xlu0 %2208 }
 0x8a8   : > { %v2213_v21 = vmul.f32 %v2209_v18, %v3179_v60 }
 0x8aa   : > { %v2215_v28 = vadd.f32 1e-05, %v2213_v21 }
 0x8ac   : > { %2471 = vrsqrt.f32 %v2215_v28  ;;  %vm2223_vm1 = vweird.f32 %v2215_v28 }
 0x8af   : > { %v2212_v24 = vpop.xlane.xlu1 %2211 }
 0x8b0   : > { %v2214_v29 = vmul.f32 %v2212_v24, %v3179_v60 }
 0x8b2   : > { %v2472_v30 = vpop.eup %2471  ;;  %v2216_v50 = vadd.f32 1e-05, %v2214_v29 }
 0x8b3   : > { %v2218_v31 = vmul.f32 %v2472_v30, %v2215_v28  ;;  %vm2224_vm6 = vweird.f32 %v2472_v30 }
 0x8b4   : > { %2473 = vrsqrt.f32 %v2216_v50  ;;  %vm2225_vm7 = vmor %vm2223_vm1, %vm2224_vm6  ;;  %vm2233_vm10 = vweird.f32 %v2216_v50 }
 0x8b5   : > { %v2219_v32 = vmul.f32 %v2472_v30, %v2218_v31 }
 0x8b7   : > { %v2220_v35 = vmul.f32 0.5, %v2219_v32 }
 0x8b9   : > { %v2221_v20 = vsub.f32 1.5, %v2220_v35 }
 0x8ba   : > { %v2474_v17 = vpop.eup %2473 }
 0x8bb   : > { %v2222_v36 = vmul.f32 %v2472_v30, %v2221_v20  ;;  %v2228_v22 = vmul.f32 %v2474_v17, %v2216_v50  ;;  %vm2234_vm8 = vweird.f32 %v2474_v17 }
 0x8bc   : > { %vm2235_vm11 = vmor %vm2233_vm10, %vm2234_vm8 }
 0x8bd   : > { %v2226_v11 = vsel %vm2225_vm7, %v2472_v30, %v2222_v36  ;;  %v2229_v60 = vmul.f32 %v2474_v17, %v2228_v22 }
 0x8be   : > { %v2237_v45 = vmul.f32 %v2226_v11, %v2203_v10 }
 0x8bf   : > { %v2230_v33 = vmul.f32 0.5, %v2229_v60 }
 0x8c0   : > { %v2242_v39 = vmul.f32 %v2431_v44, %v2237_v45 }
 0x8c1   : > { %v2231_v51 = vsub.f32 1.5, %v2230_v33 }
 0x8c2   : > { %v2247_v52 = vadd.f32 %v2432_v34, %v2242_v39 }
 0x8c3   : > { %v2232_v55 = vmul.f32 %v2474_v17, %v2231_v51 }
 0x8c4   : > { %v2249_v37 = vpack.c.bf16 %v2247_v52, %v2247_v52 }
 0x8c5   : > { %v2236_v43 = vsel %vm2235_vm11, %v2474_v17, %v2232_v55 }
 0x8c6   : > { %2252 = vst.msk [vmem:[%s521_s0] sm:$0xf] %vm2251_vm9, %v2249_v37  ;;  %v2238_v38 = vmul.f32 %v2236_v43, %v2204_v16 }
 0x8c8   : > { %v2243_v58 = vmul.f32 %v2431_v44, %v2238_v38 }
 0x8ca   : > { %v2248_v49 = vadd.f32 %v2432_v34, %v2243_v58 }
 0x8cc   : > { %v2250_v46 = vpack.c.bf16 %v2248_v49, %v2248_v49 }
 0x8ce   : > { %2253 = vst.msk [vmem:[%s521_s0 + $0x4] sm:$0xf] %vm2251_vm9, %v2250_v46 }
 0x8cf PF: > { %s26_s21 = sadd.s32 1, %s2481_s21  }
 0x8d0   : > { %p23_p4 = scmp.ge.s32.totalorder %s26_s21, 4  }
 0x8d2   :  { %25 = sbr.rel (!%p23_p4) target bundleno = 2 (0x2), region = 114 }

// kernel: _forward.4
= control target key start
LH: loop header
LB: loop body
LE: loop exit
PB: predicated region body
PF: predicated region fallthrough
CT: control target
= control target key end

     0   :  { %s4239_s0 = inlined_call_operand.vmem [shape: f32[2,8,32], index: 0, kind: input, shape index: {}]   ;;  %s4240_s1 = inlined_call_operand.vmem [shape: bf16[2,16,32], index: 1, kind: input, shape index: {}]   ;;  %s4241_s2 = inlined_call_operand.vmem [shape: f32[2,1,8], index: 2, kind: input, shape index: {}]   ;;  %s4242_s3 = inlined_call_operand.vmem [shape: bf16[32,96], index: 3, kind: input, shape index: {}]   ;;  %s4243_s4 = inlined_call_operand.vmem [shape: f32[1,96], index: 4, kind: input, shape index: {}]   ;;  %s4244_s5 = inlined_call_operand.vmem [shape: bf16[32,32], index: 5, kind: input, shape index: {}]   ;;  %s4245_s6 = inlined_call_operand.vmem [shape: f32[1,32], index: 6, kind: input, shape index: {}]   ;;  %s4246_s7 = inlined_call_operand.vmem [shape: f32[1,32], index: 7, kind: input, shape index: {}]   ;;  %s4247_s8 = inlined_call_operand.vmem [shape: f32[1,32], index: 8, kind: input, shape index: {}]   ;;  %s4248_s9 = inlined_call_operand.vmem [shape: bf16[32,32], index: 9, kind: input, shape index: {}]   ;;  %s4249_s10 = inlined_call_operand.vmem [shape: f32[1,32], index: 10, kind: input, shape index: {}]   ;;  %s4250_s11 = inlined_call_operand.vmem [shape: bf16[32,64], index: 11, kind: input, shape index: {}]   ;;  %s4251_s12 = inlined_call_operand.vmem [shape: f32[1,64], index: 12, kind: input, shape index: {}]   ;;  %s4252_s13 = inlined_call_operand.vmem [shape: bf16[32,32], index: 13, kind: input, shape index: {}]   ;;  %s4253_s14 = inlined_call_operand.vmem [shape: f32[1,32], index: 14, kind: input, shape index: {}]   ;;  %s4254_s15 = inlined_call_operand.vmem [shape: f32[1,32], index: 15, kind: input, shape index: {}]   ;;  %s4255_s16 = inlined_call_operand.vmem [shape: f32[1,32], index: 16, kind: input, shape index: {}]   ;;  %s4256_s17 = inlined_call_operand.vmem [shape: bf16[32,64], index: 17, kind: input, shape index: {}]   ;;  %s4257_s18 = inlined_call_operand.vmem [shape: f32[1,64], index: 18, kind: input, shape index: {}]   ;;  %s4258_s19 = inlined_call_operand.vmem [shape: bf16[64,32], index: 19, kind: input, shape index: {}]   ;;  %s4259_s20 = inlined_call_operand.vmem [shape: f32[1,32], index: 20, kind: input, shape index: {}]   ;;  %s4260_s21 = inlined_call_operand.vmem [shape: f32[1,32], index: 21, kind: input, shape index: {}]   ;;  %s4261_s22 = inlined_call_operand.vmem [shape: f32[1,32], index: 22, kind: input, shape index: {}]   ;;  %s4262_s23 = inlined_call_operand.vmem [shape: bf16[2,8,32], index: 23, kind: output, shape index: {0}]   ;;  %s4263_s24 = inlined_call_operand.hbm [shape: f32[2,4,8,16], index: 24, kind: output, shape index: {1}]  }
   0x1   :  { %4286 = sst [smem:[#allocation11_spill]] %s4239_s0 }
   0x2   :  { %4287 = sst [smem:[#allocation12_spill]] %s4240_s1 }
   0x3   :  { %4288 = sst [smem:[#allocation13_spill]] %s4241_s2 }
   0x4   :  { %4289 = sst [smem:[#allocation14_spill]] %s4242_s3 }
   0x5   :  { %4290 = sst [smem:[#allocation15_spill]] %s4243_s4 }
   0x6   :  { %4291 = sst [smem:[#allocation16_spill]] %s4244_s5 }
   0x7   :  { %4292 = sst [smem:[#allocation17_spill]] %s4245_s6 }
   0x8   :  { %4293 = sst [smem:[#allocation18_spill]] %s4246_s7 }
   0x9   :  { %4294 = sst [smem:[#allocation19_spill]] %s4247_s8 }
   0xa   :  { %4295 = sst [smem:[#allocation20_spill]] %s4248_s9 }
   0xb   :  { %4296 = sst [smem:[#allocation21_spill]] %s4249_s10 }
   0xc   :  { %4297 = sst [smem:[#allocation22_spill]] %s4250_s11 }
   0xd   :  { %4298 = sst [smem:[#allocation23_spill]] %s4262_s23 }
   0xe   :  { %30 = vsyncpa [#allocation3], 0 }
   0xf   :  { %32 = vsyncpa [#allocation3 + $0x1], 0  ;;  %s3508_s5 = smov 0   ;;  %s3510_s26 = smov 0  }
  0x10   :  { %s3512_s27 = smov 0   ;;  %s3514_s28 = smov 0  }
  0x11 LB: > { %4299 = sst [smem:[#allocation5_spill]] %s3356_s5  ;;  %s3529_s6 = sadd.s32 4294967295, %s3368_s28   ;;  %s3368_s28 = sphi %s3514_s28, %s4330_s28   ;;  %s3364_s27 = sphi %s3512_s27, %s4332_s27   ;;  %s3360_s26 = sphi %s3510_s26, %s4334_s26   ;;  %s3356_s5 = sphi %s3508_s5, %s4333_s5  }
  0x12   : > { %4300 = sst [smem:[#allocation6_spill]] %s3364_s27  ;;  %s3077_s2 = sadd.s32 4294967294, %s3368_s28  }
  0x13   : > { %4301 = sst [smem:[#allocation7_spill]] %s3368_s28  ;;  %s3533_s29 = sadd.s32 1, %s3368_s28  }
  0x14   : > { %4302 = sst [smem:[#allocation8_spill]] %s3533_s29  ;;  %s569_s0 = sadd.s32 1, %s3364_s27 }
  0x15   : > { %s566_s7 = ssub.s32 %s3368_s28, %s3533_s29  ;;  %p579_p0 = scmp.ne.s32.totalorder %s3364_s27, %s3360_s26 }
  0x16   : > { %p567_p1 = scmp.eq.s32.totalorder %s566_s7, 0  ;;  %p580_p2 = scmp.eq.s32.totalorder %s3529_s6, 1 }
  0x17   : > { %p585_p3 = scmp.ne.s32.totalorder %s3360_s26, %s3356_s5  ;;  %p586_p4 = scmp.eq.s32.totalorder %s3077_s2, 1 }
  0x18   : > { %s3544_s30 = scalar_select %p567_p1, %s3364_s27, %s569_s0  }
  0x19   : > { %p3546_p5 = por %p580_p2, %p579_p0  ;;  %p3550_p6 = por %p586_p4, %p585_p3 }
  0x1a   : > { %4303 = sst [smem:[#allocation9_spill]] %s3544_s30  ;;  %p3080_p7 = scmp.ge.s32.totalorder %s3368_s28, 1 }
  0x1b   : > { %s4305_s25 = scalar_select %p3550_p6, 1, 0 }
  0x1c   : > { %p685_p8 = scmp.lt.s32.totalorder %s3368_s28, 3 }
  0x1d   : > { %4306 = sst [smem:[#allocation10_spill]] %s4305_s25 }
  0x1e   : > { %p686_p9 = pnand %p3080_p7, %p685_p8 }
  0x1f   : > { %s4307_s1 = sld [smem:[#allocation14_spill]] (!%p686_p9)  ;;  %p762_p10 = scmp.lt.s32.totalorder (!%p686_p9), %s3529_s6, 1 }
  0x20   : > { %689 = sbr.rel (%p686_p9) target bundleno = 3418 (0xd5a), region = 112  ;;  %s4308_s25 = sld [smem:[#allocation11_spill]] (!%p686_p9) }
  0x21   : > { %s4309_s2 = sld [smem:[#allocation15_spill]] (!%p686_p9)  ;;  %s4276_s0 = smov (!%p686_p9), 104  }
  0x22   : > { %s4281_s27 = smov (!%p686_p9), 120   ;;  %s4273_s29 = smov (!%p686_p9), 112  }
  0x23   : > { %s4278_s8 = smov (!%p686_p9), 8   ;;  %s4312_s11 = sld [smem:[#allocation22_spill]] (!%p686_p9) }
  0x24   : > { %s4314_s23 = sld [smem:[#allocation17_spill]] (!%p686_p9)  ;;  %s4316_s28 = smov (!%p686_p9), 104  }
  0x25   : > { %v3185_v0 = vld [vmem:[%s4307_s1 + $0x8] sm:$0xff]  ;;  %v3184_v1 = vld [vmem:[%s4307_s1] sm:$0xff]  ;;  %s3564_s7 = scalar_select %p762_p10, %s3529_s6, 1  ;;  %vm816_vm0 = vcmask 261120   ;;  %v3375_v13 = vmov 1983009808  }
  0x26   : > { %826 = vmatpush.bf16.msra.mxu0 %v3185_v0  ;;  %v855_v14 = vunpack.c.l.s4 %v3375_v13  ;;  %v3376_v25 = vmov 1934713408   ;;  %vm864_vm1 = vcmask 1047556   ;;  %vm1200_vm2 = vcmask 64512   ;;  %s4319_s9 = sld [smem:[#allocation20_spill]] }
  0x27   : > { %s3082_s30 = sshll.u32 %s3564_s7, 3  ;;  %v3253_v4 = vld [vmem:[%s4309_s2] ss:$0 sm:$0xff]  ;;  %v869_v26 = vunpack.c.l.s4 %v3376_v25  ;;  %s4310_s2 = sld [smem:[#allocation13_spill]]  ;;  %vm1384_vm7 = vcmask 1043456  }
  0x28   : > { %s765_s5 = scalar_lea.vmem %s4308_s25, %s3082_s30  ;;  %s3374_s25 = smov 64   ;;  %v3600_v19 = vunpack.c.0.s8 %v855_v14 }
  0x29   : > { %v3572_v2 = vld [vmem:[%s765_s5] sm:$0xff]  ;;  %s4271_s5 = smov 96   ;;  %v3609_v31 = vunpack.c.0.s8 %v869_v26  ;;  %s4322_s10 = sld [smem:[#allocation21_spill]] }
  0x2a   : > { %827 = vmatpush.bf16.msra.mxu0 %v3184_v1  ;;  %v795_v3 = vpack.c.bf16 %v3572_v2, %v3572_v2 }
  0x2d   : > { %3094 = vmatmul.msk.bf16.vlgmr.msra.gmra.mxu0 %vm816_vm0, %v795_v3 }
  0xaa   : > { %v829_v5 = vpop.f32.mrf.mxu0 }
  0xab   : > { %v830_v6 = vadd.f32 %v3253_v4, %v829_v5 }
  0xad   : > { %v833_v7 = vpack.c.bf16 %v830_v6, %v830_v6 }
  0xaf   : > { %839 = vrot.lane.b32.xlu1 %v833_v7, %s4276_s0  ;;  %835 = vrot.lane.b32.xlu0 %v833_v7, %s4281_s27  ;;  %v844_v15 = vshrl.u32 %v833_v7, 16  ;;  %s4317_s27 = smov 112   ;;  %s4324_s0 = smov 16  }
  0xb2   : > { %v831_v8 = vpop.f32.mrf.mxu0 }
  0xb7   : > { %956 = vrot.lane.b32.xlu1 %v833_v7, %s4271_s5  ;;  %837 = vrot.lane.b32.xlu0 %v833_v7, %s4273_s29  ;;  %s4311_s29 = sld [smem:[#allocation16_spill]] }
  0xbf   : > { %1078 = vrot.lane.b32.xlu1 %v833_v7, %s3374_s25 }
 0x121   : > { %v3585_v9 = vpop.permute.xlu1 %839  ;;  %v3587_v10 = vpop.permute.xlu0 %835 }
 0x122   : > { %962 = vrot.lane.b32.xlu0 %v3585_v9, %s4271_s5  ;;  %958 = vrot.lane.b32.xlu2 %v3587_v10, %s4271_s5  ;;  %v845_v12 = vshrl.u32 %v3587_v10, 16  ;;  %v851_v17 = vshrl.u32 %v3585_v9, 16  ;;  %v843_v20 = vpack.i.b16 %v3587_v10, %v833_v7 }
 0x124   : > { %v846_v18 = vpack.i.b16 %v845_v12, %v844_v15  ;;  %v857_v24 = vperm.slane %v843_v20, %v3600_v19 }
 0x126   : > { %v884_v23 = vperm.slane %v846_v18, %v3600_v19  ;;  %v866_v30 = vrot.slane %v857_v24, 4 }
 0x128   : > { %v892_v29 = vrot.slane %v884_v23, 4 }
 0x129   : > { %v3593_v11 = vpop.permute.xlu0 %837  ;;  %v957_v38 = vpop.permute.xlu1 %956 }
 0x12a   : > { %960 = vrot.lane.b32.xlu2 %v3593_v11, %s4271_s5  ;;  %v850_v16 = vshrl.u32 %v3593_v11, 16  ;;  %v849_v22 = vpack.i.b16 %v3585_v9, %v3593_v11  ;;  %v967_v43 = vshrl.u32 %v957_v38, 16  ;;  %s773_s5 = scalar_lea.vmem %s4310_s2, %s3564_s7 }
 0x12c   : > { %v852_v21 = vpack.i.b16 %v851_v17, %v850_v16  ;;  %v862_v28 = vperm.slane %v849_v22, %v3600_v19 }
 0x12e   : > { %v889_v27 = vperm.slane %v852_v21, %v3600_v19  ;;  %v863_v35 = vrot.slane %v862_v28, 4  ;;  %v867_v36 = vsel %vm864_vm1, %v862_v28, %v866_v30 }
 0x12f   : > { %v875_v39 = vperm.slane %v867_v36, %v3609_v31 }
 0x130   : > { %v890_v32 = vrot.slane %v889_v27, 4  ;;  %v893_v33 = vsel %vm864_vm1, %v889_v27, %v892_v29  ;;  %v865_v41 = vsel %vm864_vm1, %v863_v35, %v857_v24 }
 0x131   : > { %v901_v37 = vperm.slane %v893_v33, %v3609_v31  ;;  %v871_v47 = vperm.slane %v865_v41, %v3609_v31  ;;  %v878_v48 = vrot.slane %v875_v39, 4 }
 0x132   : > { %v891_v40 = vsel %vm864_vm1, %v890_v32, %v884_v23 }
 0x133   : > { %v897_v44 = vperm.slane %v891_v40, %v3609_v31  ;;  %v904_v45 = vrot.slane %v901_v37, 4  ;;  %v876_v54 = vrot.slane %v871_v47, 4  ;;  %v879_v55 = vsel %vm864_vm1, 0, %v878_v48 }
 0x134   : > { %v911_v3 = vrot.slane %v879_v55, 4  ;;  %v906_v40 = vsel %vm864_vm1, %v878_v48, %v871_v47 }
 0x135   : > { %v902_v51 = vrot.slane %v897_v44, 4  ;;  %v905_v52 = vsel %vm864_vm1, 0, %v904_v45  ;;  %v877_v4 = vsel %vm864_vm1, 0, %v876_v54  ;;  %v925_v37 = vsel %vm864_vm1, %v904_v45, %v897_v44 }
 0x136   : > { %v930_v61 = vrot.slane %v905_v52, 4  ;;  %v912_v21 = vsel %vm864_vm1, %v911_v3, %v877_v4  ;;  %v929_v52 = vperm.slane %v925_v37, %v3600_v19  ;;  %v910_v44 = vperm.slane %v906_v40, %v3600_v19 }
 0x137   : > { %v903_v1 = vsel %vm864_vm1, 0, %v902_v51  ;;  %v916_v29 = vperm.slane %v912_v21, %v3600_v19 }
 0x138   : > { %v931_v13 = vsel %vm864_vm1, %v930_v61, %v903_v1 }
 0x139   : > { %v935_v23 = vperm.slane %v931_v13, %v3600_v19 }
 0x13b   : > { %v936_v41 = vrot.slane %v935_v23, 4 }
 0x13d   : > { %v937_v48 = vsel %vm864_vm1, %v936_v41, %v929_v52 }
 0x17c   : > { %v959_v34 = vpop.permute.xlu2 %958 }
 0x17d   : > { %v968_v42 = vshrl.u32 %v959_v34, 16  ;;  %v966_v46 = vpack.i.b16 %v959_v34, %v957_v38 }
 0x17f   : > { %v969_v49 = vpack.i.b16 %v968_v42, %v967_v43  ;;  %v980_v53 = vperm.slane %v966_v46, %v3600_v19  ;;  %v917_v46 = vrot.slane %v916_v29, 4  ;;  %v787_v29 = vld [vmem:[%s773_s5] sm:$0x1]  ;;  %s4275_s5 = smov 24  }
 0x180   : > { %vm788_vm3 = vcmp.gt.f32.partialorder %v787_v29, 0.5 }
 0x181   : > { %v1006_v57 = vperm.slane %v969_v49, %v3600_v19  ;;  %v988_v62 = vrot.slane %v980_v53, 4  ;;  %v918_v55 = vsel %vm864_vm1, %v917_v46, %v910_v44 }
 0x182   : > { %v922_v61 = vperm.slane %v918_v55, %v3609_v31 }
 0x183   : > { %v1014_v5 = vrot.slane %v1006_v57, 4 }
 0x184   : > { %v961_v50 = vpop.permute.xlu2 %960 }
 0x185   : > { %v973_v58 = vshrl.u32 %v961_v50, 16 }
 0x194   : > { %v963_v56 = vpop.permute.xlu0 %962 }
 0x195   : > { %v972_v59 = vpack.i.b16 %v963_v56, %v961_v50  ;;  %v974_v60 = vshrl.u32 %v963_v56, 16 }
 0x197   : > { %v975_v63 = vpack.i.b16 %v974_v60, %v973_v58  ;;  %v985_v0 = vperm.slane %v972_v59, %v3600_v19  ;;  %v941_v59 = vperm.slane %v937_v48, %v3609_v31 }
 0x199   : > { %v986_v6 = vrot.slane %v985_v0, 4  ;;  %v989_v7 = vsel %vm864_vm1, %v985_v0, %v988_v62  ;;  %v1011_v8 = vperm.slane %v975_v63, %v3600_v19  ;;  %v946_v21 = vpack.i.b16 %v941_v59, %v922_v61 }
 0x19a   : > { %v997_v12 = vperm.slane %v989_v7, %v3609_v31 }
 0x19b   : > { %v987_v14 = vsel %vm864_vm1, %v986_v6, %v980_v53  ;;  %v1012_v15 = vrot.slane %v1011_v8, 4  ;;  %v1015_v16 = vsel %vm864_vm1, %v1011_v8, %v1014_v5  ;;  %v942_v6 = vrot.slane %v941_v59, 4 }
 0x19c   : > { %v993_v17 = vperm.slane %v987_v14, %v3609_v31  ;;  %v1000_v18 = vrot.slane %v997_v12, 4  ;;  %v1023_v20 = vperm.slane %v1015_v16, %v3609_v31  ;;  %v923_v14 = vrot.slane %v922_v61, 4 }
 0x19d   : > { %v1013_v22 = vsel %vm864_vm1, %v1012_v15, %v1006_v57 }
 0x19e   : > { %v998_v24 = vrot.slane %v993_v17, 4  ;;  %v1001_v25 = vsel %vm864_vm1, 0, %v1000_v18  ;;  %v1019_v26 = vperm.slane %v1013_v22, %v3609_v31  ;;  %v1026_v27 = vrot.slane %v1023_v20, 4 }
 0x19f   : > { %v1033_v28 = vrot.slane %v1001_v25, 4  ;;  %v1028_v35 = vsel %vm864_vm1, %v1000_v18, %v993_v17  ;;  %v948_v17 = vshrl.u32 %v941_v59, 16  ;;  %v943_v18 = vsel %vm864_vm1, 0, %v942_v6 }
 0x1a0   : > { %v999_v30 = vsel %vm864_vm1, 0, %v998_v24  ;;  %v1024_v32 = vrot.slane %v1019_v26, 4  ;;  %v1027_v33 = vsel %vm864_vm1, 0, %v1026_v27  ;;  %v1047_v42 = vsel %vm864_vm1, %v1026_v27, %v1019_v26 }
 0x1a1   : > { %v1052_v34 = vrot.slane %v1027_v33, 4  ;;  %v1034_v36 = vsel %vm864_vm1, %v1033_v28, %v999_v30  ;;  %v1032_v49 = vperm.slane %v1028_v35, %v3600_v19  ;;  %v1051_v53 = vperm.slane %v1047_v42, %v3600_v19 }
 0x1a2   : > { %v1025_v38 = vsel %vm864_vm1, 0, %v1024_v32  ;;  %v1038_v39 = vperm.slane %v1034_v36, %v3600_v19  ;;  %v947_v22 = vshrl.u32 %v922_v61, 16  ;;  %v924_v23 = vsel %vm864_vm1, 0, %v923_v14 }
 0x1a3   : > { %v1053_v43 = vsel %vm864_vm1, %v1052_v34, %v1025_v38  ;;  %v954_v24 = vshrl.u32 %v943_v18, 16  ;;  %v952_v26 = vpack.i.b16 %v943_v18, %v924_v23  ;;  %v953_v27 = vshrl.u32 %v924_v23, 16 }
 0x1a4   : > { %v1039_v50 = vrot.slane %v1038_v39, 4  ;;  %v1057_v51 = vperm.slane %v1053_v43, %v3600_v19  ;;  %v949_v25 = vpack.i.b16 %v948_v17, %v947_v22  ;;  %v782_v30 = vlaneseq }
 0x1a5   : > { %v955_v28 = vpack.i.b16 %v954_v24, %v953_v27  ;;  %v3377_v32 = vmov 0  }
 0x1a6   : > { %v1040_v45 = vsel %vm864_vm1, %v1039_v50, %v1032_v49  ;;  %v1058_v47 = vrot.slane %v1057_v51, 4  ;;  %v789_v33 = vsel %vm788_vm3, 1, %v3377_v32  ;;  %v783_v34 = vshrl.u32 %v782_v30, 7 }
 0x1a7   : > { %v1044_v54 = vperm.slane %v1040_v45, %v3609_v31  ;;  %v785_v35 = vand.u32 127, %v782_v30  ;;  %v790_v36 = vperm.slane %v789_v33, 0 }
 0x1a8   : > { %v1059_v56 = vsel %vm864_vm1, %v1058_v47, %v1051_v53 }
 0x1a9   : > { %v1063_v57 = vperm.slane %v1059_v56, %v3609_v31  ;;  %v1045_v58 = vrot.slane %v1044_v54, 4  ;;  %v1069_v60 = vshrl.u32 %v1044_v54, 16  ;;  %vm786_vm4 = vcmp.le.s32.totalorder %v785_v35, %v783_v34 }
 0x1aa   : > { %vm791_vm5 = vcmp.eq.s32.totalorder %v790_v36, 1 }
 0x1ab   : > { %v1068_v62 = vpack.i.b16 %v1063_v57, %v1044_v54  ;;  %v1070_v63 = vshrl.u32 %v1063_v57, 16  ;;  %v1046_v0 = vsel %vm864_vm1, 0, %v1045_v58  ;;  %v1064_v1 = vrot.slane %v1063_v57, 4  ;;  %vm792_vm6 = vmand %vm786_vm4, %vm791_vm5  ;;  %v1079_v54 = vpop.permute.xlu1 %1078 }
 0x1ac   : > { %v1075_v8 = vshrl.u32 %v1046_v0, 16 }
 0x1ad   : > { %v1205_v3 = vsel %vm1200_vm2, %v1068_v62, 0  ;;  %v1071_v4 = vpack.i.b16 %v1070_v63, %v1069_v60  ;;  %v1065_v5 = vsel %vm864_vm1, 0, %v1064_v1 }
 0x1ae   : > { %1214 = vmatpush.bf16.xpose.msra.mxu1 %v1205_v3  ;;  %v1074_v7 = vpack.i.b16 %v1065_v5, %v1046_v0  ;;  %v1076_v12 = vshrl.u32 %v1065_v5, 16 }
 0x1af   : > { %v1224_v13 = vsel %vm1200_vm2, %v1071_v4, 0 }
 0x1b0   : > { %1233 = vmatpush.bf16.xpose.msra.mxu2 %v1224_v13  ;;  %v1243_v15 = vsel %vm1200_vm2, %v1074_v7, 0  ;;  %v1077_v16 = vpack.i.b16 %v1076_v12, %v1075_v8  ;;  %v1089_v12 = vshrl.u32 %v1079_v54, 16 }
 0x1b1   : > { %1252 = vmatpush.bf16.xpose.msra.mxu3 %v1243_v15 }
 0x1b2   : > { %v1262_v20 = vsel %vm1200_vm2, %v1077_v16, 0 }
 0x1b3   : > { %1271 = vmatpush.bf16.xpose.msrb.mxu0 %v1262_v20 }
 0x1b5   : > { %3095 = vmatmul.msk.bf16.vlgmr.msra.gmra.mxu1 %vm1200_vm2, %v946_v21 }
 0x1b7   : > { %3096 = vmatmul.msk.bf16.vlgmr.msra.gmra.mxu2 %vm1200_vm2, %v949_v25 }
 0x1b8   : > { %3097 = vmatmul.msk.bf16.vlgmr.msra.gmra.mxu3 %vm1200_vm2, %v952_v26 }
 0x1ba   : > { %3098 = vmatmul.msk.bf16.vlgmr.msrb.gmra.mxu0 %vm1200_vm2, %v955_v28 }
 0x232   : > { %v1216_v37 = vpop.f32.mrf.mxu1 }
 0x233   : > { %v1277_v38 = vsel %vm792_vm6, %v1216_v37, -1e+10 }
 0x234   : > { %v1281_v39 = vsel %vm1200_vm2, %v1277_v38, -inf }
 0x235   : > { %1282 = vmax.xlane.f32.xlu0 %v1281_v39 }
 0x237   : > { %v1273_v40 = vpop.f32.mrf.mxu0 }
 0x238   : > { %v1280_v41 = vsel %vm792_vm6, %v1273_v40, -1e+10 }
 0x239   : > { %v1290_v42 = vsel %vm1200_vm2, %v1280_v41, -inf }
 0x23a   : > { %v1218_v43 = vpop.f32.mrf.mxu1  ;;  %v1235_v46 = vpop.f32.mrf.mxu2  ;;  %1291 = vmax.xlane.f32.xlu2 %v1290_v42 }
 0x23b   : > { %v1254_v49 = vpop.f32.mrf.mxu3  ;;  %v1278_v52 = vsel %vm792_vm6, %v1235_v46, -1e+10 }
 0x23c   : > { %v1279_v50 = vsel %vm792_vm6, %v1254_v49, -1e+10  ;;  %v1284_v45 = vsel %vm1200_vm2, %v1278_v52, -inf }
 0x23d   : > { %v1287_v51 = vsel %vm1200_vm2, %v1279_v50, -inf }
 0x23e   : > { %1288 = vmax.xlane.f32.xlu1 %v1287_v51 }
 0x23f   : > { %v1275_v44 = vpop.f32.mrf.mxu0 }
 0x242   : > { %v1237_v53 = vpop.f32.mrf.mxu2  ;;  %1285 = vmax.xlane.f32.xlu2 %v1284_v45 }
 0x243   : > { %v1256_v47 = vpop.f32.mrf.mxu3 }
 0x249   : > { %1082 = vrot.lane.b32.xlu0 %v3593_v11, %s3374_s25 }
 0x257   : > { %1084 = vrot.lane.b32.xlu1 %v3585_v9, %s3374_s25 }
 0x25a   : > { %1080 = vrot.lane.b32.xlu2 %v3587_v10, %s3374_s25  ;;  %s4280_s25 = smov 16  }
 0x2a8   : > { %v1283_v48 = vpop.xlane.xlu0 %1282 }
 0x2a9   : > { %v1293_v55 = vsub.f32 %v1277_v38, %v1283_v48 }
 0x2ab   : > { %v1297_v56 = vmul.f32 1.442695, %v1293_v55 }
 0x2ad   : > { %3266 = vpow2.f32 %v1297_v56  ;;  %v1292_v57 = vpop.xlane.xlu2 %1291 }
 0x2ae   : > { %v1296_v61 = vsub.f32 %v1280_v41, %v1292_v57 }
 0x2b0   : > { %v1303_v10 = vmul.f32 1.442695, %v1296_v61 }
 0x2b1   : > { %v1289_v58 = vpop.xlane.xlu1 %1288 }
 0x2b2   : > { %v1295_v59 = vsub.f32 %v1279_v50, %v1289_v58 }
 0x2b3   : > { %v3689_v60 = vpop.eup %3266 }
 0x2b4   : > { %v1301_v62 = vmul.f32 1.442695, %v1295_v59  ;;  %v1305_v11 = vsel %vm1200_vm2, %v3689_v60, 0.0 }
 0x2b5   : > { %v1286_v63 = vpop.xlane.xlu2 %1285  ;;  %1306 = vadd.xlane.f32.xlu1 %v1305_v11 }
 0x2b6   : > { %3268 = vpow2.f32 %v1301_v62  ;;  %v1294_v9 = vsub.f32 %v1278_v52, %v1286_v63 }
 0x2b8   : > { %v1299_v0 = vmul.f32 1.442695, %v1294_v9 }
 0x2ba   : > { %3270 = vpow2.f32 %v1299_v0 }
 0x2bb   : > { %3272 = vpow2.f32 %v1303_v10  ;;  %v1083_v16 = vpop.permute.xlu0 %1082 }
 0x2bc   : > { %v3693_v1 = vpop.eup %3268  ;;  %v1095_v20 = vshrl.u32 %v1083_v16, 16 }
 0x2bd   : > { %v1311_v3 = vsel %vm1200_vm2, %v3693_v1, 0.0  ;;  %v1081_v4 = vpop.permute.xlu2 %1080 }
 0x2be   : > { %1312 = vadd.xlane.f32.xlu0 %v1311_v3  ;;  %v1090_v8 = vshrl.u32 %v1081_v4, 16  ;;  %v1088_v13 = vpack.i.b16 %v1081_v4, %v1079_v54 }
 0x2c0   : > { %v3697_v5 = vpop.eup %3270  ;;  %v1091_v15 = vpack.i.b16 %v1090_v8, %v1089_v12  ;;  %v1102_v17 = vperm.slane %v1088_v13, %v3600_v19 }
 0x2c1   : > { %v1308_v6 = vsel %vm1200_vm2, %v3697_v5, 0.0  ;;  %v3701_v7 = vpop.eup %3272 }
 0x2c2   : > { %1309 = vadd.xlane.f32.xlu2 %v1308_v6  ;;  %v1314_v14 = vsel %vm1200_vm2, %v3701_v7, 0.0  ;;  %v1128_v21 = vperm.slane %v1091_v15, %v3600_v19  ;;  %v1110_v24 = vrot.slane %v1102_v17, 4 }
 0x2c4   : > { %v1136_v27 = vrot.slane %v1128_v21, 4 }
 0x2c6   : > { %1315 = vadd.xlane.f32.xlu0 %v1314_v14 }
 0x2c9   : > { %v1085_v18 = vpop.permute.xlu1 %1084 }
 0x2ca   : > { %v1094_v22 = vpack.i.b16 %v1085_v18, %v1083_v16  ;;  %v1096_v23 = vshrl.u32 %v1085_v18, 16 }
 0x2cc   : > { %v1097_v25 = vpack.i.b16 %v1096_v23, %v1095_v20  ;;  %v1107_v26 = vperm.slane %v1094_v22, %v3600_v19 }
 0x2ce   : > { %v1108_v28 = vrot.slane %v1107_v26, 4  ;;  %v1111_v29 = vsel %vm864_vm1, %v1107_v26, %v1110_v24  ;;  %v1133_v30 = vperm.slane %v1097_v25, %v3600_v19 }
 0x2cf   : > { %v1119_v32 = vperm.slane %v1111_v29, %v3609_v31 }
 0x2d0   : > { %v1109_v33 = vsel %vm864_vm1, %v1108_v28, %v1102_v17  ;;  %v1134_v34 = vrot.slane %v1133_v30, 4  ;;  %v1137_v35 = vsel %vm864_vm1, %v1133_v30, %v1136_v27 }
 0x2d1   : > { %v1115_v36 = vperm.slane %v1109_v33, %v3609_v31  ;;  %v1122_v37 = vrot.slane %v1119_v32, 4  ;;  %v1145_v38 = vperm.slane %v1137_v35, %v3609_v31 }
 0x2d2   : > { %v1135_v39 = vsel %vm864_vm1, %v1134_v34, %v1128_v21 }
 0x2d3   : > { %v1120_v40 = vrot.slane %v1115_v36, 4  ;;  %v1123_v41 = vsel %vm864_vm1, 0, %v1122_v37  ;;  %v1141_v42 = vperm.slane %v1135_v39, %v3609_v31  ;;  %v1148_v43 = vrot.slane %v1145_v38, 4 }
 0x2d4   : > { %v1155_v46 = vrot.slane %v1123_v41, 4  ;;  %v1150_v44 = vsel %vm864_vm1, %v1122_v37, %v1115_v36 }
 0x2d5   : > { %v1121_v49 = vsel %vm864_vm1, 0, %v1120_v40  ;;  %v1146_v50 = vrot.slane %v1141_v42, 4  ;;  %v1149_v51 = vsel %vm864_vm1, 0, %v1148_v43  ;;  %v1169_v48 = vsel %vm864_vm1, %v1148_v43, %v1141_v42 }
 0x2d6   : > { %v1174_v52 = vrot.slane %v1149_v51, 4  ;;  %v1156_v45 = vsel %vm864_vm1, %v1155_v46, %v1121_v49  ;;  %v1154_v55 = vperm.slane %v1150_v44, %v3600_v19  ;;  %v1173_v59 = vperm.slane %v1169_v48, %v3600_v19 }
 0x2d7   : > { %v1147_v53 = vsel %vm864_vm1, 0, %v1146_v50  ;;  %v1160_v47 = vperm.slane %v1156_v45, %v3600_v19 }
 0x2d8   : > { %v1175_v54 = vsel %vm864_vm1, %v1174_v52, %v1147_v53 }
 0x2d9   : > { %v1161_v56 = vrot.slane %v1160_v47, 4  ;;  %v1179_v57 = vperm.slane %v1175_v54, %v3600_v19 }
 0x2db   : > { %v1162_v58 = vsel %vm864_vm1, %v1161_v56, %v1154_v55  ;;  %v1180_v61 = vrot.slane %v1179_v57, 4 }
 0x2dc   : > { %v1166_v62 = vperm.slane %v1162_v58, %v3609_v31 }
 0x2dd   : > { %v1181_v11 = vsel %vm864_vm1, %v1180_v61, %v1173_v59 }
 0x2de   : > { %v1185_v63 = vperm.slane %v1181_v11, %v3609_v31  ;;  %v1167_v9 = vrot.slane %v1166_v62, 4  ;;  %v1191_v10 = vshrl.u32 %v1166_v62, 16 }
 0x2e0   : > { %v1190_v0 = vpack.i.b16 %v1185_v63, %v1166_v62  ;;  %v1192_v3 = vshrl.u32 %v1185_v63, 16  ;;  %v1168_v4 = vsel %vm864_vm1, 0, %v1167_v9  ;;  %v1186_v6 = vrot.slane %v1185_v63, 4 }
 0x2e1   : > { %v1197_v15 = vshrl.u32 %v1168_v4, 16 }
 0x2e2   : > { %v1386_v8 = vsel %vm1384_vm7, %v1190_v0, 0  ;;  %v1193_v12 = vpack.i.b16 %v1192_v3, %v1191_v10  ;;  %v1187_v13 = vsel %vm864_vm1, 0, %v1186_v6 }
 0x2e3   : > { %1395 = vmatpush.bf16.msrb.mxu1 %v1386_v8  ;;  %v1196_v14 = vpack.i.b16 %v1187_v13, %v1168_v4  ;;  %v1198_v16 = vshrl.u32 %v1187_v13, 16 }
 0x2e4   : > { %v1405_v17 = vsel %vm1384_vm7, %v1193_v12, 0 }
 0x2e5   : > { %1414 = vmatpush.bf16.msrb.mxu2 %v1405_v17  ;;  %v1424_v18 = vsel %vm1384_vm7, %v1196_v14, 0  ;;  %v1199_v20 = vpack.i.b16 %v1198_v16, %v1197_v15 }
 0x2e6   : > { %1433 = vmatpush.bf16.msrb.mxu3 %v1424_v18 }
 0x2e7   : > { %v1443_v21 = vsel %vm1384_vm7, %v1199_v20, 0 }
 0x2e8   : > { %1452 = vmatpush.bf16.msra.mxu0 %v1443_v21 }
 0x328   : > { %v1307_v22 = vpop.xlane.xlu1 %1306 }
 0x329   : > { %3274 = vrcp.f32 %v1307_v22  ;;  %v1328_v27 = vand.u32 2147483648, %v1307_v22  ;;  %v1326_v29 = vand.u32 2147483647, %v1307_v22  ;;  %vm1322_vm9 = vweird.f32 %v1307_v22 }
 0x32b   : > { %v1329_v33 = vor.u32 1.1754944e-38, %v1328_v27  ;;  %vm1327_vm11 = vcmp.eq.f32.partialorder %v1326_v29, 8.507059e+37 }
 0x32f   : > { %v3275_v23 = vpop.eup %3274 }
 0x330   : > { %v1318_v24 = vmul.f32 %v3275_v23, %v1307_v22  ;;  %vm1323_vm8 = vweird.f32 %v3275_v23 }
 0x331   : > { %v1313_v25 = vpop.xlane.xlu0 %1312  ;;  %vm1324_vm10 = vmor %vm1322_vm9, %vm1323_vm8 }
 0x332   : > { %v1319_v26 = vsub.f32 1.0, %v1318_v24  ;;  %3276 = vrcp.f32 %v1313_v25  ;;  %v1356_v42 = vand.u32 2147483647, %v1313_v25  ;;  %v1358_v43 = vand.u32 2147483648, %v1313_v25 }
 0x333   : > { %vm1352_vm13 = vweird.f32 %v1313_v25 }
 0x334   : > { %v1320_v28 = vmul.f32 %v3275_v23, %v1319_v26  ;;  %vm1357_vm15 = vcmp.eq.f32.partialorder %v1356_v42, 8.507059e+37  ;;  %v1359_v45 = vor.u32 1.1754944e-38, %v1358_v43 }
 0x335   : > { %v1310_v30 = vpop.xlane.xlu2 %1309 }
 0x336   : > { %v1321_v32 = vadd.f32 %v3275_v23, %v1320_v28  ;;  %3278 = vrcp.f32 %v1310_v30  ;;  %v1341_v53 = vand.u32 2147483647, %v1310_v30  ;;  %v1343_v47 = vand.u32 2147483648, %v1310_v30 }
 0x337   : > { %vm1337_vm4 = vweird.f32 %v1310_v30 }
 0x338   : > { %v3277_v34 = vpop.eup %3276  ;;  %v1325_v35 = vsel %vm1324_vm10, %v3275_v23, %v1321_v32  ;;  %vm1342_vm6 = vcmp.eq.f32.partialorder %v1341_v53, 8.507059e+37  ;;  %v1344_v59 = vor.u32 1.1754944e-38, %v1343_v47 }
 0x339   : > { %v1348_v36 = vmul.f32 %v3277_v34, %v1313_v25  ;;  %v1316_v37 = vpop.xlane.xlu0 %1315  ;;  %v1330_v38 = vsel %vm1327_vm11, %v1329_v33, %v1325_v35  ;;  %vm1353_vm12 = vweird.f32 %v3277_v34  ;;  %vm1582_vm11 = vcmask 130048  }
 0x33a   : > { %3280 = vrcp.f32 %v1316_v37  ;;  %v1331_v40 = vmul.f32 %v3689_v60, %v1330_v38  ;;  %vm1354_vm14 = vmor %vm1352_vm13, %vm1353_vm12  ;;  %v1371_v61 = vand.u32 2147483647, %v1316_v37  ;;  %v1373_v62 = vand.u32 2147483648, %v1316_v37 }
 0x33b   : > { %v1349_v39 = vsub.f32 1.0, %v1348_v36  ;;  %vm1367_vm8 = vweird.f32 %v1316_v37  ;;  %vm1584_vm12 = vcmask 195584  }
 0x33c   : > { %v3279_v41 = vpop.eup %3278  ;;  %v1377_v50 = vpack.c.bf16 %v1331_v40, %v1331_v40  ;;  %v1374_v4 = vor.u32 1.1754944e-38, %v1373_v62  ;;  %vm1372_vm10 = vcmp.eq.f32.partialorder %v1371_v61, 8.507059e+37 }
 0x33d   : > { %v1350_v46 = vmul.f32 %v3277_v34, %v1349_v39  ;;  %v1333_v49 = vmul.f32 %v3279_v41, %v1310_v30  ;;  %vm1338_vm3 = vweird.f32 %v3279_v41 }
 0x33e   : > { %3099 = vmatmul.msk.bf16.vlgmr.msrb.gmra.mxu1 %vm1200_vm2, %v1377_v50  ;;  %vm1339_vm5 = vmor %vm1337_vm4, %vm1338_vm3 }
 0x33f   : > { %v1351_v51 = vadd.f32 %v3277_v34, %v1350_v46  ;;  %v1334_v52 = vsub.f32 1.0, %v1333_v49 }
 0x340   : > { %v3281_v44 = vpop.eup %3280 }
 0x341   : > { %v1335_v48 = vmul.f32 %v3279_v41, %v1334_v52  ;;  %v1363_v60 = vmul.f32 %v3281_v44, %v1316_v37  ;;  %v1355_v54 = vsel %vm1354_vm14, %v3277_v34, %v1351_v51  ;;  %vm1368_vm7 = vweird.f32 %v3281_v44 }
 0x342   : > { %v1360_v55 = vsel %vm1357_vm15, %v1359_v45, %v1355_v54  ;;  %vm1369_vm9 = vmor %vm1367_vm8, %vm1368_vm7 }
 0x343   : > { %v1336_v56 = vadd.f32 %v3279_v41, %v1335_v48  ;;  %v1364_v57 = vsub.f32 1.0, %v1363_v60  ;;  %v1361_v58 = vmul.f32 %v3693_v1, %v1360_v55 }
 0x345   : > { %v1365_v11 = vmul.f32 %v3281_v44, %v1364_v57  ;;  %v1379_v63 = vpack.c.bf16 %v1361_v58, %v1361_v58  ;;  %v1340_v9 = vsel %vm1339_vm5, %v3279_v41, %v1336_v56 }
 0x346   : > { %v1345_v10 = vsel %vm1342_vm6, %v1344_v59, %v1340_v9 }
 0x347   : > { %v1366_v0 = vadd.f32 %v3281_v44, %v1365_v11  ;;  %3101 = vmatmul.msk.bf16.vlgmr.msrb.gmra.mxu3 %vm1200_vm2, %v1379_v63  ;;  %v1346_v3 = vmul.f32 %v3697_v5, %v1345_v10 }
 0x349   : > { %v1370_v6 = vsel %vm1369_vm9, %v3281_v44, %v1366_v0  ;;  %v1378_v1 = vpack.c.bf16 %v1346_v3, %v1346_v3 }
 0x34a   : > { %v1375_v8 = vsel %vm1372_vm10, %v1374_v4, %v1370_v6 }
 0x34b   : > { %v1376_v12 = vmul.f32 %v3701_v7, %v1375_v8  ;;  %3100 = vmatmul.msk.bf16.vlgmr.msrb.gmra.mxu2 %vm1200_vm2, %v1378_v1 }
 0x34d   : > { %v1380_v13 = vpack.c.bf16 %v1376_v12, %v1376_v12 }
 0x34f   : > { %3102 = vmatmul.msk.bf16.vlgmr.msra.gmra.mxu0 %vm1200_vm2, %v1380_v13 }
 0x3bb   : > { %v1397_v14 = vpop.f32.mrf.mxu1 }
 0x3bc   : > { %v1461_v16 = vrot.slane %v1397_v14, 4 }
 0x3c3   : > { %v1399_v15 = vpop.f32.mrf.mxu1 }
 0x3ca   : > { %v1435_v17 = vpop.f32.mrf.mxu3 }
 0x3cb   : > { %v1458_v18 = vrot.slane %v1435_v17, 4  ;;  %v1462_v5 = vsel %vm864_vm1, %v1435_v17, %v1461_v16 }
 0x3cc   : > { %v1454_v20 = vpop.f32.mrf.mxu0  ;;  %v1470_v7 = vperm.slane %v1462_v5, %v3600_v19 }
 0x3cd   : > { %v1460_v21 = vsel %vm864_vm1, %v1458_v18, %v1397_v14  ;;  %v1471_v22 = vrot.slane %v1454_v20, 4 }
 0x3ce   : > { %v1466_v23 = vperm.slane %v1460_v21, %v3600_v19  ;;  %v1416_v24 = vpop.f32.mrf.mxu2  ;;  %v1497_v30 = vrot.slane %v1470_v7, 4 }
 0x3cf   : > { %v1472_v25 = vsel %vm864_vm1, %v1471_v22, %v1416_v24  ;;  %v1473_v26 = vrot.slane %v1416_v24, 4 }
 0x3d0   : > { %v1485_v27 = vrot.slane %v1466_v23, 4  ;;  %v1478_v28 = vperm.slane %v1472_v25, %v3600_v19 }
 0x3d1   : > { %v1474_v29 = vsel %vm864_vm1, %v1454_v20, %v1473_v26 }
 0x3d2   : > { %v1482_v32 = vperm.slane %v1474_v29, %v3600_v19  ;;  %v1483_v33 = vrot.slane %v1478_v28, 4  ;;  %v1486_v34 = vsel %vm864_vm1, %v1478_v28, %v1485_v27  ;;  %v1437_v35 = vpop.f32.mrf.mxu3 }
 0x3d3   : > { %v1494_v36 = vperm.slane %v1486_v34, %v3609_v31  ;;  %v3254_v35 = vld [vmem:[%s4314_s23] ss:$0 sm:$0xff]  ;;  %s4315_s23 = smov 120  }
 0x3d4   : > { %v1484_v37 = vsel %vm864_vm1, %v1483_v33, %v1466_v23  ;;  %v1495_v38 = vrot.slane %v1482_v32, 4  ;;  %v1498_v39 = vsel %vm864_vm1, %v1482_v32, %v1497_v30  ;;  %v1456_v40 = vpop.f32.mrf.mxu0  ;;  %v3187_v23 = vld [vmem:[%s4311_s29 + $0x8] sm:$0xff]  ;;  %v3190_v33 = vld [vmem:[%s4312_s11] sm:$0xff] }
 0x3d5   : > { %v1490_v41 = vperm.slane %v1484_v37, %v3609_v31  ;;  %v1506_v42 = vperm.slane %v1498_v39, %v3609_v31  ;;  %v1509_v43 = vrot.slane %v1494_v36, 4  ;;  %1616 = vmatpush.bf16.msra.mxu1 %v3187_v23  ;;  %v3191_v32 = vld [vmem:[%s4312_s11 + $0x8] sm:$0xff] }
 0x3d6   : > { %v1496_v46 = vsel %vm864_vm1, %v1495_v38, %v1470_v7  ;;  %v1418_v49 = vpop.f32.mrf.mxu2  ;;  %v3186_v7 = vld [vmem:[%s4311_s29] sm:$0xff]  ;;  %1734 = vmatpush.bf16.msra.mxu3 %v3191_v32  ;;  %s4318_s29 = smov 96  }
 0x3d7   : > { %v1502_v50 = vperm.slane %v1496_v46, %v3609_v31  ;;  %v1507_v51 = vrot.slane %v1490_v41, 4  ;;  %v1510_v52 = vsel %vm864_vm1, 0.0, %v1509_v43  ;;  %v1513_v44 = vrot.slane %v1506_v42, 4 }
 0x3d8   : > { %v1515_v45 = vsel %vm864_vm1, %v1509_v43, %v1490_v41  ;;  %v1520_v53 = vrot.slane %v1510_v52, 4  ;;  %v3381_v41 = vmov 32.0  }
 0x3d9   : > { %v1508_v47 = vsel %vm864_vm1, 0.0, %v1507_v51  ;;  %v1511_v48 = vrot.slane %v1502_v50, 4  ;;  %v1514_v60 = vsel %vm864_vm1, 0.0, %v1513_v44  ;;  %v1519_v54 = vperm.slane %v1515_v45, %v3600_v19  ;;  %1617 = vmatpush.bf16.msra.mxu1 %v3186_v7 }
 0x3da   : > { %v1531_v55 = vrot.slane %v1514_v60, 4  ;;  %v1521_v56 = vsel %vm864_vm1, %v1520_v53, %v1508_v47  ;;  %v1526_v57 = vsel %vm864_vm1, %v1513_v44, %v1502_v50  ;;  %1735 = vmatpush.bf16.msra.mxu3 %v3190_v33  ;;  %3282 = vrcp.f32 %v3381_v41  ;;  %v3255_v50 = vld [vmem:[%s4251_s12] ss:$0 sm:$0xff] }
 0x3db   : > { %v1512_v58 = vsel %vm864_vm1, 0.0, %v1511_v48  ;;  %v1525_v59 = vperm.slane %v1521_v56, %v3600_v19  ;;  %v1530_v61 = vperm.slane %v1526_v57, %v3600_v19  ;;  %v1539_v62 = vrot.slane %v1519_v54, 4 }
 0x3dc   : > { %v1532_v11 = vsel %vm864_vm1, %v1531_v55, %v1512_v58  ;;  %v3189_v58 = vld [vmem:[%s4319_s9 + $0x8] sm:$0xff] }
 0x3dd   : > { %v1536_v63 = vperm.slane %v1532_v11, %v3600_v19  ;;  %v1540_v9 = vsel %vm864_vm1, %v1525_v59, %v1539_v62  ;;  %v1551_v10 = vrot.slane %v1530_v61, 4  ;;  %v1537_v0 = vrot.slane %v1525_v59, 4  ;;  %1693 = vmatpush.bf16.msra.mxu2 %v3189_v58  ;;  %v3188_v59 = vld [vmem:[%s4319_s9] sm:$0xff] }
 0x3de   : > { %v1548_v3 = vperm.slane %v1540_v9, %v3609_v31 }
 0x3df   : > { %v1552_v4 = vsel %vm864_vm1, %v1536_v63, %v1551_v10  ;;  %v1538_v6 = vsel %vm864_vm1, %v1537_v0, %v1519_v54  ;;  %v1549_v1 = vrot.slane %v1536_v63, 4 }
 0x3e0   : > { %v1560_v8 = vperm.slane %v1552_v4, %v3609_v31  ;;  %v1567_v12 = vrot.slane %v1548_v3, 4  ;;  %v1544_v13 = vperm.slane %v1538_v6, %v3609_v31  ;;  %v3283_v42 = vpop.eup %3282 }
 0x3e1   : > { %v1550_v14 = vsel %vm864_vm1, %v1549_v1, %v1530_v61  ;;  %v1630_v43 = vmul.f32 32.0, %v3283_v42  ;;  %vm1634_vm13 = vweird.f32 %v3283_v42  ;;  %1694 = vmatpush.bf16.msra.mxu2 %v3188_v59 }
 0x3e2   : > { %v1568_v15 = vsel %vm864_vm1, %v1560_v8, %v1567_v12  ;;  %v1565_v16 = vrot.slane %v1560_v8, 4  ;;  %v1556_v17 = vperm.slane %v1550_v14, %v3609_v31  ;;  %v1563_v18 = vrot.slane %v1544_v13, 4 }
 0x3e3   : > { %1578 = vrot.lane.b32.xlu0 %v1568_v15, %s4275_s5  ;;  %v1631_v46 = vsub.f32 1.0, %v1630_v43  ;;  %s4325_s5 = smov 8  }
 0x3e4   : > { %v1566_v5 = vsel %vm864_vm1, %v1565_v16, %v1548_v3  ;;  %v1561_v20 = vrot.slane %v1556_v17, 4  ;;  %v1564_v21 = vsel %vm864_vm1, %v1556_v17, %v1563_v18 }
 0x3e5   : > { %1574 = vrot.lane.b32.xlu1 %v1566_v5, %s4280_s25  ;;  %1570 = vrot.lane.b32.xlu2 %v1564_v21, %s4278_s8  ;;  %s4313_s8 = sld [smem:[#allocation12_spill]]  ;;  %v1632_v49 = vmul.f32 %v3283_v42, %v1631_v46 }
 0x3e6   : > { %v1562_v22 = vsel %vm864_vm1, %v1561_v20, %v1544_v13 }
 0x3e7   : > { %v1633_v51 = vadd.f32 %v3283_v42, %v1632_v49 }
 0x3e9   : > { %v3820_v45 = vsel %vm1634_vm13, %v3283_v42, %v1633_v51 }
 0x3eb   : > { %s770_s25 = scalar_lea.vmem %s4313_s8, %s3082_s30  ;;  %s4320_s30 = sld [smem:[#allocation18_spill]] }
 0x3ec   : > { %v3183_v34 = vld [vmem:[%s770_s25] sm:$0xff]  ;;  %s4321_s8 = sld [smem:[#allocation19_spill]] }
 0x3ed   : > { %3133 = vmatmul.msk.bf16.vlgmr.msra.gmra.mxu3 %vm816_vm0, %v3183_v34 }
 0x3f1   : > { %v3256_v18 = vld [vmem:[%s4320_s30] ss:$0 sm:$0xff] }
 0x43f   : > { %v1571_v24 = vpop.permute.xlu2 %1570 }
 0x440   : > { %v1581_v25 = vsel %vm1200_vm2, %v1562_v22, %v1571_v24  ;;  %v3257_v22 = vld [vmem:[%s4321_s8] ss:$0 sm:$0xff] }
 0x455   : > { %v1579_v27 = vpop.permute.xlu0 %1578 }
 0x457   : > { %v1575_v26 = vpop.permute.xlu1 %1574 }
 0x458   : > { %v1583_v28 = vsel %vm1582_vm11, %v1581_v25, %v1575_v26 }
 0x459   : > { %v1585_v29 = vsel %vm1584_vm12, %v1583_v28, %v1579_v27 }
 0x45a   : > { %v1586_v30 = vpack.c.bf16 %v1585_v29, %v1585_v29 }
 0x45c   : > { %3111 = vmatmul.msk.bf16.vlgmr.msra.gmra.mxu1 %vm816_vm0, %v1586_v30 }
 0x470   : > { %v1737_v52 = vpop.f32.mrf.mxu3 }
 0x471   : > { %v1738_v44 = vadd.f32 %v3255_v50, %v1737_v52 }
 0x478   : > { %v1739_v60 = vpop.f32.mrf.mxu3 }
 0x479   : > { %v1740_v54 = vadd.f32 %v3255_v50, %v1739_v60 }
 0x47b   : > { %v1865_v56 = vpack.c.bf16 %v1740_v54, %v1740_v54 }
 0x47d   : > { %v1895_v4 = vshrl.u32 %v1865_v56, 16 }
 0x4d9   : > { %v1619_v36 = vpop.f32.mrf.mxu1 }
 0x4da   : > { %v1620_v37 = vadd.f32 %v3254_v35, %v1619_v36 }
 0x4dc   : > { %v1625_v38 = vadd.f32 %v1620_v37, %v3572_v2  ;;  %v3822_v2 = vpack.c.bf16 %v1738_v44, %v1738_v44 }
 0x4de   : > { %v1626_v39 = vsel %vm816_vm0, %v1625_v38, 0.0  ;;  %1868 = vrot.lane.b32.xlu1 %v3822_v2, %s4315_s23  ;;  %v1883_v7 = vshrl.u32 %v3822_v2, 16 }
 0x4df   : > { %1627 = vadd.xlane.f32.xlu2 %v1626_v39 }
 0x4e1   : > { %v1621_v40 = vpop.f32.mrf.mxu1 }
 0x4e6   : > { %1870 = vrot.lane.b32.xlu1 %v1865_v56, %s4315_s23 }
 0x4ee   : > { %1872 = vrot.lane.b32.xlu1 %v3822_v2, %s4317_s27 }
 0x4f6   : > { %1874 = vrot.lane.b32.xlu1 %v1865_v56, %s4317_s27 }
 0x4f7   : > { %1878 = vrot.lane.b32.xlu2 %v1865_v56, %s4316_s28 }
 0x4fe   : > { %1876 = vrot.lane.b32.xlu1 %v3822_v2, %s4316_s28 }
 0x4ff   : > { %2110 = vrot.lane.b32.xlu2 %v1865_v56, %s4318_s29 }
 0x550   : > { %v3842_v61 = vpop.permute.xlu1 %1868 }
 0x551   : > { %v1884_v24 = vshrl.u32 %v3842_v61, 16  ;;  %v1882_v26 = vpack.i.b16 %v3842_v61, %v3822_v2 }
 0x552   : > { %v1628_v53 = vpop.xlane.xlu2 %1627 }
 0x553   : > { %v1636_v47 = vmul.f32 %v3820_v45, %v1628_v53  ;;  %v1885_v36 = vpack.i.b16 %v1884_v24, %v1883_v7  ;;  %v1908_v37 = vperm.slane %v1882_v26, %v3600_v19 }
 0x555   : > { %v1637_v48 = vsub.f32 %v1625_v38, %v1636_v47  ;;  %v1934_v51 = vperm.slane %v1885_v36, %v3600_v19 }
 0x557   : > { %v1638_v55 = vmul.f32 %v1637_v48, %v1637_v48 }
 0x558   : > { %v3845_v9 = vpop.permute.xlu1 %1870 }
 0x559   : > { %v1639_v57 = vsel %vm816_vm0, %v1638_v55, 0.0  ;;  %v1896_v6 = vshrl.u32 %v3845_v9, 16  ;;  %v1894_v12 = vpack.i.b16 %v3845_v9, %v1865_v56 }
 0x55a   : > { %1640 = vadd.xlane.f32.xlu0 %v1639_v57  ;;  %v3850_v15 = vpop.permute.xlu2 %1878 }
 0x55b   : > { %v1897_v14 = vpack.i.b16 %v1896_v6, %v1895_v4  ;;  %v1960_v17 = vperm.slane %v1894_v12, %v3600_v19  ;;  %v1902_v21 = vshrl.u32 %v3850_v15, 16 }
 0x55d   : > { %v1986_v20 = vperm.slane %v1897_v14, %v3600_v19  ;;  %v1968_v27 = vrot.slane %v1960_v17, 4 }
 0x55f   : > { %v1994_v32 = vrot.slane %v1986_v20, 4 }
 0x560   : > { %v1873_v1 = vpop.permute.xlu1 %1872 }
 0x561   : > { %2116 = vrot.lane.b32.xlu2 %v1873_v1, %s4318_s29  ;;  %v1889_v43 = vshrl.u32 %v1873_v1, 16 }
 0x568   : > { %v3863_v25 = vpop.permute.xlu1 %1874 }
 0x569   : > { %v1901_v28 = vshrl.u32 %v3863_v25, 16  ;;  %v1900_v29 = vpack.i.b16 %v3850_v15, %v3863_v25 }
 0x56b   : > { %v1903_v33 = vpack.i.b16 %v1902_v21, %v1901_v28  ;;  %v1965_v34 = vperm.slane %v1900_v29, %v3600_v19 }
 0x56d   : > { %v1966_v38 = vrot.slane %v1965_v34, 4  ;;  %v1969_v39 = vsel %vm864_vm1, %v1965_v34, %v1968_v27  ;;  %v1991_v40 = vperm.slane %v1903_v33, %v3600_v19 }
 0x56e   : > { %v1977_v42 = vperm.slane %v1969_v39, %v3609_v31 }
 0x56f   : > { %v1967_v46 = vsel %vm864_vm1, %v1966_v38, %v1960_v17  ;;  %v1992_v49 = vrot.slane %v1991_v40, 4  ;;  %v1995_v50 = vsel %vm864_vm1, %v1991_v40, %v1994_v32 }
 0x570   : > { %v1973_v52 = vperm.slane %v1967_v46, %v3609_v31  ;;  %v1980_v44 = vrot.slane %v1977_v42, 4  ;;  %v2003_v53 = vperm.slane %v1995_v50, %v3609_v31  ;;  %v3885_v47 = vpop.permute.xlu1 %1876 }
 0x571   : > { %v1993_v60 = vsel %vm864_vm1, %v1992_v49, %v1986_v20  ;;  %v1888_v54 = vpack.i.b16 %v3885_v47, %v1873_v1  ;;  %v1890_v55 = vshrl.u32 %v3885_v47, 16 }
 0x572   : > { %v1978_v56 = vrot.slane %v1973_v52, 4  ;;  %v1981_v57 = vsel %vm864_vm1, 0, %v1980_v44  ;;  %v1999_v58 = vperm.slane %v1993_v60, %v3609_v31  ;;  %v2006_v59 = vrot.slane %v2003_v53, 4 }
 0x574   : > { %v2004_v4 = vrot.slane %v1999_v58, 4  ;;  %v2007_v6 = vsel %vm864_vm1, 0, %v2006_v59 }
 0x575   : > { %v2070_v12 = vrot.slane %v2007_v6, 4 }
 0x576   : > { %v2005_v14 = vsel %vm864_vm1, 0, %v2004_v4 }
 0x5cd   : > { %v1641_v62 = vpop.xlane.xlu0 %1640 }
 0x5ce   : > { %v1642_v11 = vmul.f32 %v1641_v62, %v3820_v45  ;;  %v2046_v62 = vsel %vm864_vm1, %v1980_v44, %v1973_v52 }
 0x5cf   : > { %v2050_v1 = vperm.slane %v2046_v62, %v3600_v19 }
 0x5d0   : > { %v1643_v63 = vadd.f32 1e-05, %v1642_v11  ;;  %v2051_v11 = vrot.slane %v1981_v57, 4 }
 0x5d2   : > { %3284 = vrsqrt.f32 %v1643_v63  ;;  %vm1650_vm15 = vweird.f32 %v1643_v63 }
 0x5d8   : > { %v3285_v10 = vpop.eup %3284 }
 0x5d9   : > { %v1645_v0 = vmul.f32 %v3285_v10, %v1643_v63  ;;  %vm1651_vm14 = vweird.f32 %v3285_v10  ;;  %v1891_v63 = vpack.i.b16 %v1890_v55, %v1889_v43 }
 0x5da   : > { %vm1652_vm3 = vmor %vm1650_vm15, %vm1651_vm14 }
 0x5db   : > { %v1646_v3 = vmul.f32 %v3285_v10, %v1645_v0  ;;  %v1942_v0 = vrot.slane %v1934_v51, 4  ;;  %v1939_v17 = vperm.slane %v1891_v63, %v3600_v19 }
 0x5dd   : > { %v1647_v8 = vmul.f32 0.5, %v1646_v3  ;;  %v1979_v3 = vsel %vm864_vm1, 0, %v1978_v56  ;;  %v1940_v7 = vrot.slane %v1939_v17, 4  ;;  %v1943_v24 = vsel %vm864_vm1, %v1939_v17, %v1942_v0 }
 0x5de   : > { %v1951_v28 = vperm.slane %v1943_v24, %v3609_v31 }
 0x5df   : > { %v1648_v13 = vsub.f32 1.5, %v1647_v8  ;;  %v2052_v8 = vsel %vm864_vm1, %v2051_v11, %v1979_v3  ;;  %v1941_v32 = vsel %vm864_vm1, %v1940_v7, %v1934_v51 }
 0x5e0   : > { %v1954_v38 = vrot.slane %v1951_v28, 4 }
 0x5e1   : > { %v1649_v16 = vmul.f32 %v3285_v10, %v1648_v13 }
 0x5e2   : > { %v1955_v46 = vsel %vm864_vm1, 0, %v1954_v38 }
 0x5e3   : > { %v1653_v5 = vsel %vm1652_vm3, %v3285_v10, %v1649_v16  ;;  %v1913_v10 = vperm.slane %v1888_v54, %v3600_v19  ;;  %v2032_v44 = vrot.slane %v1955_v46, 4 }
 0x5e4   : > { %v1654_v23 = vmul.f32 %v1653_v5, %v1637_v48  ;;  %v1916_v48 = vrot.slane %v1908_v37, 4  ;;  %v2065_v5 = vsel %vm864_vm1, %v2006_v59, %v1999_v58 }
 0x5e5   : > { %v1914_v13 = vrot.slane %v1913_v10, 4  ;;  %v2069_v34 = vperm.slane %v2065_v5, %v3600_v19 }
 0x5e6   : > { %v1658_v30 = vmul.f32 %v3256_v18, %v1654_v23  ;;  %v1917_v16 = vsel %vm864_vm1, %v1913_v10, %v1916_v48  ;;  %v2056_v18 = vperm.slane %v2052_v8, %v3600_v19 }
 0x5e7   : > { %v1915_v20 = vsel %vm864_vm1, %v1914_v13, %v1908_v37  ;;  %v1925_v21 = vperm.slane %v1917_v16, %v3609_v31  ;;  %v1947_v37 = vperm.slane %v1941_v32, %v3609_v31 }
 0x5e8   : > { %v3871_v35 = vadd.f32 %v3257_v22, %v1658_v30  ;;  %v2071_v22 = vsel %vm864_vm1, %v2070_v12, %v2005_v14  ;;  %v1921_v23 = vperm.slane %v1915_v20, %v3609_v31  ;;  %v2057_v26 = vrot.slane %v2056_v18, 4 }
 0x5e9   : > { %v1928_v27 = vrot.slane %v1925_v21, 4  ;;  %v2075_v29 = vperm.slane %v2071_v22, %v3600_v19  ;;  %v1952_v43 = vrot.slane %v1947_v37, 4  ;;  %v2027_v52 = vsel %vm864_vm1, %v1954_v38, %v1947_v37 }
 0x5ea   : > { %v1663_v41 = vpack.c.bf16 %v3871_v35, %v3871_v35  ;;  %v1926_v30 = vrot.slane %v1921_v23, 4  ;;  %v2058_v33 = vsel %vm864_vm1, %v2057_v26, %v2050_v1  ;;  %v2031_v58 = vperm.slane %v2027_v52, %v3600_v19 }
 0x5eb   : > { %v1929_v36 = vsel %vm864_vm1, 0, %v1928_v27  ;;  %v2008_v39 = vsel %vm864_vm1, %v1928_v27, %v1921_v23  ;;  %v2062_v42 = vperm.slane %v2058_v33, %v3609_v31  ;;  %v2076_v49 = vrot.slane %v2075_v29, 4 }
 0x5ec   : > { %3120 = vmatmul.msk.bf16.vlgmr.msra.gmra.mxu2 %vm816_vm0, %v1663_v41  ;;  %v1927_v40 = vsel %vm864_vm1, 0, %v1926_v30  ;;  %v2013_v41 = vrot.slane %v1929_v36, 4  ;;  %v2012_v50 = vperm.slane %v2008_v39, %v3600_v19  ;;  %v1953_v53 = vsel %vm864_vm1, 0, %v1952_v43 }
 0x5ed   : > { %v2077_v60 = vsel %vm864_vm1, %v2076_v49, %v2069_v34  ;;  %v2063_v54 = vrot.slane %v2062_v42, 4  ;;  %v2033_v55 = vsel %vm864_vm1, %v2032_v44, %v1953_v53  ;;  %v2099_v62 = vshrl.u32 %v2062_v42, 16  ;;  %v3258_v44 = vld [vmem:[%s4322_s10] ss:$0 sm:$0xff] }
 0x5ee   : > { %v2014_v51 = vsel %vm864_vm1, %v2013_v41, %v1927_v40  ;;  %v2081_v56 = vperm.slane %v2077_v60, %v3609_v31  ;;  %v2037_v59 = vperm.slane %v2033_v55, %v3600_v19 }
 0x5ef   : > { %v2018_v48 = vperm.slane %v2014_v51, %v3600_v19  ;;  %v2064_v63 = vsel %vm864_vm1, 0, %v2063_v54 }
 0x5f0   : > { %v2100_v11 = vshrl.u32 %v2081_v56, 16  ;;  %v2082_v10 = vrot.slane %v2081_v56, 4  ;;  %v2038_v3 = vrot.slane %v2037_v59, 4  ;;  %v2098_v4 = vpack.i.b16 %v2081_v56, %v2062_v42 }
 0x5f1   : > { %v2019_v57 = vrot.slane %v2018_v48, 4  ;;  %v2105_v12 = vshrl.u32 %v2064_v63, 16 }
 0x5f2   : > { %v2083_v1 = vsel %vm864_vm1, 0, %v2082_v10  ;;  %v2039_v8 = vsel %vm864_vm1, %v2038_v3, %v2031_v58  ;;  %v2101_v17 = vpack.i.b16 %v2100_v11, %v2099_v62  ;;  %v2353_v5 = vunpack.c.l.b16 %v2098_v4 }
 0x5f3   : > { %v2020_v0 = vsel %vm864_vm1, %v2019_v57, %v2012_v50  ;;  %v2106_v13 = vshrl.u32 %v2083_v1, 16  ;;  %v2043_v14 = vperm.slane %v2039_v8, %v3609_v31  ;;  %v2104_v20 = vpack.i.b16 %v2083_v1, %v2064_v63 }
 0x5f4   : > { %v2024_v6 = vperm.slane %v2020_v0, %v3609_v31  ;;  %v2375_v29 = vunpack.c.l.b16 %v2101_v17 }
 0x5f5   : > { %v2088_v22 = vshrl.u32 %v2043_v14, 16  ;;  %v2044_v7 = vrot.slane %v2043_v14, 4  ;;  %v2107_v26 = vpack.i.b16 %v2106_v13, %v2105_v12  ;;  %v2397_v33 = vunpack.c.l.b16 %v2104_v20 }
 0x5f6   : > { %v2087_v16 = vshrl.u32 %v2024_v6, 16  ;;  %v2025_v18 = vrot.slane %v2024_v6, 4  ;;  %v2086_v21 = vpack.i.b16 %v2043_v14, %v2024_v6 }
 0x5f7   : > { %v2045_v30 = vsel %vm864_vm1, 0, %v2044_v7  ;;  %v2419_v40 = vunpack.c.l.b16 %v2107_v26 }
 0x5f8   : > { %v2026_v23 = vsel %vm864_vm1, 0, %v2025_v18  ;;  %v2352_v27 = vunpack.c.l.b16 %v2086_v21  ;;  %v2089_v28 = vpack.i.b16 %v2088_v22, %v2087_v16  ;;  %v2094_v34 = vshrl.u32 %v2045_v30, 16 }
 0x5f9   : > { %v2093_v24 = vshrl.u32 %v2026_v23, 16  ;;  %v2092_v32 = vpack.i.b16 %v2045_v30, %v2026_v23 }
 0x5fa   : > { %v2354_v36 = vpack.c.b16 %v2353_v5, %v2352_v27  ;;  %v2374_v37 = vunpack.c.l.b16 %v2089_v28 }
 0x5fb   : > { %v2396_v38 = vunpack.c.l.b16 %v2092_v32  ;;  %v2095_v39 = vpack.i.b16 %v2094_v34, %v2093_v24 }
 0x5fc   : > { %v2359_v41 = vsel %vm1200_vm2, %v2354_v36, 0  ;;  %v2376_v42 = vpack.c.b16 %v2375_v29, %v2374_v37 }
 0x5fd   : > { %2368 = vmatpush.bf16.xpose.msrb.mxu0 %v2359_v41  ;;  %v2398_v43 = vpack.c.b16 %v2397_v33, %v2396_v38  ;;  %v2418_v46 = vunpack.c.l.b16 %v2095_v39 }
 0x5fe   : > { %v2381_v49 = vsel %vm1200_vm2, %v2376_v42, 0 }
 0x5ff   : > { %2390 = vmatpush.bf16.xpose.msrb.mxu1 %v2381_v49  ;;  %v2403_v50 = vsel %vm1200_vm2, %v2398_v43, 0  ;;  %v2420_v51 = vpack.c.b16 %v2419_v40, %v2418_v46 }
 0x600   : > { %2412 = vmatpush.bf16.xpose.msrb.mxu2 %v2403_v50 }
 0x601   : > { %v2425_v52 = vsel %vm1200_vm2, %v2420_v51, 0 }
 0x602   : > { %2434 = vmatpush.bf16.xpose.msrb.mxu3 %v2425_v52 }
 0x66f   : > { %v1696_v53 = vpop.f32.mrf.mxu2 }
 0x670   : > { %v1697_v48 = vadd.f32 %v3258_v44, %v1696_v53 }
 0x672   : > { %v1742_v60 = vpack.c.bf16 %v1697_v48, %v1697_v48 }
 0x674   : > { %1744 = vrot.lane.b32.xlu0 %v1742_v60, %s4315_s23  ;;  %1746 = vrot.lane.b32.xlu1 %v1742_v60, %s4317_s27  ;;  %v1753_v59 = vshrl.u32 %v1742_v60, 16  ;;  %s759_s23 = sand.u32 1, %s3360_s26  }
 0x675   : > { %s2952_s2 = scalar_lea.sflag [#allocation3], %s759_s23 }
 0x677   : > { %v1698_v54 = vpop.f32.mrf.mxu2 }
 0x67c   : > { %2108 = vrot.lane.b32.xlu0 %v3822_v2, %s4318_s29  ;;  %1748 = vrot.lane.b32.xlu1 %v1742_v60, %s4316_s28  ;;  %s3081_s28 = sshll.u32 %s759_s23, 5 }
 0x67d   : > { %s4081_s27 = scalar_lea.vmem [#allocation2], %s3081_s28 }
 0x67e   : > { %s2967_s8 = sshll.u32 %s4081_s27, 4  ;;  %s2968_s8 = int_to_ptr.vmem [resolvable:$true] %s2967_s8 }
 0x684   : > { %2112 = vrot.lane.b32.xlu1 %v3842_v61, %s4318_s29  ;;  %2114 = vrot.lane.b32.xlu0 %v3845_v9, %s4318_s29 }
 0x6e6   : > { %v1745_v55 = vpop.permute.xlu0 %1744  ;;  %v1747_v56 = vpop.permute.xlu1 %1746 }
 0x6e7   : > { %v1754_v57 = vshrl.u32 %v1745_v55, 16  ;;  %v1752_v58 = vpack.i.b16 %v1745_v55, %v1742_v60  ;;  %v1759_v2 = vshrl.u32 %v1747_v56, 16 }
 0x6e9   : > { %v1755_v62 = vpack.i.b16 %v1754_v57, %v1753_v59  ;;  %v1766_v11 = vperm.slane %v1752_v58, %v3600_v19 }
 0x6eb   : > { %v1792_v10 = vperm.slane %v1755_v62, %v3600_v19  ;;  %v1774_v4 = vrot.slane %v1766_v11, 4 }
 0x6ed   : > { %v1800_v1 = vrot.slane %v1792_v10, 4 }
 0x6ee   : > { %v1749_v63 = vpop.permute.xlu1 %1748 }
 0x6ef   : > { %v1758_v0 = vpack.i.b16 %v1749_v63, %v1747_v56  ;;  %v1760_v3 = vshrl.u32 %v1749_v63, 16 }
 0x6f1   : > { %v1761_v6 = vpack.i.b16 %v1760_v3, %v1759_v2  ;;  %v1771_v61 = vperm.slane %v1758_v0, %v3600_v19 }
 0x6f3   : > { %v1772_v9 = vrot.slane %v1771_v61, 4  ;;  %v1775_v8 = vsel %vm864_vm1, %v1771_v61, %v1774_v4  ;;  %v1797_v12 = vperm.slane %v1761_v6, %v3600_v19 }
 0x6f4   : > { %v1783_v13 = vperm.slane %v1775_v8, %v3609_v31 }
 0x6f5   : > { %v1773_v14 = vsel %vm864_vm1, %v1772_v9, %v1766_v11  ;;  %v1798_v16 = vrot.slane %v1797_v12, 4  ;;  %v1801_v17 = vsel %vm864_vm1, %v1797_v12, %v1800_v1  ;;  %v2111_v12 = vpop.permute.xlu2 %2110 }
 0x6f6   : > { %v1779_v18 = vperm.slane %v1773_v14, %v3609_v31  ;;  %v1786_v5 = vrot.slane %v1783_v13, 4  ;;  %v1809_v20 = vperm.slane %v1801_v17, %v3609_v31  ;;  %v2109_v14 = vpop.permute.xlu0 %2108 }
 0x6f7   : > { %v1799_v21 = vsel %vm864_vm1, %v1798_v16, %v1792_v10  ;;  %v2113_v16 = vpop.permute.xlu1 %2112 }
 0x6f8   : > { %v1784_v22 = vrot.slane %v1779_v18, 4  ;;  %v1787_v23 = vsel %vm864_vm1, 0, %v1786_v5  ;;  %v1805_v7 = vperm.slane %v1799_v21, %v3609_v31  ;;  %v1812_v24 = vrot.slane %v1809_v20, 4 }
 0x6f9   : > { %v1819_v26 = vrot.slane %v1787_v23, 4  ;;  %v1814_v30 = vsel %vm864_vm1, %v1786_v5, %v1779_v18 }
 0x6fa   : > { %v1785_v27 = vsel %vm864_vm1, 0, %v1784_v22  ;;  %v1810_v28 = vrot.slane %v1805_v7, 4  ;;  %v1813_v29 = vsel %vm864_vm1, 0, %v1812_v24  ;;  %v1833_v37 = vsel %vm864_vm1, %v1812_v24, %v1805_v7 }
 0x6fb   : > { %v1820_v32 = vsel %vm864_vm1, %v1819_v26, %v1785_v27  ;;  %v1838_v33 = vrot.slane %v1813_v29, 4  ;;  %v1818_v39 = vperm.slane %v1814_v30, %v3600_v19  ;;  %v1837_v42 = vperm.slane %v1833_v37, %v3600_v19 }
 0x6fc   : > { %v1811_v34 = vsel %vm864_vm1, 0, %v1810_v28  ;;  %v1824_v36 = vperm.slane %v1820_v32, %v3600_v19 }
 0x6fd   : > { %v1839_v38 = vsel %vm864_vm1, %v1838_v33, %v1811_v34  ;;  %v3997_v13 = vpop.permute.xlu2 %2116 }
 0x6fe   : > { %v1825_v40 = vrot.slane %v1824_v36, 4  ;;  %v1843_v41 = vperm.slane %v1839_v38, %v3600_v19  ;;  %v2115_v20 = vpop.permute.xlu0 %2114  ;;  %v2139_v36 = vshrl.u32 %v2111_v12, 16 }
 0x6ff   : > { %v2140_v32 = vshrl.u32 %v2115_v20, 16  ;;  %v2138_v37 = vpack.i.b16 %v2115_v20, %v2111_v12 }
 0x700   : > { %v1844_v43 = vrot.slane %v1843_v41, 4  ;;  %v1826_v46 = vsel %vm864_vm1, %v1825_v40, %v1818_v39  ;;  %v2126_v40 = vpack.i.b16 %v2113_v16, %v2109_v14 }
 0x701   : > { %v1830_v49 = vperm.slane %v1826_v46, %v3609_v31  ;;  %v2141_v38 = vpack.i.b16 %v2140_v32, %v2139_v36  ;;  %v2128_v46 = vshrl.u32 %v2113_v16, 16 }
 0x702   : > { %v1845_v50 = vsel %vm864_vm1, %v1844_v43, %v1837_v42  ;;  %v2204_v42 = vperm.slane %v2138_v37, %v3600_v19 }
 0x703   : > { %v1849_v51 = vperm.slane %v1845_v50, %v3609_v31  ;;  %v1831_v52 = vrot.slane %v1830_v49, 4  ;;  %v1855_v44 = vshrl.u32 %v1830_v49, 16  ;;  %v2230_v43 = vperm.slane %v2141_v38, %v3600_v19 }
 0x705   : > { %v1854_v53 = vpack.i.b16 %v1849_v51, %v1830_v49  ;;  %v1856_v48 = vshrl.u32 %v1849_v51, 16  ;;  %v1832_v60 = vsel %vm864_vm1, 0, %v1831_v52  ;;  %v1850_v54 = vrot.slane %v1849_v51, 4 }
 0x706   : > { %v1861_v58 = vshrl.u32 %v1832_v60, 16 }
 0x707   : > { %3134 = vmatmul.msk.bf16.vlgmr.msrb.gmra.mxu0 %vm1200_vm2, %v1854_v53  ;;  %v1857_v55 = vpack.i.b16 %v1856_v48, %v1855_v44  ;;  %v1851_v56 = vsel %vm864_vm1, 0, %v1850_v54  ;;  %v2127_v53 = vshrl.u32 %v2109_v14, 16  ;;  %v2152_v48 = vperm.slane %v2126_v40, %v3600_v19 }
 0x708   : > { %v1860_v57 = vpack.i.b16 %v1851_v56, %v1832_v60  ;;  %v1862_v59 = vshrl.u32 %v1851_v56, 16  ;;  %v2212_v60 = vrot.slane %v2204_v42, 4  ;;  %v2238_v56 = vrot.slane %v2230_v43, 4 }
 0x709   : > { %3135 = vmatmul.msk.bf16.vlgmr.msrb.gmra.mxu1 %vm1200_vm2, %v1857_v55 }
 0x70a   : > { %3136 = vmatmul.msk.bf16.vlgmr.msrb.gmra.mxu2 %vm1200_vm2, %v1860_v57  ;;  %v1863_v62 = vpack.i.b16 %v1862_v59, %v1861_v58  ;;  %v2129_v57 = vpack.i.b16 %v2128_v46, %v2127_v53 }
 0x70c   : > { %3137 = vmatmul.msk.bf16.vlgmr.msrb.gmra.mxu3 %vm1200_vm2, %v1863_v62  ;;  %v2178_v14 = vperm.slane %v2129_v57, %v3600_v19 }
 0x784   : > { %v2370_v11 = vpop.f32.mrf.mxu0 }
 0x785   : > { %v2440_v63 = vsel %vm1582_vm11, %v2370_v11, -inf }
 0x786   : > { %v2392_v10 = vpop.f32.mrf.mxu1  ;;  %2441 = vmax.xlane.f32.xlu2 %v2440_v63 }
 0x787   : > { %v2443_v2 = vsel %vm1582_vm11, %v2392_v10, -inf }
 0x788   : > { %2444 = vmax.xlane.f32.xlu1 %v2443_v2 }
 0x78c   : > { %v2372_v0 = vpop.f32.mrf.mxu0 }
 0x78d   : > { %v2414_v3 = vpop.f32.mrf.mxu2 }
 0x78e   : > { %v2394_v4 = vpop.f32.mrf.mxu1  ;;  %v2446_v6 = vsel %vm1582_vm11, %v2414_v3, -inf }
 0x78f   : > { %v2436_v61 = vpop.f32.mrf.mxu3 }
 0x790   : > { %2447 = vmax.xlane.f32.xlu1 %v2446_v6  ;;  %v2449_v1 = vsel %vm1582_vm11, %v2436_v61, -inf }
 0x791   : > { %2450 = vmax.xlane.f32.xlu0 %v2449_v1  ;;  %v2133_v1 = vshrl.u32 %v3997_v13, 16 }
 0x795   : > { %v2416_v9 = vpop.f32.mrf.mxu2 }
 0x797   : > { %v2438_v8 = vpop.f32.mrf.mxu3 }
 0x79e   : > { %2122 = vrot.lane.b32.xlu2 %v3850_v15, %s4318_s29 }
 0x7a5   : > { %2118 = vrot.lane.b32.xlu0 %v3863_v25, %s4318_s29 }
 0x7a9   : > { %2120 = vrot.lane.b32.xlu1 %v3885_v47, %s4318_s29  ;;  %s4323_s29 = smov 24  }
 0x7f9   : > { %v2442_v17 = vpop.xlane.xlu2 %2441 }
 0x7fa   : > { %v2452_v18 = vsub.f32 %v2370_v11, %v2442_v17 }
 0x7fb   : > { %v2445_v5 = vpop.xlane.xlu1 %2444 }
 0x7fc   : > { %v2456_v21 = vmul.f32 1.442695, %v2452_v18  ;;  %v2453_v24 = vsub.f32 %v2392_v10, %v2445_v5  ;;  %v2160_v10 = vrot.slane %v2152_v48, 4 }
 0x7fe   : > { %3286 = vpow2.f32 %v2456_v21  ;;  %v2458_v28 = vmul.f32 1.442695, %v2453_v24 }
 0x801   : > { %v2123_v41 = vpop.permute.xlu2 %2122 }
 0x802   : > { %v2146_v51 = vshrl.u32 %v2123_v41, 16 }
 0x803   : > { %v2448_v22 = vpop.xlane.xlu1 %2447 }
 0x804   : > { %v3999_v23 = vpop.eup %3286  ;;  %v2454_v15 = vsub.f32 %v2414_v3, %v2448_v22  ;;  %v2451_v7 = vpop.xlane.xlu0 %2450 }
 0x805   : > { %v2455_v25 = vsub.f32 %v2436_v61, %v2451_v7  ;;  %v2464_v47 = vsel %vm1582_vm11, %v3999_v23, 0.0 }
 0x806   : > { %v2460_v26 = vmul.f32 1.442695, %v2454_v15  ;;  %2465 = vadd.xlane.f32.xlu2 %v2464_v47 }
 0x807   : > { %v2462_v27 = vmul.f32 1.442695, %v2455_v25 }
 0x808   : > { %3288 = vpow2.f32 %v2460_v26 }
 0x809   : > { %3290 = vpow2.f32 %v2462_v27  ;;  %v2186_v27 = vrot.slane %v2178_v14, 4 }
 0x80a   : > { %3292 = vpow2.f32 %v2458_v28 }
 0x80e   : > { %v4003_v29 = vpop.eup %3288 }
 0x80f   : > { %v4005_v30 = vpop.eup %3290  ;;  %v2470_v33 = vsel %vm1582_vm11, %v4003_v29, 0.0 }
 0x810   : > { %2471 = vadd.xlane.f32.xlu0 %v2470_v33  ;;  %v2473_v34 = vsel %vm1582_vm11, %v4005_v30, 0.0  ;;  %v4011_v39 = vpop.eup %3292 }
 0x811   : > { %2474 = vadd.xlane.f32.xlu1 %v2473_v34  ;;  %v2467_v50 = vsel %vm1582_vm11, %v4011_v39, 0.0 }
 0x817   : > { %v2119_v49 = vpop.permute.xlu0 %2118 }
 0x818   : > { %v2144_v52 = vpack.i.b16 %v2123_v41, %v2119_v49  ;;  %v2145_v44 = vshrl.u32 %v2119_v49, 16  ;;  %2468 = vadd.xlane.f32.xlu0 %v2467_v50 }
 0x81a   : > { %v2147_v54 = vpack.i.b16 %v2146_v51, %v2145_v44  ;;  %v2209_v55 = vperm.slane %v2144_v52, %v3600_v19 }
 0x81b   : > { %v2121_v58 = vpop.permute.xlu1 %2120 }
 0x81c   : > { %v2210_v59 = vrot.slane %v2209_v55, 4  ;;  %v2213_v62 = vsel %vm864_vm1, %v2209_v55, %v2212_v60  ;;  %v2235_v11 = vperm.slane %v2147_v54, %v3600_v19  ;;  %v2132_v63 = vpack.i.b16 %v2121_v58, %v3997_v13 }
 0x81d   : > { %v2221_v2 = vperm.slane %v2213_v62, %v3609_v31  ;;  %v2134_v0 = vshrl.u32 %v2121_v58, 16 }
 0x81e   : > { %v2211_v3 = vsel %vm864_vm1, %v2210_v59, %v2204_v42  ;;  %v2236_v4 = vrot.slane %v2235_v11, 4  ;;  %v2239_v6 = vsel %vm864_vm1, %v2235_v11, %v2238_v56  ;;  %v2157_v61 = vperm.slane %v2132_v63, %v3600_v19 }
 0x81f   : > { %v2217_v9 = vperm.slane %v2211_v3, %v3609_v31  ;;  %v2224_v8 = vrot.slane %v2221_v2, 4  ;;  %v2247_v12 = vperm.slane %v2239_v6, %v3609_v31  ;;  %v2135_v13 = vpack.i.b16 %v2134_v0, %v2133_v1 }
 0x820   : > { %v2237_v16 = vsel %vm864_vm1, %v2236_v4, %v2230_v43  ;;  %v2158_v17 = vrot.slane %v2157_v61, 4  ;;  %v2161_v18 = vsel %vm864_vm1, %v2157_v61, %v2160_v10 }
 0x821   : > { %v2222_v5 = vrot.slane %v2217_v9, 4  ;;  %v2225_v20 = vsel %vm864_vm1, 0, %v2224_v8  ;;  %v2243_v21 = vperm.slane %v2237_v16, %v3609_v31  ;;  %v2250_v22 = vrot.slane %v2247_v12, 4 }
 0x822   : > { %v2295_v15 = vrot.slane %v2225_v20, 4  ;;  %v2159_v7 = vsel %vm864_vm1, %v2158_v17, %v2152_v48  ;;  %v2169_v25 = vperm.slane %v2161_v18, %v3609_v31  ;;  %v2290_v36 = vsel %vm864_vm1, %v2224_v8, %v2217_v9 }
 0x823   : > { %v2223_v47 = vsel %vm864_vm1, 0, %v2222_v5  ;;  %v2248_v24 = vrot.slane %v2243_v21, 4  ;;  %v2251_v26 = vsel %vm864_vm1, 0, %v2250_v22  ;;  %v2165_v33 = vperm.slane %v2159_v7, %v3609_v31 }
 0x824   : > { %v2296_v28 = vsel %vm864_vm1, %v2295_v15, %v2223_v47  ;;  %v2314_v32 = vrot.slane %v2251_v26, 4  ;;  %v2172_v38 = vrot.slane %v2169_v25, 4  ;;  %v2309_v40 = vsel %vm864_vm1, %v2250_v22, %v2243_v21 }
 0x825   : > { %v2249_v34 = vsel %vm864_vm1, 0, %v2248_v24  ;;  %v2300_v37 = vperm.slane %v2296_v28, %v3600_v19  ;;  %v2170_v42 = vrot.slane %v2165_v33, 4  ;;  %v2183_v43 = vperm.slane %v2135_v13, %v3600_v19 }
 0x826   : > { %v2315_v41 = vsel %vm864_vm1, %v2314_v32, %v2249_v34  ;;  %v2173_v50 = vsel %vm864_vm1, 0, %v2172_v38  ;;  %v2294_v51 = vperm.slane %v2290_v36, %v3600_v19  ;;  %v2313_v48 = vperm.slane %v2309_v40, %v3600_v19 }
 0x827   : > { %v2301_v46 = vrot.slane %v2300_v37, 4  ;;  %v2319_v49 = vperm.slane %v2315_v41, %v3600_v19  ;;  %v2171_v52 = vsel %vm864_vm1, 0, %v2170_v42  ;;  %v2184_v44 = vrot.slane %v2183_v43, 4 }
 0x828   : > { %v2187_v53 = vsel %vm864_vm1, %v2183_v43, %v2186_v27  ;;  %v2257_v54 = vrot.slane %v2173_v50, 4  ;;  %v2252_v57 = vsel %vm864_vm1, %v2172_v38, %v2165_v33 }
 0x829   : > { %v2195_v60 = vperm.slane %v2187_v53, %v3609_v31  ;;  %v2320_v55 = vrot.slane %v2319_v49, 4  ;;  %v2185_v56 = vsel %vm864_vm1, %v2184_v44, %v2178_v14  ;;  %v2302_v58 = vsel %vm864_vm1, %v2301_v46, %v2294_v51 }
 0x82a   : > { %v2191_v59 = vperm.slane %v2185_v56, %v3609_v31  ;;  %v2258_v11 = vsel %vm864_vm1, %v2257_v54, %v2171_v52  ;;  %v2256_v4 = vperm.slane %v2252_v57, %v3600_v19  ;;  %v2306_v1 = vperm.slane %v2302_v58, %v3609_v31 }
 0x82b   : > { %v2198_v62 = vrot.slane %v2195_v60, 4  ;;  %v2321_v63 = vsel %vm864_vm1, %v2320_v55, %v2313_v48  ;;  %v2262_v10 = vperm.slane %v2258_v11, %v3600_v19 }
 0x82c   : > { %v2325_v2 = vperm.slane %v2321_v63, %v3609_v31  ;;  %v2196_v0 = vrot.slane %v2191_v59, 4  ;;  %v2307_v5 = vrot.slane %v2306_v1, 4  ;;  %v2343_v25 = vshrl.u32 %v2306_v1, 16 }
 0x82d   : > { %v2199_v3 = vsel %vm864_vm1, 0, %v2198_v62  ;;  %v2263_v6 = vrot.slane %v2262_v10, 4  ;;  %v2271_v8 = vsel %vm864_vm1, %v2198_v62, %v2191_v59 }
 0x82e   : > { %v2276_v61 = vrot.slane %v2199_v3, 4  ;;  %v2197_v9 = vsel %vm864_vm1, 0, %v2196_v0  ;;  %v2326_v16 = vrot.slane %v2325_v2, 4  ;;  %v2275_v20 = vperm.slane %v2271_v8, %v3600_v19 }
 0x82f   : > { %v2264_v14 = vsel %vm864_vm1, %v2263_v6, %v2256_v4  ;;  %v2344_v22 = vshrl.u32 %v2325_v2, 16  ;;  %v2342_v24 = vpack.i.b16 %v2325_v2, %v2306_v1  ;;  %v2308_v26 = vsel %vm864_vm1, 0, %v2307_v5 }
 0x830   : > { %v2277_v12 = vsel %vm864_vm1, %v2276_v61, %v2197_v9  ;;  %v2268_v18 = vperm.slane %v2264_v14, %v3609_v31  ;;  %v2327_v13 = vsel %vm864_vm1, 0, %v2326_v16  ;;  %v2349_v40 = vshrl.u32 %v2308_v26, 16 }
 0x831   : > { %v2281_v17 = vperm.slane %v2277_v12, %v3600_v19  ;;  %v2345_v28 = vpack.i.b16 %v2344_v22, %v2343_v25  ;;  %v2350_v32 = vshrl.u32 %v2327_v13, 16  ;;  %v2348_v38 = vpack.i.b16 %v2327_v13, %v2308_v26 }
 0x832   : > { %v2269_v15 = vrot.slane %v2268_v18, 4  ;;  %v2331_v27 = vshrl.u32 %v2268_v18, 16  ;;  %v2541_v42 = vunpack.c.l.b16 %v2342_v24 }
 0x833   : > { %v2282_v21 = vrot.slane %v2281_v17, 4  ;;  %v2351_v52 = vpack.i.b16 %v2350_v32, %v2349_v40  ;;  %v2561_v48 = vunpack.c.l.b16 %v2345_v28  ;;  %v2581_v54 = vunpack.c.l.b16 %v2348_v38 }
 0x834   : > { %v2270_v36 = vsel %vm864_vm1, 0, %v2269_v15 }
 0x835   : > { %v2283_v7 = vsel %vm864_vm1, %v2282_v21, %v2275_v20  ;;  %v2337_v50 = vshrl.u32 %v2270_v36, 16  ;;  %v2601_v59 = vunpack.c.l.b16 %v2351_v52 }
 0x836   : > { %v2287_v47 = vperm.slane %v2283_v7, %v3609_v31 }
 0x838   : > { %v2330_v33 = vpack.i.b16 %v2287_v47, %v2268_v18  ;;  %v2332_v34 = vshrl.u32 %v2287_v47, 16  ;;  %v2288_v37 = vrot.slane %v2287_v47, 4 }
 0x83a   : > { %v2540_v41 = vunpack.c.l.b16 %v2330_v33  ;;  %v2333_v43 = vpack.i.b16 %v2332_v34, %v2331_v27  ;;  %v2289_v46 = vsel %vm864_vm1, 0, %v2288_v37 }
 0x83b   : > { %v2336_v49 = vpack.i.b16 %v2289_v46, %v2270_v36  ;;  %v2338_v51 = vshrl.u32 %v2289_v46, 16 }
 0x83c   : > { %v2542_v44 = vpack.c.b16 %v2541_v42, %v2540_v41  ;;  %v2560_v53 = vunpack.c.l.b16 %v2333_v43 }
 0x83d   : > { %v2580_v60 = vunpack.c.l.b16 %v2336_v49  ;;  %v2339_v55 = vpack.i.b16 %v2338_v51, %v2337_v50 }
 0x83e   : > { %2554 = vmatpush.bf16.msra.mxu0 %v2542_v44  ;;  %v2562_v56 = vpack.c.b16 %v2561_v48, %v2560_v53 }
 0x83f   : > { %v2582_v57 = vpack.c.b16 %v2581_v54, %v2580_v60  ;;  %v2600_v58 = vunpack.c.l.b16 %v2339_v55 }
 0x840   : > { %2574 = vmatpush.bf16.msra.mxu1 %v2562_v56 }
 0x841   : > { %2594 = vmatpush.bf16.msra.mxu2 %v2582_v57  ;;  %v2602_v62 = vpack.c.b16 %v2601_v59, %v2600_v58 }
 0x843   : > { %2614 = vmatpush.bf16.msra.mxu3 %v2602_v62 }
 0x879   : > { %v2466_v11 = vpop.xlane.xlu2 %2465 }
 0x87a   : > { %3294 = vrcp.f32 %v2466_v11  ;;  %v2487_v3 = vand.u32 2147483648, %v2466_v11  ;;  %v2485_v61 = vand.u32 2147483647, %v2466_v11  ;;  %vm2481_vm5 = vweird.f32 %v2466_v11 }
 0x87c   : > { %v2488_v9 = vor.u32 1.1754944e-38, %v2487_v3  ;;  %vm2486_vm7 = vcmp.eq.f32.partialorder %v2485_v61, 8.507059e+37 }
 0x880   : > { %v3295_v63 = vpop.eup %3294 }
 0x881   : > { %v2477_v10 = vmul.f32 %v3295_v63, %v2466_v11  ;;  %vm2482_vm4 = vweird.f32 %v3295_v63 }
 0x882   : > { %vm2483_vm6 = vmor %vm2481_vm5, %vm2482_vm4 }
 0x883   : > { %v2478_v2 = vsub.f32 1.0, %v2477_v10  ;;  %v2472_v0 = vpop.xlane.xlu0 %2471 }
 0x884   : > { %3296 = vrcp.f32 %v2472_v0  ;;  %v2475_v4 = vpop.xlane.xlu1 %2474  ;;  %v2517_v15 = vand.u32 2147483648, %v2472_v0  ;;  %v2515_v25 = vand.u32 2147483647, %v2472_v0  ;;  %vm2511_vm10 = vweird.f32 %v2472_v0 }
 0x885   : > { %v2479_v6 = vmul.f32 %v3295_v63, %v2478_v2  ;;  %3298 = vrcp.f32 %v2475_v4  ;;  %v2532_v47 = vand.u32 2147483648, %v2475_v4  ;;  %v2530_v24 = vand.u32 2147483647, %v2475_v4 }
 0x886   : > { %v2518_v28 = vor.u32 1.1754944e-38, %v2517_v15  ;;  %vm2526_vm14 = vweird.f32 %v2475_v4  ;;  %vm2516_vm15 = vcmp.eq.f32.partialorder %v2515_v25, 8.507059e+37 }
 0x887   : > { %v2480_v1 = vadd.f32 %v3295_v63, %v2479_v6  ;;  %v2533_v34 = vor.u32 1.1754944e-38, %v2532_v47  ;;  %vm2531_vm4 = vcmp.eq.f32.partialorder %v2530_v24, 8.507059e+37 }
 0x889   : > { %v2484_v8 = vsel %vm2483_vm6, %v3295_v63, %v2480_v1 }
 0x88a   : > { %v3297_v12 = vpop.eup %3296  ;;  %v2489_v14 = vsel %vm2486_vm7, %v2488_v9, %v2484_v8 }
 0x88b   : > { %v3299_v16 = vpop.eup %3298  ;;  %v2490_v17 = vmul.f32 %v3999_v23, %v2489_v14  ;;  %v2507_v18 = vmul.f32 %v3297_v12, %v2472_v0  ;;  %v2469_v5 = vpop.xlane.xlu0 %2468  ;;  %vm2512_vm8 = vweird.f32 %v3297_v12 }
 0x88c   : > { %v2522_v20 = vmul.f32 %v3299_v16, %v2475_v4  ;;  %3300 = vrcp.f32 %v2469_v5  ;;  %vm2527_vm9 = vweird.f32 %v3299_v16  ;;  %vm2513_vm13 = vmor %vm2511_vm10, %vm2512_vm8  ;;  %v2502_v46 = vand.u32 2147483648, %v2469_v5 }
 0x88d   : > { %2676 = vst.msk [vmem:[%s4081_s27] sm:$0xff] %vm1582_vm11, %v2490_v17  ;;  %v2508_v21 = vsub.f32 1.0, %v2507_v18  ;;  %v2536_v22 = vpack.c.bf16 %v2490_v17, %v2490_v17  ;;  %vm2528_vm3 = vmor %vm2526_vm14, %vm2527_vm9  ;;  %v2500_v50 = vand.u32 2147483647, %v2469_v5  ;;  %vm2496_vm6 = vweird.f32 %v2469_v5 }
 0x88e   : > { %v2523_v13 = vsub.f32 1.0, %v2522_v20 }
 0x88f   : > { %v2509_v7 = vmul.f32 %v3297_v12, %v2508_v21  ;;  %3138 = vmatmul.msk.bf16.vlgmr.msra.gmra.mxu0 %vm1582_vm11, %v2536_v22  ;;  %vm2501_vm8 = vcmp.eq.f32.partialorder %v2500_v50, 8.507059e+37 }
 0x890   : > { %v2524_v23 = vmul.f32 %v3299_v16, %v2523_v13 }
 0x891   : > { %v2510_v26 = vadd.f32 %v3297_v12, %v2509_v7 }
 0x892   : > { %v3301_v27 = vpop.eup %3300  ;;  %v2525_v32 = vadd.f32 %v3299_v16, %v2524_v23 }
 0x893   : > { %v2514_v33 = vsel %vm2513_vm13, %v3297_v12, %v2510_v26  ;;  %v2492_v36 = vmul.f32 %v3301_v27, %v2469_v5  ;;  %vm2497_vm5 = vweird.f32 %v3301_v27 }
 0x894   : > { %v2519_v37 = vsel %vm2516_vm15, %v2518_v28, %v2514_v33  ;;  %v2529_v38 = vsel %vm2528_vm3, %v3299_v16, %v2525_v32  ;;  %vm2498_vm7 = vmor %vm2496_vm6, %vm2497_vm5 }
 0x895   : > { %v2520_v40 = vmul.f32 %v4003_v29, %v2519_v37  ;;  %v2534_v41 = vsel %vm2531_vm4, %v2533_v34, %v2529_v38  ;;  %v2493_v42 = vsub.f32 1.0, %v2492_v36  ;;  %v2503_v29 = vor.u32 1.1754944e-38, %v2502_v46 }
 0x896   : > { %v2535_v43 = vmul.f32 %v4005_v30, %v2534_v41 }
 0x897   : > { %2678 = vst.msk [vmem:[%s4081_s27 + $0x10] sm:$0xff] %vm1582_vm11, %v2520_v40  ;;  %v2494_v49 = vmul.f32 %v3301_v27, %v2493_v42  ;;  %v2538_v51 = vpack.c.bf16 %v2520_v40, %v2520_v40 }
 0x898   : > { %2679 = vst.msk [vmem:[%s4081_s27 + $0x18] sm:$0xff] %vm1582_vm11, %v2535_v43  ;;  %v2539_v52 = vpack.c.bf16 %v2535_v43, %v2535_v43 }
 0x899   : > { %v2495_v44 = vadd.f32 %v3301_v27, %v2494_v49  ;;  %3140 = vmatmul.msk.bf16.vlgmr.msra.gmra.mxu2 %vm1582_vm11, %v2538_v51 }
 0x89a   : > { %3141 = vmatmul.msk.bf16.vlgmr.msra.gmra.mxu3 %vm1582_vm11, %v2539_v52 }
 0x89b   : > { %v2499_v30 = vsel %vm2498_vm7, %v3301_v27, %v2495_v44 }
 0x89c   : > { %v2504_v53 = vsel %vm2501_vm8, %v2503_v29, %v2499_v30 }
 0x89d   : > { %v2505_v48 = vmul.f32 %v4011_v39, %v2504_v53 }
 0x89f   : > { %2677 = vst.msk [vmem:[%s4081_s27 + $0x8] sm:$0xff] %vm1582_vm11, %v2505_v48  ;;  %v2537_v60 = vpack.c.bf16 %v2505_v48, %v2505_v48 }
 0x8a1   : > { %3139 = vmatmul.msk.bf16.vlgmr.msra.gmra.mxu1 %vm1582_vm11, %v2537_v60 }
 0x90c   : > { %v2556_v54 = vpop.f32.mrf.mxu0 }
 0x90d   : > { %v2622_v56 = vrot.slane %v2556_v54, 4 }
 0x914   : > { %v2558_v55 = vpop.f32.mrf.mxu0 }
 0x91c   : > { %v2596_v57 = vpop.f32.mrf.mxu2 }
 0x91d   : > { %v2620_v58 = vrot.slane %v2596_v57, 4  ;;  %v2623_v59 = vsel %vm864_vm1, %v2596_v57, %v2622_v56  ;;  %v2616_v62 = vpop.f32.mrf.mxu3 }
 0x91e   : > { %v2631_v11 = vperm.slane %v2623_v59, %v3600_v19  ;;  %v2632_v63 = vrot.slane %v2616_v62, 4  ;;  %v2576_v10 = vpop.f32.mrf.mxu1 }
 0x91f   : > { %v2621_v2 = vsel %vm864_vm1, %v2620_v58, %v2556_v54  ;;  %v2634_v39 = vrot.slane %v2576_v10, 4 }
 0x920   : > { %v2627_v0 = vperm.slane %v2621_v2, %v3600_v19  ;;  %v2633_v3 = vsel %vm864_vm1, %v2632_v63, %v2576_v10  ;;  %v2658_v1 = vrot.slane %v2631_v11, 4  ;;  %v3192_v10 = vld [vmem:[%s4252_s13] sm:$0xff] }
 0x921   : > { %v2635_v4 = vsel %vm864_vm1, %v2616_v62, %v2634_v39  ;;  %v2639_v6 = vperm.slane %v2633_v3, %v3600_v19 }
 0x922   : > { %v2646_v61 = vrot.slane %v2627_v0, 4  ;;  %v2643_v9 = vperm.slane %v2635_v4, %v3600_v19 }
 0x923   : > { %v2644_v8 = vrot.slane %v2639_v6, 4 }
 0x924   : > { %v2647_v12 = vsel %vm864_vm1, %v2639_v6, %v2646_v61  ;;  %v2656_v14 = vrot.slane %v2643_v9, 4  ;;  %v2659_v16 = vsel %vm864_vm1, %v2643_v9, %v2658_v1  ;;  %v2598_v17 = vpop.f32.mrf.mxu2  ;;  %v3259_v1 = vld [vmem:[%s4253_s14] ss:$0 sm:$0xff] }
 0x925   : > { %v2645_v18 = vsel %vm864_vm1, %v2644_v8, %v2627_v0  ;;  %v2655_v5 = vperm.slane %v2647_v12, %v3609_v31  ;;  %v2667_v20 = vperm.slane %v2659_v16, %v3609_v31  ;;  %v2618_v21 = vpop.f32.mrf.mxu3 }
 0x926   : > { %v2651_v22 = vperm.slane %v2645_v18, %v3609_v31  ;;  %v2657_v15 = vsel %vm864_vm1, %v2656_v14, %v2631_v11  ;;  %v2578_v13 = vpop.f32.mrf.mxu1 }
 0x927   : > { %v2663_v7 = vperm.slane %v2657_v15, %v3609_v31  ;;  %v2670_v25 = vrot.slane %v2655_v5, 4  ;;  %v2674_v47 = vrot.slane %v2667_v20, 4  ;;  %v3199_v15 = vld [vmem:[%s4258_s19 + $0x18] sm:$0xff] }
 0x928   : > { %v2668_v23 = vrot.slane %v2651_v22, 4  ;;  %2902 = vmatpush.bf16.msrb.mxu2 %v3199_v15 }
 0x929   : > { %v2671_v24 = vsel %vm864_vm1, 0.0, %v2670_v25  ;;  %v2672_v26 = vrot.slane %v2663_v7, 4  ;;  %v2675_v27 = vsel %vm864_vm1, 0.0, %v2674_v47  ;;  %v2680_v28 = vsel %vm864_vm1, %v2670_v25, %v2651_v22  ;;  %v3195_v22 = vld [vmem:[%s4256_s17 + $0x8] sm:$0xff]  ;;  %v3198_v25 = vld [vmem:[%s4258_s19 + $0x10] sm:$0xff] }
 0x92a   : > { %v2669_v32 = vsel %vm864_vm1, 0.0, %v2668_v23  ;;  %v2684_v33 = vperm.slane %v2680_v28, %v3600_v19  ;;  %v2685_v34 = vrot.slane %v2671_v24, 4  ;;  %v2696_v36 = vrot.slane %v2675_v27, 4  ;;  %2849 = vmatpush.bf16.msrb.mxu1 %v3195_v22 }
 0x92b   : > { %v2673_v37 = vsel %vm864_vm1, 0.0, %v2672_v26  ;;  %v2691_v38 = vsel %vm864_vm1, %v2674_v47, %v2663_v7 }
 0x92c   : > { %v2686_v40 = vsel %vm864_vm1, %v2685_v34, %v2669_v32  ;;  %v2695_v41 = vperm.slane %v2691_v38, %v3600_v19  ;;  %v2697_v42 = vsel %vm864_vm1, %v2696_v36, %v2673_v37  ;;  %v2704_v43 = vrot.slane %v2684_v33, 4  ;;  %2903 = vmatpush.bf16.msrb.mxu2 %v3198_v25  ;;  %v3261_v36 = vld [vmem:[%s4255_s16] ss:$0 sm:$0xff] }
 0x92d   : > { %v2690_v46 = vperm.slane %v2686_v40, %v3600_v19  ;;  %v2701_v49 = vperm.slane %v2697_v42, %v3600_v19  ;;  %v3197_v42 = vld [vmem:[%s4258_s19 + $0x8] sm:$0xff] }
 0x92e   : > { %v2716_v50 = vrot.slane %v2695_v41, 4 }
 0x92f   : > { %v2705_v51 = vsel %vm864_vm1, %v2690_v46, %v2704_v43  ;;  %v2702_v52 = vrot.slane %v2690_v46, 4  ;;  %v2714_v44 = vrot.slane %v2701_v49, 4  ;;  %v3196_v43 = vld [vmem:[%s4258_s19] sm:$0xff] }
 0x930   : > { %v2713_v29 = vperm.slane %v2705_v51, %v3609_v31  ;;  %v2717_v30 = vsel %vm864_vm1, %v2701_v49, %v2716_v50  ;;  %2904 = vmatpush.bf16.msrb.mxu2 %v3197_v42  ;;  %v3262_v46 = vld [vmem:[%s4257_s18] ss:$0 sm:$0xff] }
 0x931   : > { %v2725_v53 = vperm.slane %v2717_v30, %v3609_v31  ;;  %v2703_v48 = vsel %vm864_vm1, %v2702_v52, %v2684_v33  ;;  %v2715_v60 = vsel %vm864_vm1, %v2714_v44, %v2695_v41  ;;  %v3260_v33 = vld [vmem:[%s4254_s15] ss:$0 sm:$0xff] }
 0x932   : > { %v2732_v54 = vrot.slane %v2713_v29, 4  ;;  %v2709_v55 = vperm.slane %v2703_v48, %v3609_v31  ;;  %v2721_v19 = vperm.slane %v2715_v60, %v3609_v31  ;;  %v3193_v31 = vld [vmem:[%s4252_s13 + $0x8] sm:$0xff] }
 0x933   : > { %v2730_v56 = vrot.slane %v2725_v53, 4  ;;  %2779 = vmatpush.bf16.msrb.mxu0 %v3193_v31 }
 0x934   : > { %v2733_v57 = vsel %vm864_vm1, %v2725_v53, %v2732_v54  ;;  %v2726_v58 = vrot.slane %v2721_v19, 4  ;;  %v2728_v59 = vrot.slane %v2709_v55, 4  ;;  %2905 = vmatpush.bf16.msrb.mxu2 %v3196_v43 }
 0x935   : > { %2743 = vrot.lane.b32.xlu0 %v2733_v57, %s4323_s29  ;;  %v2731_v62 = vsel %vm864_vm1, %v2730_v56, %v2713_v29  ;;  %v3263_v29 = vld [vmem:[%s4259_s20] ss:$0 sm:$0xff] }
 0x936   : > { %2739 = vrot.lane.b32.xlu2 %v2731_v62, %s4324_s0  ;;  %v2729_v11 = vsel %vm864_vm1, %v2721_v19, %v2728_v59  ;;  %v2727_v63 = vsel %vm864_vm1, %v2726_v58, %v2709_v55  ;;  %s3200_s0 = sshll.u32 %s3529_s6, 5  ;;  %s3326_s6 = scalar_lea.hbm %s4263_s24, 64 }
 0x937   : > { %2735 = vrot.lane.b32.xlu1 %v2729_v11, %s4325_s5  ;;  %2780 = vmatpush.bf16.msrb.mxu0 %v3192_v10  ;;  %s2966_s25 = scalar_lea.hbm %s4263_s24, %s3200_s0 }
 0x938   : > { %s2969_s4 = sshll.u32 %s2966_s25, 4  ;;  %s2970_s4 = int_to_ptr.hbm [resolvable:$true] %s2969_s4 }
 0x939   : > { %s3320_s28 = sshra.s32 %s2970_s4, 4  ;;  %s3321_s28 = int_to_ptr.hbm [resolvable:$true] %s3320_s28 }
 0x93a   : > { %s3322_s29 = scalar_lea.hbm %s3321_s28, 32  ;;  %p3327_p0 = scmp.lt.s32.totalorder %s3321_s28, %s4263_s24 }
 0x93b   : > { %p3323_p11 = scmp.ne.s32.totalorder %s3321_s28, %s3322_s29  ;;  %p3328_p1 = scmp.lt.s32.totalorder %s3326_s6, %s3322_s29 }
 0x93d   : > { %p3324_p12 = pnand %p3323_p11, %p3546_p5  ;;  %p3329_p2 = por %p3328_p1, %p3327_p0 }
 0x93f   : > { %p3325_p13 = pneg %p3324_p12 }
 0x941   : > { %p3330_p3 = pnand %p3329_p2, %p3325_p13 }
 0x990   : > { %v2740_v39 = vpop.permute.xlu2 %2739 }
 0x9a7   : > { %v2744_v3 = vpop.permute.xlu0 %2743 }
 0x9a9   : > { %v2736_v2 = vpop.permute.xlu1 %2735 }
 0x9aa   : > { %v2746_v0 = vsel %vm1200_vm2, %v2727_v63, %v2736_v2 }
 0x9ab   : > { %v2747_v4 = vsel %vm1582_vm11, %v2746_v0, %v2740_v39 }
 0x9ac   : > { %v2748_v6 = vsel %vm1584_vm12, %v2747_v4, %v2744_v3  ;;  %vm2894_vm12 = vcmask 523264  }
 0x9ad   : > { %v2749_v61 = vpack.c.bf16 %v2748_v6, %v2748_v6 }
 0x9af   : > { %3150 = vmatmul.msk.bf16.vlgmr.msrb.gmra.mxu0 %vm816_vm0, %v2749_v61 }
 0xa2c   : > { %v2782_v9 = vpop.f32.mrf.mxu0 }
 0xa2d   : > { %v2783_v8 = vadd.f32 %v3259_v1, %v2782_v9 }
 0xa2f   : > { %v2788_v12 = vadd.f32 %v2783_v8, %v3871_v35  ;;  %v3194_v35 = vld [vmem:[%s4256_s17] sm:$0xff] }
 0xa30   : > { %2850 = vmatpush.bf16.msrb.mxu1 %v3194_v35 }
 0xa31   : > { %v2789_v14 = vsel %vm816_vm0, %v2788_v12, 0.0 }
 0xa32   : > { %2790 = vadd.xlane.f32.xlu1 %v2789_v14 }
 0xa34   : > { %v2784_v16 = vpop.f32.mrf.mxu0 }
 0xaa5   : > { %v2791_v17 = vpop.xlane.xlu1 %2790 }
 0xaa6   : > { %v2792_v18 = vmul.f32 %v2791_v17, %v3820_v45 }
 0xaa8   : > { %v2793_v5 = vsub.f32 %v2788_v12, %v2792_v18 }
 0xaaa   : > { %v2794_v20 = vmul.f32 %v2793_v5, %v2793_v5 }
 0xaac   : > { %v2795_v21 = vsel %vm816_vm0, %v2794_v20, 0.0 }
 0xaad   : > { %2796 = vadd.xlane.f32.xlu2 %v2795_v21 }
 0xb20   : > { %v2797_v13 = vpop.xlane.xlu2 %2796 }
 0xb21   : > { %v2798_v7 = vmul.f32 %v2797_v13, %v3820_v45 }
 0xb23   : > { %v2799_v47 = vadd.f32 1e-05, %v2798_v7 }
 0xb25   : > { %3302 = vrsqrt.f32 %v2799_v47  ;;  %vm2806_vm2 = vweird.f32 %v2799_v47 }
 0xb2b   : > { %v3303_v23 = vpop.eup %3302 }
 0xb2c   : > { %v2801_v24 = vmul.f32 %v3303_v23, %v2799_v47  ;;  %vm2807_vm1 = vweird.f32 %v3303_v23 }
 0xb2d   : > { %vm2808_vm11 = vmor %vm2806_vm2, %vm2807_vm1 }
 0xb2e   : > { %v2802_v26 = vmul.f32 %v3303_v23, %v2801_v24 }
 0xb30   : > { %v2803_v27 = vmul.f32 0.5, %v2802_v26 }
 0xb32   : > { %v2804_v28 = vsub.f32 1.5, %v2803_v27 }
 0xb34   : > { %v2805_v32 = vmul.f32 %v3303_v23, %v2804_v28 }
 0xb36   : > { %v2809_v34 = vsel %vm2808_vm11, %v3303_v23, %v2805_v32 }
 0xb37   : > { %v2810_v37 = vmul.f32 %v2809_v34, %v2793_v5 }
 0xb39   : > { %v2814_v38 = vmul.f32 %v3260_v33, %v2810_v37 }
 0xb3b   : > { %v2818_v40 = vadd.f32 %v3261_v36, %v2814_v38 }
 0xb3d   : > { %v2819_v41 = vpack.c.bf16 %v2818_v40, %v2818_v40 }
 0xb3f   : > { %3159 = vmatmul.msk.bf16.vlgmr.msrb.gmra.mxu1 %vm816_vm0, %v2819_v41 }
 0xbbc   : > { %v2852_v49 = vpop.f32.mrf.mxu1 }
 0xbbd   : > { %v2853_v50 = vadd.f32 %v3262_v46, %v2852_v49 }
 0xbbf   : > { %v2856_v51 = vmax.f32 %v2853_v50, 0.0 }
 0xbc1   : > { %v2857_v52 = vpack.c.bf16 %v2856_v51, %v2856_v51 }
 0xbc3   : > { %3176 = vmatmul.msk.bf16.vlgmr.msrb.gmra.mxu2 %vm2894_vm12, %v2857_v52 }
 0xbc4   : > { %v2854_v44 = vpop.f32.mrf.mxu1 }
 0xc46   : > { %v2907_v30 = vpop.f32.mrf.mxu2 }
 0xc47   : > { %v2908_v53 = vadd.f32 %v3263_v29, %v2907_v30 }
 0xc49   : > { %v2913_v48 = vadd.f32 %v2908_v53, %v2818_v40 }
 0xc4b   : > { %v2914_v60 = vsel %vm816_vm0, %v2913_v48, 0.0 }
 0xc4c   : > { %2915 = vadd.xlane.f32.xlu0 %v2914_v60 }
 0xc4e   : > { %v2909_v54 = vpop.f32.mrf.mxu2 }
 0xcbf   : > { %v2916_v55 = vpop.xlane.xlu0 %2915 }
 0xcc0   : > { %v2917_v19 = vmul.f32 %v2916_v55, %v3820_v45 }
 0xcc2   : > { %v2918_v56 = vsub.f32 %v2913_v48, %v2917_v19 }
 0xcc4   : > { %v2919_v57 = vmul.f32 %v2918_v56, %v2918_v56 }
 0xcc6   : > { %v2920_v58 = vsel %vm816_vm0, %v2919_v57, 0.0 }
 0xcc7   : > { %2921 = vadd.xlane.f32.xlu1 %v2920_v58 }
 0xcc8   : > { %3333 = shalt.err (!%p3330_p3)
}
 0xcc9   : > { %s3382_s23 = smov 128   ;;  %v3264_v3 = vld [vmem:[%s4260_s21] ss:$0 sm:$0xff]  ;;  %s3085_s27 = sshll.u32 %s3564_s7, 2  ;;  %vm2945_vm13 = vcmask 257024  }
 0xcca   : > { %3201 = dma.vmem_to_hbm [thread:$0]  (%p3546_p5), %s2968_s8, 512, %s2970_s4, %s2952_s2, %s3382_s23, %s3382_s23, %s4325_s5  }
 0xccb   : > { %s4326_s1 = sld [smem:[#allocation23_spill]] }
 0xcd1   : > { %s777_s25 = scalar_lea.vmem %s4326_s1, %s3085_s27 }
 0xd3a   : > { %v2922_v59 = vpop.xlane.xlu1 %2921 }
 0xd3b   : > { %v2923_v62 = vmul.f32 %v2922_v59, %v3820_v45  ;;  %v3265_v45 = vld [vmem:[%s4261_s22] ss:$0 sm:$0xff] }
 0xd3d   : > { %v2924_v11 = vadd.f32 1e-05, %v2923_v62 }
 0xd3f   : > { %3304 = vrsqrt.f32 %v2924_v11  ;;  %vm2931_vm9 = vweird.f32 %v2924_v11 }
 0xd45   : > { %v3305_v63 = vpop.eup %3304 }
 0xd46   : > { %v2926_v31 = vmul.f32 %v3305_v63, %v2924_v11  ;;  %vm2932_vm0 = vweird.f32 %v3305_v63 }
 0xd47   : > { %vm2933_vm10 = vmor %vm2931_vm9, %vm2932_vm0 }
 0xd48   : > { %v2927_v10 = vmul.f32 %v3305_v63, %v2926_v31 }
 0xd4a   : > { %v2928_v2 = vmul.f32 0.5, %v2927_v10 }
 0xd4c   : > { %v2929_v39 = vsub.f32 1.5, %v2928_v2 }
 0xd4e   : > { %v2930_v0 = vmul.f32 %v3305_v63, %v2929_v39 }
 0xd50   : > { %v2934_v4 = vsel %vm2933_vm10, %v3305_v63, %v2930_v0 }
 0xd51   : > { %v2935_v6 = vmul.f32 %v2934_v4, %v2918_v56 }
 0xd53   : > { %v2939_v61 = vmul.f32 %v3264_v3, %v2935_v6 }
 0xd55   : > { %v2943_v1 = vadd.f32 %v3265_v45, %v2939_v61 }
 0xd57   : > { %v2944_v9 = vpack.c.bf16 %v2943_v1, %v2943_v1 }
 0xd59   : > { %2946 = vst.msk [vmem:[%s777_s25] sm:$0xf] %vm2945_vm13, %v2944_v9 }
 0xd5a PF: > { %s4327_s8 = sld [smem:[#allocation7_spill]] }
 0xd5b   : > { %s4328_s4 = sld [smem:[#allocation5_spill]] }
 0xd60   : > { %p3207_p4 = scmp.ge.s32.totalorder %s4327_s8, 2 }
 0xd61   : > { %s2991_s28 = sand.u32 1, %s4328_s4  }
 0xd62   : > { %p3204_p5 = pnand %p3207_p4, %p3550_p6  ;;  %s2992_s29 = scalar_lea.sflag [#allocation3], %s2991_s28 }
 0xd64   : > { %p3205_p7 = pneg %p3204_p5 }
 0xd66   : > { %3351 = dma.done.wait (%p3205_p7), %s2992_s29, 512  }
 0xd67   : > { %3353 = vsyncadd (%p3205_p7), %s2992_s29, 4294966784  ;;  %s4330_s28 = sld [smem:[#allocation8_spill]]  ;;  %s4333_s5 = smov %s3360_s26 }
 0xd68   : > { %s4331_s7 = sld [smem:[#allocation6_spill]] }
 0xd69   : > { %s4332_s27 = sld [smem:[#allocation9_spill]] }
 0xd6d   : > { %p35_p8 = scmp.ge.s32.totalorder %s4330_s28, 4  }
 0xd6e   : > { %s4334_s26 = smov %s4331_s7 }
 0xd6f   :  { %37 = sbr.rel (!%p35_p8) target bundleno = 17 (0x11), region = 165 }
 0xd74   :  { %2998 = vsyncpa [#allocation3], 1 }
 0xd75   :  { %3000 = vsyncpa [#allocation3 + $0x1], 1 }

</bundles_post_ra>
